<compile_context>
chip_gen: v6e
topology: v6e:2x2x1
jax: 0.10.0
libtpu: 0.0.40
codegen_flags: <defaults>
</compile_context>

<pallas_src>
import functools
import numpy as np

import jax
import jax.numpy as jnp
from jax import lax
from jax.experimental import pallas as pl
from jax.experimental.pallas import tpu as pltpu


# ---------------------------------------------------------------------------
# Trace-time constant builders (numpy)
# ---------------------------------------------------------------------------
def _axis_pool_matrix(n_in, n_out):
    m = np.zeros((n_out, n_in), np.float32)
    for i in range(n_out):
        s = (i * n_in) // n_out
        e = -((-(i + 1) * n_in) // n_out)   # ceil
        m[i, s:e] = 1.0 / (e - s)
    return m


def _adaptive_pool_matrix(h_in, w_in, h_out, w_out):
    """(h_in*w_in, h_out*w_out): out = X_flat @ A for X with (C, H*W) layout."""
    mh = _axis_pool_matrix(h_in, h_out)
    mw = _axis_pool_matrix(w_in, w_out)
    a = np.einsum("ph,qw->hwpq", mh, mw).reshape(h_in * w_in, h_out * w_out)
    return a.astype(np.float32)


def _conv_gather_mats(h_in, w_in, k, stride, pad):
    """Per-tap 0/1 gather matrices G[t] (h_in*w_in, h_out*w_out)."""
    h_out = (h_in + 2 * pad - k) // stride + 1
    w_out = (w_in + 2 * pad - k) // stride + 1
    g = np.zeros((k * k, h_in * w_in, h_out * w_out), np.float32)
    for kh in range(k):
        for kw in range(k):
            t = kh * k + kw
            for ho in range(h_out):
                hi = stride * ho + kh - pad
                if not (0 <= hi < h_in):
                    continue
                for wo in range(w_out):
                    wi = stride * wo + kw - pad
                    if 0 <= wi < w_in:
                        g[t, hi * w_in + wi, ho * w_out + wo] = 1.0
    return g, h_out, w_out


def _maxpool_select_mats(h_in, w_in):
    """4 column-select matrices for MaxPool2d(2,2) (floor mode)."""
    h_out, w_out = h_in // 2, w_in // 2
    s = np.zeros((4, h_in * w_in, h_out * w_out), np.float32)
    for a, (dh, dw) in enumerate(((0, 0), (0, 1), (1, 0), (1, 1))):
        for ho in range(h_out):
            for wo in range(w_out):
                s[a, (2 * ho + dh) * w_in + (2 * wo + dw), ho * w_out + wo] = 1.0
    return s, h_out, w_out


def _fc_pool_mats(h_in, feat, h_out, w_out):
    """kpool[h] (feat, h_out*w_out): out5 = sum_h out4_h @ kpool[h]."""
    mh = _axis_pool_matrix(h_in, h_out)
    mw = _axis_pool_matrix(feat, w_out)
    k = np.einsum("ph,qj->hjpq", mh, mw).reshape(h_in, feat, h_out * w_out)
    return k.astype(np.float32)


# ---------------------------------------------------------------------------
# The single fused Pallas kernel (one grid step == one batch element)
# ---------------------------------------------------------------------------
def _fused_forward_kernel(
    patches_ref,                       # (1, Cin*9, N1)
    w1_ref, s1_ref,                    # (A4, Cin*9), (A4, 1)
    w2_ref, s2_ref, g2_ref,            # (9, A4, A4), (A4, 1), (9, N1, N2)
    w3_ref, s3_ref, g3_ref,            # (9, A4, A4), (A4, 1), (9, N2, N2)
    mp_ref,                            # (4, N2, N3)
    wq_ref, bq_ref,                    # (C8, A4), (C8, 1)
    wk_ref, bk_ref,                    # (C8, A4), (C8, 1)
    wv_ref, bv_ref,                    # (A4, A4), (A4, 1)
    gamma_ref,                         # (1, 1)
    ap_att_ref,                        # (N3, PP)
    wc1_ref, bc1_ref, gc1_ref,         # (9, nA, A4), (nA, 1), (9, PP, PP)
    fc1w_ref, fc1b_ref,                # (1, F1), (1, F1)
    fc2w_ref, fc2b_ref,                # (F1, 8), (1, 8)
    kpool_ref,                         # (N3, 8, PP)
    boxes_ref, att4_ref, att3_ref,     # (1, A4, PP), (1, nA, PP), (1, nA, PP)
    *, num_anchors,
):
    f32 = jnp.float32

    def mm(a, b):
        return jnp.dot(a, b, preferred_element_type=f32)

    def conv_taps(x, w_taps, g_taps, shift):
        acc = shift
        for t in range(9):
            acc = acc + mm(w_taps[t], mm(x, g_taps[t]))
        return acc

    # ---- conv stack: layer1 + layer2 + layer3 (BN folded) + 2x2 maxpool ----
    x1 = jnp.maximum(mm(w1_ref[...], patches_ref[0]) + s1_ref[...], 0.0)   # (A4, N1)
    x2 = jnp.maximum(conv_taps(x1, w2_ref, g2_ref, s2_ref[...]), 0.0)      # (A4, N2)
    x3 = jnp.maximum(conv_taps(x2, w3_ref, g3_ref, s3_ref[...]), 0.0)      # (A4, N2)
    p0 = mm(x3, mp_ref[0])
    p1 = mm(x3, mp_ref[1])
    p2 = mm(x3, mp_ref[2])
    p3 = mm(x3, mp_ref[3])
    out2 = jnp.maximum(jnp.maximum(p0, p1), jnp.maximum(p2, p3))           # (A4, N3)

    # ---- self-attention: q/k/v 1x1 convs + softmax + gamma*out + residual ----
    q = mm(wq_ref[...], out2) + bq_ref[...]            # (C8, N3)
    k = mm(wk_ref[...], out2) + bk_ref[...]            # (C8, N3)
    v = mm(wv_ref[...], out2) + bv_ref[...]            # (A4, N3)
    n3 = q.shape[1]
    # transpose q via identity matmul (trans_b dot_general; no relayout needed)
    eye = (lax.broadcasted_iota(jnp.int32, (n3, n3), 0) ==
           lax.broadcasted_iota(jnp.int32, (n3, n3), 1)).astype(f32)
    q_t = lax.dot_general(eye, q, (((1,), (1,)), ((), ())),
                          preferred_element_type=f32)                      # (N3, C8)
    energy = mm(q_t, k)                                                    # (N3, N3)
    energy = energy - jnp.max(energy, axis=-1, keepdims=True)
    ex = jnp.exp(energy)
    att = ex / jnp.sum(ex, axis=-1, keepdims=True)                         # softmax rows
    # out[c, i] = sum_j v[c, j] * att[i, j]  ==  v @ att^T
    att_out = lax.dot_general(v, att, (((1,), (1,)), ((), ())),
                              preferred_element_type=f32)                  # (A4, N3)
    outatt1 = gamma_ref[...] * att_out + out2                              # (A4, N3)

    # ---- attention head: adaptive pool -> conv c1 + ReLU -> (tanh > 0.4) ----
    outatt2 = mm(outatt1, ap_att_ref[...])                                 # (A4, PP)
    a3 = bc1_ref[...]
    for t in range(9):
        a3 = a3 + mm(wc1_ref[t], mm(outatt2, gc1_ref[t]))
    outatt3 = jnp.maximum(a3, 0.0)                                         # (nA, PP)
    outatt4 = (jnp.tanh(outatt3) > 0.4).astype(f32)
    att3_ref[0] = outatt3
    att4_ref[0] = outatt4

    # ---- fc branch: Linear(1,F1)+ReLU (VPU outer product), Linear(F1,8)+ReLU,
    #      adaptive pool, tanh/relu channel split.  Dropout = eval identity. ----
    out5 = None
    for h in range(n3):
        f1 = jnp.maximum(out2[:, h:h + 1] * fc1w_ref[...] + fc1b_ref[...], 0.0)  # (A4, F1)
        f2 = jnp.maximum(mm(f1, fc2w_ref[...]) + fc2b_ref[...], 0.0)             # (A4, 8)
        term = mm(f2, kpool_ref[h])                                              # (A4, PP)
        out5 = term if out5 is None else out5 + term
    row = lax.broadcasted_iota(jnp.int32, out5.shape, 0)
    boxes = jnp.where(row < num_anchors * 2,
                      jnp.tanh(out5),              # self.sigmoid = nn.Tanh()
                      jnp.maximum(out5, 0.0))      # self.tanh    = nn.ReLU()
    boxes_ref[0] = boxes


# ---------------------------------------------------------------------------
# Plain-JAX glue (tiny, once per forward)
# ---------------------------------------------------------------------------
def _im2col_l1(x, k, stride, pad):
    """(B,C,H,W) -> (B, C*k*k, Ho*Wo), row order (ci, kh, kw)."""
    B, C, H, W = x.shape
    xp = jnp.pad(x, ((0, 0), (0, 0), (pad, pad), (pad, pad)))
    Ho = (H + 2 * pad - k) // stride + 1
    Wo = (W + 2 * pad - k) // stride + 1
    cols = []
    for dh in range(k):
        for dw in range(k):
            cols.append(xp[:, :, dh:dh + stride * Ho:stride,
                           dw:dw + stride * Wo:stride])
    patches = jnp.stack(cols, axis=2)                  # (B, C, k*k, Ho, Wo)
    return patches.reshape(B, C * k * k, Ho * Wo)


def _fold_bn(w, b, bn, eps=1e-5):
    gamma, beta, mean, var = bn
    scale = gamma / jnp.sqrt(var + eps)
    return w * scale[:, None, None, None], (b - mean) * scale + beta


def _taps(w):
    """(Cout, Cin, 3, 3) -> (9, Cout, Cin), tap order kh*3+kw."""
    cout, cin = w.shape[0], w.shape[1]
    return jnp.transpose(w, (2, 3, 0, 1)).reshape(9, cout, cin)


# ---------------------------------------------------------------------------
# Parameters (deterministic init) + forward
# ---------------------------------------------------------------------------
def init_params(key, feature_size, num_anchors):
    A4 = num_anchors * 4
    ks = jax.random.split(key, 18)
    nrm = lambda k, shape: jax.random.normal(k, shape, jnp.float32) * 0.1
    bn_id = (jnp.ones((A4,), jnp.float32), jnp.zeros((A4,), jnp.float32),
             jnp.zeros((A4,), jnp.float32), jnp.ones((A4,), jnp.float32))
    return {
        "l1_w": nrm(ks[0], (A4, feature_size, 3, 3)), "l1_b": nrm(ks[1], (A4,)),
        "l2_w": nrm(ks[2], (A4, A4, 3, 3)),           "l2_b": nrm(ks[3], (A4,)),
        "l3_w": nrm(ks[4], (A4, A4, 3, 3)),           "l3_b": nrm(ks[5], (A4,)),
        "bn1": bn_id, "bn2": bn_id, "bn3": bn_id,
        "q_w": nrm(ks[6], (A4 // 8, A4)),  "q_b": nrm(ks[7], (A4 // 8,)),
        "k_w": nrm(ks[8], (A4 // 8, A4)),  "k_b": nrm(ks[9], (A4 // 8,)),
        "v_w": nrm(ks[10], (A4, A4)),      "v_b": nrm(ks[11], (A4,)),
        "att_gamma": jnp.zeros((1,), jnp.float32),   # matches torch.zeros(1)
        "fc1_w": nrm(ks[12], (A4 * 8, 1)),      "fc1_b": nrm(ks[13], (A4 * 8,)),
        "fc2_w": nrm(ks[14], (8, A4 * 8)),      "fc2_b": nrm(ks[15], (8,)),
        "c1_w": nrm(ks[16], (num_anchors, A4, 3, 3)), "c1_b": nrm(ks[17], (num_anchors,)),
    }


def anchor_box_predictor_forward(params, x, *, num_anchors, patch_size):
    B, Cin, H, W = x.shape
    A4 = num_anchors * 4
    PP = patch_size * patch_size

    # --- static geometry (same formulas as the PyTorch conv/pool layers) ---
    H1 = (H + 2 - 3) // 3 + 1
    W1 = (W + 2 - 3) // 3 + 1
    g2_np, H2, W2 = _conv_gather_mats(H1, W1, 3, 2, 1)
    g3_np, H3, W3 = _conv_gather_mats(H2, W2, 3, 1, 1)
    mp_np, Hp, Wp = _maxpool_select_mats(H3, W3)
    assert Wp == 1, "fc1 = Linear(1, ...) requires out2 width == 1"
    N1, N3 = H1 * W1, Hp * Wp
    ap_att_np = _adaptive_pool_matrix(Hp, Wp, patch_size, patch_size)
    gc1_np, pc1h, pc1w = _conv_gather_mats(patch_size, patch_size, 3, 1, 1)
    assert (pc1h, pc1w) == (patch_size, patch_size)
    kpool_np = _fc_pool_mats(N3, 8, patch_size, patch_size)

    # --- fold / reshape parameters (tiny trace-time work) ---
    w1f, s1 = _fold_bn(params["l1_w"], params["l1_b"], params["bn1"])
    w2f, s2 = _fold_bn(params["l2_w"], params["l2_b"], params["bn2"])
    w3f, s3 = _fold_bn(params["l3_w"], params["l3_b"], params["bn3"])

    patches = _im2col_l1(x.astype(jnp.float32), 3, 3, 1)        # (B, Cin*9, N1)
    assert patches.shape == (B, Cin * 9, N1)

    consts = [
        w1f.reshape(A4, Cin * 9), s1[:, None],
        _taps(w2f), s2[:, None], jnp.asarray(g2_np),
        _taps(w3f), s3[:, None], jnp.asarray(g3_np),
        jnp.asarray(mp_np),
        params["q_w"], params["q_b"][:, None],
        params["k_w"], params["k_b"][:, None],
        params["v_w"], params["v_b"][:, None],
        params["att_gamma"].reshape(1, 1),
        jnp.asarray(ap_att_np),
        _taps(params["c1_w"]), params["c1_b"][:, None], jnp.asarray(gc1_np),
        params["fc1_w"].T, params["fc1_b"][None, :],
        params["fc2_w"].T, params["fc2_b"][None, :],
        jnp.asarray(kpool_np),
    ]
    consts = [jnp.asarray(c, jnp.float32) for c in consts]

    def batch_spec(shape):
        nd = len(shape)
        return pl.BlockSpec((1,) + tuple(shape[1:]),
                            lambda b: (b,) + (0,) * (nd - 1))

    def const_spec(arr):
        nd = arr.ndim
        return pl.BlockSpec(arr.shape, lambda b: (0,) * nd)

    out_shapes = (
        jax.ShapeDtypeStruct((B, A4, PP), jnp.float32),
        jax.ShapeDtypeStruct((B, num_anchors, PP), jnp.float32),
        jax.ShapeDtypeStruct((B, num_anchors, PP), jnp.float32),
    )
    out_specs = (
        batch_spec((B, A4, PP)),
        batch_spec((B, num_anchors, PP)),
        batch_spec((B, num_anchors, PP)),
    )

    boxes, att4, att3 = pl.pallas_call(
        functools.partial(_fused_forward_kernel, num_anchors=num_anchors),
        out_shape=out_shapes,
        grid=(B,),
        in_specs=[batch_spec(patches.shape)] + [const_spec(c) for c in consts],
        out_specs=out_specs,
        compiler_params=pltpu.CompilerParams(
            dimension_semantics=("parallel",)),
    )(patches, *consts)

    boxes = boxes.reshape(B, A4, patch_size, patch_size)
    att4 = att4.reshape(B, num_anchors, patch_size, patch_size)
    att3 = att3.reshape(B, num_anchors, patch_size, patch_size)
    return boxes, att4, att3


# ---------------------------------------------------------------------------
if __name__ == "__main__":
    feature_size, num_anchors, patch_size = 4, 3, 2
    B, H, W = 2, 48, 16   # W=16 -> conv stack reduces width to 1 (fc1 requirement)

    key = jax.random.PRNGKey(0)
    kx, kp = jax.random.split(key)
    x = jax.random.normal(kx, (B, feature_size, H, W), jnp.float32)
    params = init_params(kp, feature_size, num_anchors)

    fwd = jax.jit(functools.partial(anchor_box_predictor_forward,
                                    num_anchors=num_anchors,
                                    patch_size=patch_size))
    boxes, outatt4, outatt3 = fwd(params, x)
    jax.block_until_ready((boxes, outatt4, outatt3))

    assert boxes.shape == (B, num_anchors * 4, patch_size, patch_size)
    assert outatt4.shape == (B, num_anchors, patch_size, patch_size)
    assert outatt3.shape == (B, num_anchors, patch_size, patch_size)
    assert bool(jnp.all(jnp.isfinite(boxes)))
    assert bool(jnp.all(jnp.isfinite(outatt3)))
    print("KERNEL_OK")
</pallas_src>

<mosaic_0001>
module attributes {stable_mosaic.version = 11 : i64} {
  func.func @_fused_forward_kernel(%arg0: i32, %arg1: memref<1x36x96xf32, #tpu.memory_space<vmem>>, %arg2: memref<12x36xf32, #tpu.memory_space<vmem>>, %arg3: memref<12x1xf32, #tpu.memory_space<vmem>>, %arg4: memref<9x12x12xf32, #tpu.memory_space<vmem>>, %arg5: memref<12x1xf32, #tpu.memory_space<vmem>>, %arg6: memref<9x96x24xf32, #tpu.memory_space<vmem>>, %arg7: memref<9x12x12xf32, #tpu.memory_space<vmem>>, %arg8: memref<12x1xf32, #tpu.memory_space<vmem>>, %arg9: memref<9x24x24xf32, #tpu.memory_space<vmem>>, %arg10: memref<4x24x4xf32, #tpu.memory_space<vmem>>, %arg11: memref<1x12xf32, #tpu.memory_space<vmem>>, %arg12: memref<1x1xf32, #tpu.memory_space<vmem>>, %arg13: memref<1x12xf32, #tpu.memory_space<vmem>>, %arg14: memref<1x1xf32, #tpu.memory_space<vmem>>, %arg15: memref<12x12xf32, #tpu.memory_space<vmem>>, %arg16: memref<12x1xf32, #tpu.memory_space<vmem>>, %arg17: memref<1x1xf32, #tpu.memory_space<vmem>>, %arg18: memref<4x4xf32, #tpu.memory_space<vmem>>, %arg19: memref<9x3x12xf32, #tpu.memory_space<vmem>>, %arg20: memref<3x1xf32, #tpu.memory_space<vmem>>, %arg21: memref<9x4x4xf32, #tpu.memory_space<vmem>>, %arg22: memref<1x96xf32, #tpu.memory_space<vmem>>, %arg23: memref<1x96xf32, #tpu.memory_space<vmem>>, %arg24: memref<96x8xf32, #tpu.memory_space<vmem>>, %arg25: memref<1x8xf32, #tpu.memory_space<vmem>>, %arg26: memref<4x8x4xf32, #tpu.memory_space<vmem>>, %arg27: memref<1x12x4xf32, #tpu.memory_space<vmem>>, %arg28: memref<1x3x4xf32, #tpu.memory_space<vmem>>, %arg29: memref<1x3x4xf32, #tpu.memory_space<vmem>>) attributes {dimension_semantics = [#tpu.dimension_semantics<parallel>], iteration_bounds = array<i64: 2>, scalar_prefetch = 0 : i64, scratch_operands = 0 : i64, tpu.core_type = #tpu.core_type<tc>, window_params = [{transform_indices = @transform_0, window_bounds = array<i64: 1, 36, 96>}, {pipeline_mode = #tpu.pipeline_mode<synchronous>, transform_indices = @transform_1, window_bounds = array<i64: 12, 36>}, {pipeline_mode = #tpu.pipeline_mode<synchronous>, transform_indices = @transform_2, window_bounds = array<i64: 12, 1>}, {pipeline_mode = #tpu.pipeline_mode<synchronous>, transform_indices = @transform_3, window_bounds = array<i64: 9, 12, 12>}, {pipeline_mode = #tpu.pipeline_mode<synchronous>, transform_indices = @transform_4, window_bounds = array<i64: 12, 1>}, {pipeline_mode = #tpu.pipeline_mode<synchronous>, transform_indices = @transform_5, window_bounds = array<i64: 9, 96, 24>}, {pipeline_mode = #tpu.pipeline_mode<synchronous>, transform_indices = @transform_6, window_bounds = array<i64: 9, 12, 12>}, {pipeline_mode = #tpu.pipeline_mode<synchronous>, transform_indices = @transform_7, window_bounds = array<i64: 12, 1>}, {pipeline_mode = #tpu.pipeline_mode<synchronous>, transform_indices = @transform_8, window_bounds = array<i64: 9, 24, 24>}, {pipeline_mode = #tpu.pipeline_mode<synchronous>, transform_indices = @transform_9, window_bounds = array<i64: 4, 24, 4>}, {pipeline_mode = #tpu.pipeline_mode<synchronous>, transform_indices = @transform_10, window_bounds = array<i64: 1, 12>}, {pipeline_mode = #tpu.pipeline_mode<synchronous>, transform_indices = @transform_11, window_bounds = array<i64: 1, 1>}, {pipeline_mode = #tpu.pipeline_mode<synchronous>, transform_indices = @transform_12, window_bounds = array<i64: 1, 12>}, {pipeline_mode = #tpu.pipeline_mode<synchronous>, transform_indices = @transform_13, window_bounds = array<i64: 1, 1>}, {pipeline_mode = #tpu.pipeline_mode<synchronous>, transform_indices = @transform_14, window_bounds = array<i64: 12, 12>}, {pipeline_mode = #tpu.pipeline_mode<synchronous>, transform_indices = @transform_15, window_bounds = array<i64: 12, 1>}, {pipeline_mode = #tpu.pipeline_mode<synchronous>, transform_indices = @transform_16, window_bounds = array<i64: 1, 1>}, {pipeline_mode = #tpu.pipeline_mode<synchronous>, transform_indices = @transform_17, window_bounds = array<i64: 4, 4>}, {pipeline_mode = #tpu.pipeline_mode<synchronous>, transform_indices = @transform_18, window_bounds = array<i64: 9, 3, 12>}, {pipeline_mode = #tpu.pipeline_mode<synchronous>, transform_indices = @transform_19, window_bounds = array<i64: 3, 1>}, {pipeline_mode = #tpu.pipeline_mode<synchronous>, transform_indices = @transform_20, window_bounds = array<i64: 9, 4, 4>}, {pipeline_mode = #tpu.pipeline_mode<synchronous>, transform_indices = @transform_21, window_bounds = array<i64: 1, 96>}, {pipeline_mode = #tpu.pipeline_mode<synchronous>, transform_indices = @transform_22, window_bounds = array<i64: 1, 96>}, {pipeline_mode = #tpu.pipeline_mode<synchronous>, transform_indices = @transform_23, window_bounds = array<i64: 96, 8>}, {pipeline_mode = #tpu.pipeline_mode<synchronous>, transform_indices = @transform_24, window_bounds = array<i64: 1, 8>}, {pipeline_mode = #tpu.pipeline_mode<synchronous>, transform_indices = @transform_25, window_bounds = array<i64: 4, 8, 4>}, {transform_indices = @transform_26, window_bounds = array<i64: 1, 12, 4>}, {transform_indices = @transform_27, window_bounds = array<i64: 1, 3, 4>}, {transform_indices = @transform_28, window_bounds = array<i64: 1, 3, 4>}]} {
    %c0 = arith.constant 0 : index
    %c0_0 = arith.constant 0 : index
    %0 = vector.load %arg2[%c0, %c0_0] : memref<12x36xf32, #tpu.memory_space<vmem>>, vector<12x36xf32>
    %c0_1 = arith.constant 0 : index
    %c0_2 = arith.constant 0 : index
    %c0_3 = arith.constant 0 : index
    %1 = vector.load %arg1[%c0_1, %c0_2, %c0_3] : memref<1x36x96xf32, #tpu.memory_space<vmem>>, vector<1x36x96xf32>
    %2 = vector.shape_cast %1 : vector<1x36x96xf32> to vector<36x96xf32>
    %cst = arith.constant dense<0.000000e+00> : vector<12x96xf32>
    %3 = tpu.matmul %0, %2, %cst {dimension_numbers = #tpu.dot_dimension_numbers<[1], [0], [0], [1], [0, 0, 1, 1], [], []>} : vector<12x36xf32>, vector<36x96xf32>, vector<12x96xf32> -> vector<12x96xf32>
    %c0_4 = arith.constant 0 : index
    %c0_5 = arith.constant 0 : index
    %4 = vector.load %arg3[%c0_4, %c0_5] : memref<12x1xf32, #tpu.memory_space<vmem>>, vector<12x1xf32>
    %5 = vector.broadcast %4 : vector<12x1xf32> to vector<12x96xf32>
    %6 = arith.addf %3, %5 : vector<12x96xf32>
    %cst_6 = arith.constant 0.000000e+00 : f32
    %7 = vector.broadcast %cst_6 : f32 to vector<12x96xf32>
    %8 = arith.maximumf %6, %7 : vector<12x96xf32>
    %c0_7 = arith.constant 0 : index
    %c0_8 = arith.constant 0 : index
    %9 = vector.load %arg5[%c0_7, %c0_8] : memref<12x1xf32, #tpu.memory_space<vmem>>, vector<12x1xf32>
    %c0_9 = arith.constant 0 : index
    %c0_10 = arith.constant 0 : index
    %c0_11 = arith.constant 0 : index
    %10 = vector.load %arg4[%c0_9, %c0_10, %c0_11] : memref<9x12x12xf32, #tpu.memory_space<vmem>>, vector<1x12x12xf32>
    %11 = vector.shape_cast %10 : vector<1x12x12xf32> to vector<12x12xf32>
    %c0_12 = arith.constant 0 : index
    %c0_13 = arith.constant 0 : index
    %c0_14 = arith.constant 0 : index
    %12 = vector.load %arg6[%c0_12, %c0_13, %c0_14] : memref<9x96x24xf32, #tpu.memory_space<vmem>>, vector<1x96x24xf32>
    %13 = vector.shape_cast %12 : vector<1x96x24xf32> to vector<96x24xf32>
    %cst_15 = arith.constant dense<0.000000e+00> : vector<12x24xf32>
    %14 = tpu.matmul %8, %13, %cst_15 {dimension_numbers = #tpu.dot_dimension_numbers<[1], [0], [0], [1], [0, 0, 1, 1], [], []>} : vector<12x96xf32>, vector<96x24xf32>, vector<12x24xf32> -> vector<12x24xf32>
    %cst_16 = arith.constant dense<0.000000e+00> : vector<12x24xf32>
    %15 = tpu.matmul %11, %14, %cst_16 {dimension_numbers = #tpu.dot_dimension_numbers<[1], [0], [0], [1], [0, 0, 1, 1], [], []>} : vector<12x12xf32>, vector<12x24xf32>, vector<12x24xf32> -> vector<12x24xf32>
    %16 = vector.broadcast %9 : vector<12x1xf32> to vector<12x24xf32>
    %17 = arith.addf %16, %15 : vector<12x24xf32>
    %c1 = arith.constant 1 : index
    %c0_17 = arith.constant 0 : index
    %c0_18 = arith.constant 0 : index
    %18 = vector.load %arg4[%c1, %c0_17, %c0_18] : memref<9x12x12xf32, #tpu.memory_space<vmem>>, vector<1x12x12xf32>
    %19 = vector.shape_cast %18 : vector<1x12x12xf32> to vector<12x12xf32>
    %c1_19 = arith.constant 1 : index
    %c0_20 = arith.constant 0 : index
    %c0_21 = arith.constant 0 : index
    %20 = vector.load %arg6[%c1_19, %c0_20, %c0_21] : memref<9x96x24xf32, #tpu.memory_space<vmem>>, vector<1x96x24xf32>
    %21 = vector.shape_cast %20 : vector<1x96x24xf32> to vector<96x24xf32>
    %cst_22 = arith.constant dense<0.000000e+00> : vector<12x24xf32>
    %22 = tpu.matmul %8, %21, %cst_22 {dimension_numbers = #tpu.dot_dimension_numbers<[1], [0], [0], [1], [0, 0, 1, 1], [], []>} : vector<12x96xf32>, vector<96x24xf32>, vector<12x24xf32> -> vector<12x24xf32>
    %cst_23 = arith.constant dense<0.000000e+00> : vector<12x24xf32>
    %23 = tpu.matmul %19, %22, %cst_23 {dimension_numbers = #tpu.dot_dimension_numbers<[1], [0], [0], [1], [0, 0, 1, 1], [], []>} : vector<12x12xf32>, vector<12x24xf32>, vector<12x24xf32> -> vector<12x24xf32>
    %24 = arith.addf %17, %23 : vector<12x24xf32>
    %c2 = arith.constant 2 : index
    %c0_24 = arith.constant 0 : index
    %c0_25 = arith.constant 0 : index
    %25 = vector.load %arg4[%c2, %c0_24, %c0_25] : memref<9x12x12xf32, #tpu.memory_space<vmem>>, vector<1x12x12xf32>
    %26 = vector.shape_cast %25 : vector<1x12x12xf32> to vector<12x12xf32>
    %c2_26 = arith.constant 2 : index
    %c0_27 = arith.constant 0 : index
    %c0_28 = arith.constant 0 : index
    %27 = vector.load %arg6[%c2_26, %c0_27, %c0_28] : memref<9x96x24xf32, #tpu.memory_space<vmem>>, vector<1x96x24xf32>
    %28 = vector.shape_cast %27 : vector<1x96x24xf32> to vector<96x24xf32>
    %cst_29 = arith.constant dense<0.000000e+00> : vector<12x24xf32>
    %29 = tpu.matmul %8, %28, %cst_29 {dimension_numbers = #tpu.dot_dimension_numbers<[1], [0], [0], [1], [0, 0, 1, 1], [], []>} : vector<12x96xf32>, vector<96x24xf32>, vector<12x24xf32> -> vector<12x24xf32>
    %cst_30 = arith.constant dense<0.000000e+00> : vector<12x24xf32>
    %30 = tpu.matmul %26, %29, %cst_30 {dimension_numbers = #tpu.dot_dimension_numbers<[1], [0], [0], [1], [0, 0, 1, 1], [], []>} : vector<12x12xf32>, vector<12x24xf32>, vector<12x24xf32> -> vector<12x24xf32>
    %31 = arith.addf %24, %30 : vector<12x24xf32>
    %c3 = arith.constant 3 : index
    %c0_31 = arith.constant 0 : index
    %c0_32 = arith.constant 0 : index
    %32 = vector.load %arg4[%c3, %c0_31, %c0_32] : memref<9x12x12xf32, #tpu.memory_space<vmem>>, vector<1x12x12xf32>
    %33 = vector.shape_cast %32 : vector<1x12x12xf32> to vector<12x12xf32>
    %c3_33 = arith.constant 3 : index
    %c0_34 = arith.constant 0 : index
    %c0_35 = arith.constant 0 : index
    %34 = vector.load %arg6[%c3_33, %c0_34, %c0_35] : memref<9x96x24xf32, #tpu.memory_space<vmem>>, vector<1x96x24xf32>
    %35 = vector.shape_cast %34 : vector<1x96x24xf32> to vector<96x24xf32>
    %cst_36 = arith.constant dense<0.000000e+00> : vector<12x24xf32>
    %36 = tpu.matmul %8, %35, %cst_36 {dimension_numbers = #tpu.dot_dimension_numbers<[1], [0], [0], [1], [0, 0, 1, 1], [], []>} : vector<12x96xf32>, vector<96x24xf32>, vector<12x24xf32> -> vector<12x24xf32>
    %cst_37 = arith.constant dense<0.000000e+00> : vector<12x24xf32>
    %37 = tpu.matmul %33, %36, %cst_37 {dimension_numbers = #tpu.dot_dimension_numbers<[1], [0], [0], [1], [0, 0, 1, 1], [], []>} : vector<12x12xf32>, vector<12x24xf32>, vector<12x24xf32> -> vector<12x24xf32>
    %38 = arith.addf %31, %37 : vector<12x24xf32>
    %c4 = arith.constant 4 : index
    %c0_38 = arith.constant 0 : index
    %c0_39 = arith.constant 0 : index
    %39 = vector.load %arg4[%c4, %c0_38, %c0_39] : memref<9x12x12xf32, #tpu.memory_space<vmem>>, vector<1x12x12xf32>
    %40 = vector.shape_cast %39 : vector<1x12x12xf32> to vector<12x12xf32>
    %c4_40 = arith.constant 4 : index
    %c0_41 = arith.constant 0 : index
    %c0_42 = arith.constant 0 : index
    %41 = vector.load %arg6[%c4_40, %c0_41, %c0_42] : memref<9x96x24xf32, #tpu.memory_space<vmem>>, vector<1x96x24xf32>
    %42 = vector.shape_cast %41 : vector<1x96x24xf32> to vector<96x24xf32>
    %cst_43 = arith.constant dense<0.000000e+00> : vector<12x24xf32>
    %43 = tpu.matmul %8, %42, %cst_43 {dimension_numbers = #tpu.dot_dimension_numbers<[1], [0], [0], [1], [0, 0, 1, 1], [], []>} : vector<12x96xf32>, vector<96x24xf32>, vector<12x24xf32> -> vector<12x24xf32>
    %cst_44 = arith.constant dense<0.000000e+00> : vector<12x24xf32>
    %44 = tpu.matmul %40, %43, %cst_44 {dimension_numbers = #tpu.dot_dimension_numbers<[1], [0], [0], [1], [0, 0, 1, 1], [], []>} : vector<12x12xf32>, vector<12x24xf32>, vector<12x24xf32> -> vector<12x24xf32>
    %45 = arith.addf %38, %44 : vector<12x24xf32>
    %c5 = arith.constant 5 : index
    %c0_45 = arith.constant 0 : index
    %c0_46 = arith.constant 0 : index
    %46 = vector.load %arg4[%c5, %c0_45, %c0_46] : memref<9x12x12xf32, #tpu.memory_space<vmem>>, vector<1x12x12xf32>
    %47 = vector.shape_cast %46 : vector<1x12x12xf32> to vector<12x12xf32>
    %c5_47 = arith.constant 5 : index
    %c0_48 = arith.constant 0 : index
    %c0_49 = arith.constant 0 : index
    %48 = vector.load %arg6[%c5_47, %c0_48, %c0_49] : memref<9x96x24xf32, #tpu.memory_space<vmem>>, vector<1x96x24xf32>
    %49 = vector.shape_cast %48 : vector<1x96x24xf32> to vector<96x24xf32>
    %cst_50 = arith.constant dense<0.000000e+00> : vector<12x24xf32>
    %50 = tpu.matmul %8, %49, %cst_50 {dimension_numbers = #tpu.dot_dimension_numbers<[1], [0], [0], [1], [0, 0, 1, 1], [], []>} : vector<12x96xf32>, vector<96x24xf32>, vector<12x24xf32> -> vector<12x24xf32>
    %cst_51 = arith.constant dense<0.000000e+00> : vector<12x24xf32>
    %51 = tpu.matmul %47, %50, %cst_51 {dimension_numbers = #tpu.dot_dimension_numbers<[1], [0], [0], [1], [0, 0, 1, 1], [], []>} : vector<12x12xf32>, vector<12x24xf32>, vector<12x24xf32> -> vector<12x24xf32>
    %52 = arith.addf %45, %51 : vector<12x24xf32>
    %c6 = arith.constant 6 : index
    %c0_52 = arith.constant 0 : index
    %c0_53 = arith.constant 0 : index
    %53 = vector.load %arg4[%c6, %c0_52, %c0_53] : memref<9x12x12xf32, #tpu.memory_space<vmem>>, vector<1x12x12xf32>
    %54 = vector.shape_cast %53 : vector<1x12x12xf32> to vector<12x12xf32>
    %c6_54 = arith.constant 6 : index
    %c0_55 = arith.constant 0 : index
    %c0_56 = arith.constant 0 : index
    %55 = vector.load %arg6[%c6_54, %c0_55, %c0_56] : memref<9x96x24xf32, #tpu.memory_space<vmem>>, vector<1x96x24xf32>
    %56 = vector.shape_cast %55 : vector<1x96x24xf32> to vector<96x24xf32>
    %cst_57 = arith.constant dense<0.000000e+00> : vector<12x24xf32>
    %57 = tpu.matmul %8, %56, %cst_57 {dimension_numbers = #tpu.dot_dimension_numbers<[1], [0], [0], [1], [0, 0, 1, 1], [], []>} : vector<12x96xf32>, vector<96x24xf32>, vector<12x24xf32> -> vector<12x24xf32>
    %cst_58 = arith.constant dense<0.000000e+00> : vector<12x24xf32>
    %58 = tpu.matmul %54, %57, %cst_58 {dimension_numbers = #tpu.dot_dimension_numbers<[1], [0], [0], [1], [0, 0, 1, 1], [], []>} : vector<12x12xf32>, vector<12x24xf32>, vector<12x24xf32> -> vector<12x24xf32>
    %59 = arith.addf %52, %58 : vector<12x24xf32>
    %c7 = arith.constant 7 : index
    %c0_59 = arith.constant 0 : index
    %c0_60 = arith.constant 0 : index
    %60 = vector.load %arg4[%c7, %c0_59, %c0_60] : memref<9x12x12xf32, #tpu.memory_space<vmem>>, vector<1x12x12xf32>
    %61 = vector.shape_cast %60 : vector<1x12x12xf32> to vector<12x12xf32>
    %c7_61 = arith.constant 7 : index
    %c0_62 = arith.constant 0 : index
    %c0_63 = arith.constant 0 : index
    %62 = vector.load %arg6[%c7_61, %c0_62, %c0_63] : memref<9x96x24xf32, #tpu.memory_space<vmem>>, vector<1x96x24xf32>
    %63 = vector.shape_cast %62 : vector<1x96x24xf32> to vector<96x24xf32>
    %cst_64 = arith.constant dense<0.000000e+00> : vector<12x24xf32>
    %64 = tpu.matmul %8, %63, %cst_64 {dimension_numbers = #tpu.dot_dimension_numbers<[1], [0], [0], [1], [0, 0, 1, 1], [], []>} : vector<12x96xf32>, vector<96x24xf32>, vector<12x24xf32> -> vector<12x24xf32>
    %cst_65 = arith.constant dense<0.000000e+00> : vector<12x24xf32>
    %65 = tpu.matmul %61, %64, %cst_65 {dimension_numbers = #tpu.dot_dimension_numbers<[1], [0], [0], [1], [0, 0, 1, 1], [], []>} : vector<12x12xf32>, vector<12x24xf32>, vector<12x24xf32> -> vector<12x24xf32>
    %66 = arith.addf %59, %65 : vector<12x24xf32>
    %c8 = arith.constant 8 : index
    %c0_66 = arith.constant 0 : index
    %c0_67 = arith.constant 0 : index
    %67 = vector.load %arg4[%c8, %c0_66, %c0_67] : memref<9x12x12xf32, #tpu.memory_space<vmem>>, vector<1x12x12xf32>
    %68 = vector.shape_cast %67 : vector<1x12x12xf32> to vector<12x12xf32>
    %c8_68 = arith.constant 8 : index
    %c0_69 = arith.constant 0 : index
    %c0_70 = arith.constant 0 : index
    %69 = vector.load %arg6[%c8_68, %c0_69, %c0_70] : memref<9x96x24xf32, #tpu.memory_space<vmem>>, vector<1x96x24xf32>
    %70 = vector.shape_cast %69 : vector<1x96x24xf32> to vector<96x24xf32>
    %cst_71 = arith.constant dense<0.000000e+00> : vector<12x24xf32>
    %71 = tpu.matmul %8, %70, %cst_71 {dimension_numbers = #tpu.dot_dimension_numbers<[1], [0], [0], [1], [0, 0, 1, 1], [], []>} : vector<12x96xf32>, vector<96x24xf32>, vector<12x24xf32> -> vector<12x24xf32>
    %cst_72 = arith.constant dense<0.000000e+00> : vector<12x24xf32>
    %72 = tpu.matmul %68, %71, %cst_72 {dimension_numbers = #tpu.dot_dimension_numbers<[1], [0], [0], [1], [0, 0, 1, 1], [], []>} : vector<12x12xf32>, vector<12x24xf32>, vector<12x24xf32> -> vector<12x24xf32>
    %73 = arith.addf %66, %72 : vector<12x24xf32>
    %cst_73 = arith.constant 0.000000e+00 : f32
    %74 = vector.broadcast %cst_73 : f32 to vector<12x24xf32>
    %75 = arith.maximumf %73, %74 : vector<12x24xf32>
    %c0_74 = arith.constant 0 : index
    %c0_75 = arith.constant 0 : index
    %76 = vector.load %arg8[%c0_74, %c0_75] : memref<12x1xf32, #tpu.memory_space<vmem>>, vector<12x1xf32>
    %c0_76 = arith.constant 0 : index
    %c0_77 = arith.constant 0 : index
    %c0_78 = arith.constant 0 : index
    %77 = vector.load %arg7[%c0_76, %c0_77, %c0_78] : memref<9x12x12xf32, #tpu.memory_space<vmem>>, vector<1x12x12xf32>
    %78 = vector.shape_cast %77 : vector<1x12x12xf32> to vector<12x12xf32>
    %c0_79 = arith.constant 0 : index
    %c0_80 = arith.constant 0 : index
    %c0_81 = arith.constant 0 : index
    %79 = vector.load %arg9[%c0_79, %c0_80, %c0_81] : memref<9x24x24xf32, #tpu.memory_space<vmem>>, vector<1x24x24xf32>
    %80 = vector.shape_cast %79 : vector<1x24x24xf32> to vector<24x24xf32>
    %cst_82 = arith.constant dense<0.000000e+00> : vector<12x24xf32>
    %81 = tpu.matmul %75, %80, %cst_82 {dimension_numbers = #tpu.dot_dimension_numbers<[1], [0], [0], [1], [0, 0, 1, 1], [], []>} : vector<12x24xf32>, vector<24x24xf32>, vector<12x24xf32> -> vector<12x24xf32>
    %cst_83 = arith.constant dense<0.000000e+00> : vector<12x24xf32>
    %82 = tpu.matmul %78, %81, %cst_83 {dimension_numbers = #tpu.dot_dimension_numbers<[1], [0], [0], [1], [0, 0, 1, 1], [], []>} : vector<12x12xf32>, vector<12x24xf32>, vector<12x24xf32> -> vector<12x24xf32>
    %83 = vector.broadcast %76 : vector<12x1xf32> to vector<12x24xf32>
    %84 = arith.addf %83, %82 : vector<12x24xf32>
    %c1_84 = arith.constant 1 : index
    %c0_85 = arith.constant 0 : index
    %c0_86 = arith.constant 0 : index
    %85 = vector.load %arg7[%c1_84, %c0_85, %c0_86] : memref<9x12x12xf32, #tpu.memory_space<vmem>>, vector<1x12x12xf32>
    %86 = vector.shape_cast %85 : vector<1x12x12xf32> to vector<12x12xf32>
    %c1_87 = arith.constant 1 : index
    %c0_88 = arith.constant 0 : index
    %c0_89 = arith.constant 0 : index
    %87 = vector.load %arg9[%c1_87, %c0_88, %c0_89] : memref<9x24x24xf32, #tpu.memory_space<vmem>>, vector<1x24x24xf32>
    %88 = vector.shape_cast %87 : vector<1x24x24xf32> to vector<24x24xf32>
    %cst_90 = arith.constant dense<0.000000e+00> : vector<12x24xf32>
    %89 = tpu.matmul %75, %88, %cst_90 {dimension_numbers = #tpu.dot_dimension_numbers<[1], [0], [0], [1], [0, 0, 1, 1], [], []>} : vector<12x24xf32>, vector<24x24xf32>, vector<12x24xf32> -> vector<12x24xf32>
    %cst_91 = arith.constant dense<0.000000e+00> : vector<12x24xf32>
    %90 = tpu.matmul %86, %89, %cst_91 {dimension_numbers = #tpu.dot_dimension_numbers<[1], [0], [0], [1], [0, 0, 1, 1], [], []>} : vector<12x12xf32>, vector<12x24xf32>, vector<12x24xf32> -> vector<12x24xf32>
    %91 = arith.addf %84, %90 : vector<12x24xf32>
    %c2_92 = arith.constant 2 : index
    %c0_93 = arith.constant 0 : index
    %c0_94 = arith.constant 0 : index
    %92 = vector.load %arg7[%c2_92, %c0_93, %c0_94] : memref<9x12x12xf32, #tpu.memory_space<vmem>>, vector<1x12x12xf32>
    %93 = vector.shape_cast %92 : vector<1x12x12xf32> to vector<12x12xf32>
    %c2_95 = arith.constant 2 : index
    %c0_96 = arith.constant 0 : index
    %c0_97 = arith.constant 0 : index
    %94 = vector.load %arg9[%c2_95, %c0_96, %c0_97] : memref<9x24x24xf32, #tpu.memory_space<vmem>>, vector<1x24x24xf32>
    %95 = vector.shape_cast %94 : vector<1x24x24xf32> to vector<24x24xf32>
    %cst_98 = arith.constant dense<0.000000e+00> : vector<12x24xf32>
    %96 = tpu.matmul %75, %95, %cst_98 {dimension_numbers = #tpu.dot_dimension_numbers<[1], [0], [0], [1], [0, 0, 1, 1], [], []>} : vector<12x24xf32>, vector<24x24xf32>, vector<12x24xf32> -> vector<12x24xf32>
    %cst_99 = arith.constant dense<0.000000e+00> : vector<12x24xf32>
    %97 = tpu.matmul %93, %96, %cst_99 {dimension_numbers = #tpu.dot_dimension_numbers<[1], [0], [0], [1], [0, 0, 1, 1], [], []>} : vector<12x12xf32>, vector<12x24xf32>, vector<12x24xf32> -> vector<12x24xf32>
    %98 = arith.addf %91, %97 : vector<12x24xf32>
    %c3_100 = arith.constant 3 : index
    %c0_101 = arith.constant 0 : index
    %c0_102 = arith.constant 0 : index
    %99 = vector.load %arg7[%c3_100, %c0_101, %c0_102] : memref<9x12x12xf32, #tpu.memory_space<vmem>>, vector<1x12x12xf32>
    %100 = vector.shape_cast %99 : vector<1x12x12xf32> to vector<12x12xf32>
    %c3_103 = arith.constant 3 : index
    %c0_104 = arith.constant 0 : index
    %c0_105 = arith.constant 0 : index
    %101 = vector.load %arg9[%c3_103, %c0_104, %c0_105] : memref<9x24x24xf32, #tpu.memory_space<vmem>>, vector<1x24x24xf32>
    %102 = vector.shape_cast %101 : vector<1x24x24xf32> to vector<24x24xf32>
    %cst_106 = arith.constant dense<0.000000e+00> : vector<12x24xf32>
    %103 = tpu.matmul %75, %102, %cst_106 {dimension_numbers = #tpu.dot_dimension_numbers<[1], [0], [0], [1], [0, 0, 1, 1], [], []>} : vector<12x24xf32>, vector<24x24xf32>, vector<12x24xf32> -> vector<12x24xf32>
    %cst_107 = arith.constant dense<0.000000e+00> : vector<12x24xf32>
    %104 = tpu.matmul %100, %103, %cst_107 {dimension_numbers = #tpu.dot_dimension_numbers<[1], [0], [0], [1], [0, 0, 1, 1], [], []>} : vector<12x12xf32>, vector<12x24xf32>, vector<12x24xf32> -> vector<12x24xf32>
    %105 = arith.addf %98, %104 : vector<12x24xf32>
    %c4_108 = arith.constant 4 : index
    %c0_109 = arith.constant 0 : index
    %c0_110 = arith.constant 0 : index
    %106 = vector.load %arg7[%c4_108, %c0_109, %c0_110] : memref<9x12x12xf32, #tpu.memory_space<vmem>>, vector<1x12x12xf32>
    %107 = vector.shape_cast %106 : vector<1x12x12xf32> to vector<12x12xf32>
    %c4_111 = arith.constant 4 : index
    %c0_112 = arith.constant 0 : index
    %c0_113 = arith.constant 0 : index
    %108 = vector.load %arg9[%c4_111, %c0_112, %c0_113] : memref<9x24x24xf32, #tpu.memory_space<vmem>>, vector<1x24x24xf32>
    %109 = vector.shape_cast %108 : vector<1x24x24xf32> to vector<24x24xf32>
    %cst_114 = arith.constant dense<0.000000e+00> : vector<12x24xf32>
    %110 = tpu.matmul %75, %109, %cst_114 {dimension_numbers = #tpu.dot_dimension_numbers<[1], [0], [0], [1], [0, 0, 1, 1], [], []>} : vector<12x24xf32>, vector<24x24xf32>, vector<12x24xf32> -> vector<12x24xf32>
    %cst_115 = arith.constant dense<0.000000e+00> : vector<12x24xf32>
    %111 = tpu.matmul %107, %110, %cst_115 {dimension_numbers = #tpu.dot_dimension_numbers<[1], [0], [0], [1], [0, 0, 1, 1], [], []>} : vector<12x12xf32>, vector<12x24xf32>, vector<12x24xf32> -> vector<12x24xf32>
    %112 = arith.addf %105, %111 : vector<12x24xf32>
    %c5_116 = arith.constant 5 : index
    %c0_117 = arith.constant 0 : index
    %c0_118 = arith.constant 0 : index
    %113 = vector.load %arg7[%c5_116, %c0_117, %c0_118] : memref<9x12x12xf32, #tpu.memory_space<vmem>>, vector<1x12x12xf32>
    %114 = vector.shape_cast %113 : vector<1x12x12xf32> to vector<12x12xf32>
    %c5_119 = arith.constant 5 : index
    %c0_120 = arith.constant 0 : index
    %c0_121 = arith.constant 0 : index
    %115 = vector.load %arg9[%c5_119, %c0_120, %c0_121] : memref<9x24x24xf32, #tpu.memory_space<vmem>>, vector<1x24x24xf32>
    %116 = vector.shape_cast %115 : vector<1x24x24xf32> to vector<24x24xf32>
    %cst_122 = arith.constant dense<0.000000e+00> : vector<12x24xf32>
    %117 = tpu.matmul %75, %116, %cst_122 {dimension_numbers = #tpu.dot_dimension_numbers<[1], [0], [0], [1], [0, 0, 1, 1], [], []>} : vector<12x24xf32>, vector<24x24xf32>, vector<12x24xf32> -> vector<12x24xf32>
    %cst_123 = arith.constant dense<0.000000e+00> : vector<12x24xf32>
    %118 = tpu.matmul %114, %117, %cst_123 {dimension_numbers = #tpu.dot_dimension_numbers<[1], [0], [0], [1], [0, 0, 1, 1], [], []>} : vector<12x12xf32>, vector<12x24xf32>, vector<12x24xf32> -> vector<12x24xf32>
    %119 = arith.addf %112, %118 : vector<12x24xf32>
    %c6_124 = arith.constant 6 : index
    %c0_125 = arith.constant 0 : index
    %c0_126 = arith.constant 0 : index
    %120 = vector.load %arg7[%c6_124, %c0_125, %c0_126] : memref<9x12x12xf32, #tpu.memory_space<vmem>>, vector<1x12x12xf32>
    %121 = vector.shape_cast %120 : vector<1x12x12xf32> to vector<12x12xf32>
    %c6_127 = arith.constant 6 : index
    %c0_128 = arith.constant 0 : index
    %c0_129 = arith.constant 0 : index
    %122 = vector.load %arg9[%c6_127, %c0_128, %c0_129] : memref<9x24x24xf32, #tpu.memory_space<vmem>>, vector<1x24x24xf32>
    %123 = vector.shape_cast %122 : vector<1x24x24xf32> to vector<24x24xf32>
    %cst_130 = arith.constant dense<0.000000e+00> : vector<12x24xf32>
    %124 = tpu.matmul %75, %123, %cst_130 {dimension_numbers = #tpu.dot_dimension_numbers<[1], [0], [0], [1], [0, 0, 1, 1], [], []>} : vector<12x24xf32>, vector<24x24xf32>, vector<12x24xf32> -> vector<12x24xf32>
    %cst_131 = arith.constant dense<0.000000e+00> : vector<12x24xf32>
    %125 = tpu.matmul %121, %124, %cst_131 {dimension_numbers = #tpu.dot_dimension_numbers<[1], [0], [0], [1], [0, 0, 1, 1], [], []>} : vector<12x12xf32>, vector<12x24xf32>, vector<12x24xf32> -> vector<12x24xf32>
    %126 = arith.addf %119, %125 : vector<12x24xf32>
    %c7_132 = arith.constant 7 : index
    %c0_133 = arith.constant 0 : index
    %c0_134 = arith.constant 0 : index
    %127 = vector.load %arg7[%c7_132, %c0_133, %c0_134] : memref<9x12x12xf32, #tpu.memory_space<vmem>>, vector<1x12x12xf32>
    %128 = vector.shape_cast %127 : vector<1x12x12xf32> to vector<12x12xf32>
    %c7_135 = arith.constant 7 : index
    %c0_136 = arith.constant 0 : index
    %c0_137 = arith.constant 0 : index
    %129 = vector.load %arg9[%c7_135, %c0_136, %c0_137] : memref<9x24x24xf32, #tpu.memory_space<vmem>>, vector<1x24x24xf32>
    %130 = vector.shape_cast %129 : vector<1x24x24xf32> to vector<24x24xf32>
    %cst_138 = arith.constant dense<0.000000e+00> : vector<12x24xf32>
    %131 = tpu.matmul %75, %130, %cst_138 {dimension_numbers = #tpu.dot_dimension_numbers<[1], [0], [0], [1], [0, 0, 1, 1], [], []>} : vector<12x24xf32>, vector<24x24xf32>, vector<12x24xf32> -> vector<12x24xf32>
    %cst_139 = arith.constant dense<0.000000e+00> : vector<12x24xf32>
    %132 = tpu.matmul %128, %131, %cst_139 {dimension_numbers = #tpu.dot_dimension_numbers<[1], [0], [0], [1], [0, 0, 1, 1], [], []>} : vector<12x12xf32>, vector<12x24xf32>, vector<12x24xf32> -> vector<12x24xf32>
    %133 = arith.addf %126, %132 : vector<12x24xf32>
    %c8_140 = arith.constant 8 : index
    %c0_141 = arith.constant 0 : index
    %c0_142 = arith.constant 0 : index
    %134 = vector.load %arg7[%c8_140, %c0_141, %c0_142] : memref<9x12x12xf32, #tpu.memory_space<vmem>>, vector<1x12x12xf32>
    %135 = vector.shape_cast %134 : vector<1x12x12xf32> to vector<12x12xf32>
    %c8_143 = arith.constant 8 : index
    %c0_144 = arith.constant 0 : index
    %c0_145 = arith.constant 0 : index
    %136 = vector.load %arg9[%c8_143, %c0_144, %c0_145] : memref<9x24x24xf32, #tpu.memory_space<vmem>>, vector<1x24x24xf32>
    %137 = vector.shape_cast %136 : vector<1x24x24xf32> to vector<24x24xf32>
    %cst_146 = arith.constant dense<0.000000e+00> : vector<12x24xf32>
    %138 = tpu.matmul %75, %137, %cst_146 {dimension_numbers = #tpu.dot_dimension_numbers<[1], [0], [0], [1], [0, 0, 1, 1], [], []>} : vector<12x24xf32>, vector<24x24xf32>, vector<12x24xf32> -> vector<12x24xf32>
    %cst_147 = arith.constant dense<0.000000e+00> : vector<12x24xf32>
    %139 = tpu.matmul %135, %138, %cst_147 {dimension_numbers = #tpu.dot_dimension_numbers<[1], [0], [0], [1], [0, 0, 1, 1], [], []>} : vector<12x12xf32>, vector<12x24xf32>, vector<12x24xf32> -> vector<12x24xf32>
    %140 = arith.addf %133, %139 : vector<12x24xf32>
    %cst_148 = arith.constant 0.000000e+00 : f32
    %141 = vector.broadcast %cst_148 : f32 to vector<12x24xf32>
    %142 = arith.maximumf %140, %141 : vector<12x24xf32>
    %c0_149 = arith.constant 0 : index
    %c0_150 = arith.constant 0 : index
    %c0_151 = arith.constant 0 : index
    %143 = vector.load %arg10[%c0_149, %c0_150, %c0_151] : memref<4x24x4xf32, #tpu.memory_space<vmem>>, vector<1x24x4xf32>
    %144 = vector.shape_cast %143 : vector<1x24x4xf32> to vector<24x4xf32>
    %cst_152 = arith.constant dense<0.000000e+00> : vector<12x4xf32>
    %145 = tpu.matmul %142, %144, %cst_152 {dimension_numbers = #tpu.dot_dimension_numbers<[1], [0], [0], [1], [0, 0, 1, 1], [], []>} : vector<12x24xf32>, vector<24x4xf32>, vector<12x4xf32> -> vector<12x4xf32>
    %c1_153 = arith.constant 1 : index
    %c0_154 = arith.constant 0 : index
    %c0_155 = arith.constant 0 : index
    %146 = vector.load %arg10[%c1_153, %c0_154, %c0_155] : memref<4x24x4xf32, #tpu.memory_space<vmem>>, vector<1x24x4xf32>
    %147 = vector.shape_cast %146 : vector<1x24x4xf32> to vector<24x4xf32>
    %cst_156 = arith.constant dense<0.000000e+00> : vector<12x4xf32>
    %148 = tpu.matmul %142, %147, %cst_156 {dimension_numbers = #tpu.dot_dimension_numbers<[1], [0], [0], [1], [0, 0, 1, 1], [], []>} : vector<12x24xf32>, vector<24x4xf32>, vector<12x4xf32> -> vector<12x4xf32>
    %c2_157 = arith.constant 2 : index
    %c0_158 = arith.constant 0 : index
    %c0_159 = arith.constant 0 : index
    %149 = vector.load %arg10[%c2_157, %c0_158, %c0_159] : memref<4x24x4xf32, #tpu.memory_space<vmem>>, vector<1x24x4xf32>
    %150 = vector.shape_cast %149 : vector<1x24x4xf32> to vector<24x4xf32>
    %cst_160 = arith.constant dense<0.000000e+00> : vector<12x4xf32>
    %151 = tpu.matmul %142, %150, %cst_160 {dimension_numbers = #tpu.dot_dimension_numbers<[1], [0], [0], [1], [0, 0, 1, 1], [], []>} : vector<12x24xf32>, vector<24x4xf32>, vector<12x4xf32> -> vector<12x4xf32>
    %c3_161 = arith.constant 3 : index
    %c0_162 = arith.constant 0 : index
    %c0_163 = arith.constant 0 : index
    %152 = vector.load %arg10[%c3_161, %c0_162, %c0_163] : memref<4x24x4xf32, #tpu.memory_space<vmem>>, vector<1x24x4xf32>
    %153 = vector.shape_cast %152 : vector<1x24x4xf32> to vector<24x4xf32>
    %cst_164 = arith.constant dense<0.000000e+00> : vector<12x4xf32>
    %154 = tpu.matmul %142, %153, %cst_164 {dimension_numbers = #tpu.dot_dimension_numbers<[1], [0], [0], [1], [0, 0, 1, 1], [], []>} : vector<12x24xf32>, vector<24x4xf32>, vector<12x4xf32> -> vector<12x4xf32>
    %155 = arith.maximumf %145, %148 : vector<12x4xf32>
    %156 = arith.maximumf %151, %154 : vector<12x4xf32>
    %157 = arith.maximumf %155, %156 : vector<12x4xf32>
    %c0_165 = arith.constant 0 : index
    %c0_166 = arith.constant 0 : index
    %158 = vector.load %arg11[%c0_165, %c0_166] : memref<1x12xf32, #tpu.memory_space<vmem>>, vector<1x12xf32>
    %cst_167 = arith.constant dense<0.000000e+00> : vector<1x4xf32>
    %159 = tpu.matmul %158, %157, %cst_167 {dimension_numbers = #tpu.dot_dimension_numbers<[1], [0], [0], [1], [0, 0, 1, 1], [], []>} : vector<1x12xf32>, vector<12x4xf32>, vector<1x4xf32> -> vector<1x4xf32>
    %c0_168 = arith.constant 0 : index
    %c0_169 = arith.constant 0 : index
    %160 = vector.load %arg12[%c0_168, %c0_169] : memref<1x1xf32, #tpu.memory_space<vmem>>, vector<1x1xf32>
    %161 = vector.broadcast %160 : vector<1x1xf32> to vector<1x4xf32>
    %162 = arith.addf %159, %161 : vector<1x4xf32>
    %c0_170 = arith.constant 0 : index
    %c0_171 = arith.constant 0 : index
    %163 = vector.load %arg13[%c0_170, %c0_171] : memref<1x12xf32, #tpu.memory_space<vmem>>, vector<1x12xf32>
    %cst_172 = arith.constant dense<0.000000e+00> : vector<1x4xf32>
    %164 = tpu.matmul %163, %157, %cst_172 {dimension_numbers = #tpu.dot_dimension_numbers<[1], [0], [0], [1], [0, 0, 1, 1], [], []>} : vector<1x12xf32>, vector<12x4xf32>, vector<1x4xf32> -> vector<1x4xf32>
    %c0_173 = arith.constant 0 : index
    %c0_174 = arith.constant 0 : index
    %165 = vector.load %arg14[%c0_173, %c0_174] : memref<1x1xf32, #tpu.memory_space<vmem>>, vector<1x1xf32>
    %166 = vector.broadcast %165 : vector<1x1xf32> to vector<1x4xf32>
    %167 = arith.addf %164, %166 : vector<1x4xf32>
    %c0_175 = arith.constant 0 : index
    %c0_176 = arith.constant 0 : index
    %168 = vector.load %arg15[%c0_175, %c0_176] : memref<12x12xf32, #tpu.memory_space<vmem>>, vector<12x12xf32>
    %cst_177 = arith.constant dense<0.000000e+00> : vector<12x4xf32>
    %169 = tpu.matmul %168, %157, %cst_177 {dimension_numbers = #tpu.dot_dimension_numbers<[1], [0], [0], [1], [0, 0, 1, 1], [], []>} : vector<12x12xf32>, vector<12x4xf32>, vector<12x4xf32> -> vector<12x4xf32>
    %c0_178 = arith.constant 0 : index
    %c0_179 = arith.constant 0 : index
    %170 = vector.load %arg16[%c0_178, %c0_179] : memref<12x1xf32, #tpu.memory_space<vmem>>, vector<12x1xf32>
    %171 = vector.broadcast %170 : vector<12x1xf32> to vector<12x4xf32>
    %172 = arith.addf %169, %171 : vector<12x4xf32>
    %173 = tpu.iota {dimensions = array<i32: 0>} : vector<4x4xi32>
    %174 = tpu.iota {dimensions = array<i32: 1>} : vector<4x4xi32>
    %175 = arith.cmpi eq, %173, %174 : vector<4x4xi32>
    %176 = arith.extui %175 : vector<4x4xi1> to vector<4x4xi32>
    %177 = arith.sitofp %176 : vector<4x4xi32> to vector<4x4xf32>
    %cst_180 = arith.constant dense<0.000000e+00> : vector<4x1xf32>
    %178 = tpu.matmul %177, %162, %cst_180 {dimension_numbers = #tpu.dot_dimension_numbers<[1], [1], [0], [0], [0, 0, 1, 0], [], []>} : vector<4x4xf32>, vector<1x4xf32>, vector<4x1xf32> -> vector<4x1xf32>
    %cst_181 = arith.constant dense<0.000000e+00> : vector<4x4xf32>
    %179 = tpu.matmul %178, %167, %cst_181 {dimension_numbers = #tpu.dot_dimension_numbers<[1], [0], [0], [1], [0, 0, 1, 1], [], []>} : vector<4x1xf32>, vector<1x4xf32>, vector<4x4xf32> -> vector<4x4xf32>
    %cst_182 = arith.constant dense<0xFF800000> : vector<4xf32>
    %180 = vector.multi_reduction <maximumf>, %179, %cst_182 [1] : vector<4x4xf32> to vector<4xf32>
    %181 = vector.shape_cast %180 : vector<4xf32> to vector<4x1xf32>
    %182 = vector.broadcast %181 : vector<4x1xf32> to vector<4x4xf32>
    %183 = arith.subf %179, %182 : vector<4x4xf32>
    %184 = math.exp %183 : vector<4x4xf32>
    %cst_183 = arith.constant dense<0.000000e+00> : vector<4xf32>
    %185 = vector.multi_reduction <add>, %184, %cst_183 [1] : vector<4x4xf32> to vector<4xf32>
    %186 = vector.shape_cast %185 : vector<4xf32> to vector<4x1xf32>
    %187 = vector.broadcast %186 : vector<4x1xf32> to vector<4x4xf32>
    %188 = arith.divf %184, %187 : vector<4x4xf32>
    %cst_184 = arith.constant dense<0.000000e+00> : vector<12x4xf32>
    %189 = tpu.matmul %172, %188, %cst_184 {dimension_numbers = #tpu.dot_dimension_numbers<[1], [1], [0], [0], [0, 0, 1, 0], [], []>} : vector<12x4xf32>, vector<4x4xf32>, vector<12x4xf32> -> vector<12x4xf32>
    %c0_185 = arith.constant 0 : index
    %c0_186 = arith.constant 0 : index
    %190 = vector.load %arg17[%c0_185, %c0_186] : memref<1x1xf32, #tpu.memory_space<vmem>>, vector<1x1xf32>
    %191 = vector.broadcast %190 : vector<1x1xf32> to vector<12x4xf32>
    %192 = arith.mulf %191, %189 : vector<12x4xf32>
    %193 = arith.addf %192, %157 : vector<12x4xf32>
    %c0_187 = arith.constant 0 : index
    %c0_188 = arith.constant 0 : index
    %194 = vector.load %arg18[%c0_187, %c0_188] : memref<4x4xf32, #tpu.memory_space<vmem>>, vector<4x4xf32>
    %cst_189 = arith.constant dense<0.000000e+00> : vector<12x4xf32>
    %195 = tpu.matmul %193, %194, %cst_189 {dimension_numbers = #tpu.dot_dimension_numbers<[1], [0], [0], [1], [0, 0, 1, 1], [], []>} : vector<12x4xf32>, vector<4x4xf32>, vector<12x4xf32> -> vector<12x4xf32>
    %c0_190 = arith.constant 0 : index
    %c0_191 = arith.constant 0 : index
    %196 = vector.load %arg20[%c0_190, %c0_191] : memref<3x1xf32, #tpu.memory_space<vmem>>, vector<3x1xf32>
    %c0_192 = arith.constant 0 : index
    %c0_193 = arith.constant 0 : index
    %c0_194 = arith.constant 0 : index
    %197 = vector.load %arg19[%c0_192, %c0_193, %c0_194] : memref<9x3x12xf32, #tpu.memory_space<vmem>>, vector<1x3x12xf32>
    %198 = vector.shape_cast %197 : vector<1x3x12xf32> to vector<3x12xf32>
    %c0_195 = arith.constant 0 : index
    %c0_196 = arith.constant 0 : index
    %c0_197 = arith.constant 0 : index
    %199 = vector.load %arg21[%c0_195, %c0_196, %c0_197] : memref<9x4x4xf32, #tpu.memory_space<vmem>>, vector<1x4x4xf32>
    %200 = vector.shape_cast %199 : vector<1x4x4xf32> to vector<4x4xf32>
    %cst_198 = arith.constant dense<0.000000e+00> : vector<12x4xf32>
    %201 = tpu.matmul %195, %200, %cst_198 {dimension_numbers = #tpu.dot_dimension_numbers<[1], [0], [0], [1], [0, 0, 1, 1], [], []>} : vector<12x4xf32>, vector<4x4xf32>, vector<12x4xf32> -> vector<12x4xf32>
    %cst_199 = arith.constant dense<0.000000e+00> : vector<3x4xf32>
    %202 = tpu.matmul %198, %201, %cst_199 {dimension_numbers = #tpu.dot_dimension_numbers<[1], [0], [0], [1], [0, 0, 1, 1], [], []>} : vector<3x12xf32>, vector<12x4xf32>, vector<3x4xf32> -> vector<3x4xf32>
    %203 = vector.broadcast %196 : vector<3x1xf32> to vector<3x4xf32>
    %204 = arith.addf %203, %202 : vector<3x4xf32>
    %c1_200 = arith.constant 1 : index
    %c0_201 = arith.constant 0 : index
    %c0_202 = arith.constant 0 : index
    %205 = vector.load %arg19[%c1_200, %c0_201, %c0_202] : memref<9x3x12xf32, #tpu.memory_space<vmem>>, vector<1x3x12xf32>
    %206 = vector.shape_cast %205 : vector<1x3x12xf32> to vector<3x12xf32>
    %c1_203 = arith.constant 1 : index
    %c0_204 = arith.constant 0 : index
    %c0_205 = arith.constant 0 : index
    %207 = vector.load %arg21[%c1_203, %c0_204, %c0_205] : memref<9x4x4xf32, #tpu.memory_space<vmem>>, vector<1x4x4xf32>
    %208 = vector.shape_cast %207 : vector<1x4x4xf32> to vector<4x4xf32>
    %cst_206 = arith.constant dense<0.000000e+00> : vector<12x4xf32>
    %209 = tpu.matmul %195, %208, %cst_206 {dimension_numbers = #tpu.dot_dimension_numbers<[1], [0], [0], [1], [0, 0, 1, 1], [], []>} : vector<12x4xf32>, vector<4x4xf32>, vector<12x4xf32> -> vector<12x4xf32>
    %cst_207 = arith.constant dense<0.000000e+00> : vector<3x4xf32>
    %210 = tpu.matmul %206, %209, %cst_207 {dimension_numbers = #tpu.dot_dimension_numbers<[1], [0], [0], [1], [0, 0, 1, 1], [], []>} : vector<3x12xf32>, vector<12x4xf32>, vector<3x4xf32> -> vector<3x4xf32>
    %211 = arith.addf %204, %210 : vector<3x4xf32>
    %c2_208 = arith.constant 2 : index
    %c0_209 = arith.constant 0 : index
    %c0_210 = arith.constant 0 : index
    %212 = vector.load %arg19[%c2_208, %c0_209, %c0_210] : memref<9x3x12xf32, #tpu.memory_space<vmem>>, vector<1x3x12xf32>
    %213 = vector.shape_cast %212 : vector<1x3x12xf32> to vector<3x12xf32>
    %c2_211 = arith.constant 2 : index
    %c0_212 = arith.constant 0 : index
    %c0_213 = arith.constant 0 : index
    %214 = vector.load %arg21[%c2_211, %c0_212, %c0_213] : memref<9x4x4xf32, #tpu.memory_space<vmem>>, vector<1x4x4xf32>
    %215 = vector.shape_cast %214 : vector<1x4x4xf32> to vector<4x4xf32>
    %cst_214 = arith.constant dense<0.000000e+00> : vector<12x4xf32>
    %216 = tpu.matmul %195, %215, %cst_214 {dimension_numbers = #tpu.dot_dimension_numbers<[1], [0], [0], [1], [0, 0, 1, 1], [], []>} : vector<12x4xf32>, vector<4x4xf32>, vector<12x4xf32> -> vector<12x4xf32>
    %cst_215 = arith.constant dense<0.000000e+00> : vector<3x4xf32>
    %217 = tpu.matmul %213, %216, %cst_215 {dimension_numbers = #tpu.dot_dimension_numbers<[1], [0], [0], [1], [0, 0, 1, 1], [], []>} : vector<3x12xf32>, vector<12x4xf32>, vector<3x4xf32> -> vector<3x4xf32>
    %218 = arith.addf %211, %217 : vector<3x4xf32>
    %c3_216 = arith.constant 3 : index
    %c0_217 = arith.constant 0 : index
    %c0_218 = arith.constant 0 : index
    %219 = vector.load %arg19[%c3_216, %c0_217, %c0_218] : memref<9x3x12xf32, #tpu.memory_space<vmem>>, vector<1x3x12xf32>
    %220 = vector.shape_cast %219 : vector<1x3x12xf32> to vector<3x12xf32>
    %c3_219 = arith.constant 3 : index
    %c0_220 = arith.constant 0 : index
    %c0_221 = arith.constant 0 : index
    %221 = vector.load %arg21[%c3_219, %c0_220, %c0_221] : memref<9x4x4xf32, #tpu.memory_space<vmem>>, vector<1x4x4xf32>
    %222 = vector.shape_cast %221 : vector<1x4x4xf32> to vector<4x4xf32>
    %cst_222 = arith.constant dense<0.000000e+00> : vector<12x4xf32>
    %223 = tpu.matmul %195, %222, %cst_222 {dimension_numbers = #tpu.dot_dimension_numbers<[1], [0], [0], [1], [0, 0, 1, 1], [], []>} : vector<12x4xf32>, vector<4x4xf32>, vector<12x4xf32> -> vector<12x4xf32>
    %cst_223 = arith.constant dense<0.000000e+00> : vector<3x4xf32>
    %224 = tpu.matmul %220, %223, %cst_223 {dimension_numbers = #tpu.dot_dimension_numbers<[1], [0], [0], [1], [0, 0, 1, 1], [], []>} : vector<3x12xf32>, vector<12x4xf32>, vector<3x4xf32> -> vector<3x4xf32>
    %225 = arith.addf %218, %224 : vector<3x4xf32>
    %c4_224 = arith.constant 4 : index
    %c0_225 = arith.constant 0 : index
    %c0_226 = arith.constant 0 : index
    %226 = vector.load %arg19[%c4_224, %c0_225, %c0_226] : memref<9x3x12xf32, #tpu.memory_space<vmem>>, vector<1x3x12xf32>
    %227 = vector.shape_cast %226 : vector<1x3x12xf32> to vector<3x12xf32>
    %c4_227 = arith.constant 4 : index
    %c0_228 = arith.constant 0 : index
    %c0_229 = arith.constant 0 : index
    %228 = vector.load %arg21[%c4_227, %c0_228, %c0_229] : memref<9x4x4xf32, #tpu.memory_space<vmem>>, vector<1x4x4xf32>
    %229 = vector.shape_cast %228 : vector<1x4x4xf32> to vector<4x4xf32>
    %cst_230 = arith.constant dense<0.000000e+00> : vector<12x4xf32>
    %230 = tpu.matmul %195, %229, %cst_230 {dimension_numbers = #tpu.dot_dimension_numbers<[1], [0], [0], [1], [0, 0, 1, 1], [], []>} : vector<12x4xf32>, vector<4x4xf32>, vector<12x4xf32> -> vector<12x4xf32>
    %cst_231 = arith.constant dense<0.000000e+00> : vector<3x4xf32>
    %231 = tpu.matmul %227, %230, %cst_231 {dimension_numbers = #tpu.dot_dimension_numbers<[1], [0], [0], [1], [0, 0, 1, 1], [], []>} : vector<3x12xf32>, vector<12x4xf32>, vector<3x4xf32> -> vector<3x4xf32>
    %232 = arith.addf %225, %231 : vector<3x4xf32>
    %c5_232 = arith.constant 5 : index
    %c0_233 = arith.constant 0 : index
    %c0_234 = arith.constant 0 : index
    %233 = vector.load %arg19[%c5_232, %c0_233, %c0_234] : memref<9x3x12xf32, #tpu.memory_space<vmem>>, vector<1x3x12xf32>
    %234 = vector.shape_cast %233 : vector<1x3x12xf32> to vector<3x12xf32>
    %c5_235 = arith.constant 5 : index
    %c0_236 = arith.constant 0 : index
    %c0_237 = arith.constant 0 : index
    %235 = vector.load %arg21[%c5_235, %c0_236, %c0_237] : memref<9x4x4xf32, #tpu.memory_space<vmem>>, vector<1x4x4xf32>
    %236 = vector.shape_cast %235 : vector<1x4x4xf32> to vector<4x4xf32>
    %cst_238 = arith.constant dense<0.000000e+00> : vector<12x4xf32>
    %237 = tpu.matmul %195, %236, %cst_238 {dimension_numbers = #tpu.dot_dimension_numbers<[1], [0], [0], [1], [0, 0, 1, 1], [], []>} : vector<12x4xf32>, vector<4x4xf32>, vector<12x4xf32> -> vector<12x4xf32>
    %cst_239 = arith.constant dense<0.000000e+00> : vector<3x4xf32>
    %238 = tpu.matmul %234, %237, %cst_239 {dimension_numbers = #tpu.dot_dimension_numbers<[1], [0], [0], [1], [0, 0, 1, 1], [], []>} : vector<3x12xf32>, vector<12x4xf32>, vector<3x4xf32> -> vector<3x4xf32>
    %239 = arith.addf %232, %238 : vector<3x4xf32>
    %c6_240 = arith.constant 6 : index
    %c0_241 = arith.constant 0 : index
    %c0_242 = arith.constant 0 : index
    %240 = vector.load %arg19[%c6_240, %c0_241, %c0_242] : memref<9x3x12xf32, #tpu.memory_space<vmem>>, vector<1x3x12xf32>
    %241 = vector.shape_cast %240 : vector<1x3x12xf32> to vector<3x12xf32>
    %c6_243 = arith.constant 6 : index
    %c0_244 = arith.constant 0 : index
    %c0_245 = arith.constant 0 : index
    %242 = vector.load %arg21[%c6_243, %c0_244, %c0_245] : memref<9x4x4xf32, #tpu.memory_space<vmem>>, vector<1x4x4xf32>
    %243 = vector.shape_cast %242 : vector<1x4x4xf32> to vector<4x4xf32>
    %cst_246 = arith.constant dense<0.000000e+00> : vector<12x4xf32>
    %244 = tpu.matmul %195, %243, %cst_246 {dimension_numbers = #tpu.dot_dimension_numbers<[1], [0], [0], [1], [0, 0, 1, 1], [], []>} : vector<12x4xf32>, vector<4x4xf32>, vector<12x4xf32> -> vector<12x4xf32>
    %cst_247 = arith.constant dense<0.000000e+00> : vector<3x4xf32>
    %245 = tpu.matmul %241, %244, %cst_247 {dimension_numbers = #tpu.dot_dimension_numbers<[1], [0], [0], [1], [0, 0, 1, 1], [], []>} : vector<3x12xf32>, vector<12x4xf32>, vector<3x4xf32> -> vector<3x4xf32>
    %246 = arith.addf %239, %245 : vector<3x4xf32>
    %c7_248 = arith.constant 7 : index
    %c0_249 = arith.constant 0 : index
    %c0_250 = arith.constant 0 : index
    %247 = vector.load %arg19[%c7_248, %c0_249, %c0_250] : memref<9x3x12xf32, #tpu.memory_space<vmem>>, vector<1x3x12xf32>
    %248 = vector.shape_cast %247 : vector<1x3x12xf32> to vector<3x12xf32>
    %c7_251 = arith.constant 7 : index
    %c0_252 = arith.constant 0 : index
    %c0_253 = arith.constant 0 : index
    %249 = vector.load %arg21[%c7_251, %c0_252, %c0_253] : memref<9x4x4xf32, #tpu.memory_space<vmem>>, vector<1x4x4xf32>
    %250 = vector.shape_cast %249 : vector<1x4x4xf32> to vector<4x4xf32>
    %cst_254 = arith.constant dense<0.000000e+00> : vector<12x4xf32>
    %251 = tpu.matmul %195, %250, %cst_254 {dimension_numbers = #tpu.dot_dimension_numbers<[1], [0], [0], [1], [0, 0, 1, 1], [], []>} : vector<12x4xf32>, vector<4x4xf32>, vector<12x4xf32> -> vector<12x4xf32>
    %cst_255 = arith.constant dense<0.000000e+00> : vector<3x4xf32>
    %252 = tpu.matmul %248, %251, %cst_255 {dimension_numbers = #tpu.dot_dimension_numbers<[1], [0], [0], [1], [0, 0, 1, 1], [], []>} : vector<3x12xf32>, vector<12x4xf32>, vector<3x4xf32> -> vector<3x4xf32>
    %253 = arith.addf %246, %252 : vector<3x4xf32>
    %c8_256 = arith.constant 8 : index
    %c0_257 = arith.constant 0 : index
    %c0_258 = arith.constant 0 : index
    %254 = vector.load %arg19[%c8_256, %c0_257, %c0_258] : memref<9x3x12xf32, #tpu.memory_space<vmem>>, vector<1x3x12xf32>
    %255 = vector.shape_cast %254 : vector<1x3x12xf32> to vector<3x12xf32>
    %c8_259 = arith.constant 8 : index
    %c0_260 = arith.constant 0 : index
    %c0_261 = arith.constant 0 : index
    %256 = vector.load %arg21[%c8_259, %c0_260, %c0_261] : memref<9x4x4xf32, #tpu.memory_space<vmem>>, vector<1x4x4xf32>
    %257 = vector.shape_cast %256 : vector<1x4x4xf32> to vector<4x4xf32>
    %cst_262 = arith.constant dense<0.000000e+00> : vector<12x4xf32>
    %258 = tpu.matmul %195, %257, %cst_262 {dimension_numbers = #tpu.dot_dimension_numbers<[1], [0], [0], [1], [0, 0, 1, 1], [], []>} : vector<12x4xf32>, vector<4x4xf32>, vector<12x4xf32> -> vector<12x4xf32>
    %cst_263 = arith.constant dense<0.000000e+00> : vector<3x4xf32>
    %259 = tpu.matmul %255, %258, %cst_263 {dimension_numbers = #tpu.dot_dimension_numbers<[1], [0], [0], [1], [0, 0, 1, 1], [], []>} : vector<3x12xf32>, vector<12x4xf32>, vector<3x4xf32> -> vector<3x4xf32>
    %260 = arith.addf %253, %259 : vector<3x4xf32>
    %cst_264 = arith.constant 0.000000e+00 : f32
    %261 = vector.broadcast %cst_264 : f32 to vector<3x4xf32>
    %262 = arith.maximumf %260, %261 : vector<3x4xf32>
    %263 = math.tanh %262 : vector<3x4xf32>
    %cst_265 = arith.constant 4.000000e-01 : f32
    %264 = vector.broadcast %cst_265 : f32 to vector<3x4xf32>
    %265 = arith.cmpf ogt, %263, %264 : vector<3x4xf32>
    %266 = arith.extui %265 : vector<3x4xi1> to vector<3x4xi32>
    %267 = arith.sitofp %266 : vector<3x4xi32> to vector<3x4xf32>
    %c0_266 = arith.constant 0 : index
    %c0_267 = arith.constant 0 : index
    %c0_268 = arith.constant 0 : index
    %268 = vector.load %arg29[%c0_266, %c0_267, %c0_268] : memref<1x3x4xf32, #tpu.memory_space<vmem>>, vector<1x3x4xf32>
    %269 = vector.shape_cast %268 : vector<1x3x4xf32> to vector<3x4xf32>
    %270 = vector.shape_cast %262 : vector<3x4xf32> to vector<1x3x4xf32>
    tpu.vector_store %arg29[%c0_266, %c0_267, %c0_268], %270 {strides = array<i32>} : memref<1x3x4xf32, #tpu.memory_space<vmem>>, vector<1x3x4xf32>,
    %c0_269 = arith.constant 0 : index
    %c0_270 = arith.constant 0 : index
    %c0_271 = arith.constant 0 : index
    %271 = vector.load %arg28[%c0_269, %c0_270, %c0_271] : memref<1x3x4xf32, #tpu.memory_space<vmem>>, vector<1x3x4xf32>
    %272 = vector.shape_cast %271 : vector<1x3x4xf32> to vector<3x4xf32>
    %273 = vector.shape_cast %267 : vector<3x4xf32> to vector<1x3x4xf32>
    tpu.vector_store %arg28[%c0_269, %c0_270, %c0_271], %273 {strides = array<i32>} : memref<1x3x4xf32, #tpu.memory_space<vmem>>, vector<1x3x4xf32>,
    %274 = vector.extract_strided_slice %157 {offsets = [0, 0], sizes = [12, 1], strides = [1, 1]} : vector<12x4xf32> to vector<12x1xf32>
    %c0_272 = arith.constant 0 : index
    %c0_273 = arith.constant 0 : index
    %275 = vector.load %arg22[%c0_272, %c0_273] : memref<1x96xf32, #tpu.memory_space<vmem>>, vector<1x96xf32>
    %276 = vector.broadcast %274 : vector<12x1xf32> to vector<12x96xf32>
    %277 = vector.broadcast %275 : vector<1x96xf32> to vector<12x96xf32>
    %278 = arith.mulf %276, %277 : vector<12x96xf32>
    %c0_274 = arith.constant 0 : index
    %c0_275 = arith.constant 0 : index
    %279 = vector.load %arg23[%c0_274, %c0_275] : memref<1x96xf32, #tpu.memory_space<vmem>>, vector<1x96xf32>
    %280 = vector.broadcast %279 : vector<1x96xf32> to vector<12x96xf32>
    %281 = arith.addf %278, %280 : vector<12x96xf32>
    %cst_276 = arith.constant 0.000000e+00 : f32
    %282 = vector.broadcast %cst_276 : f32 to vector<12x96xf32>
    %283 = arith.maximumf %281, %282 : vector<12x96xf32>
    %c0_277 = arith.constant 0 : index
    %c0_278 = arith.constant 0 : index
    %284 = vector.load %arg24[%c0_277, %c0_278] : memref<96x8xf32, #tpu.memory_space<vmem>>, vector<96x8xf32>
    %cst_279 = arith.constant dense<0.000000e+00> : vector<12x8xf32>
    %285 = tpu.matmul %283, %284, %cst_279 {dimension_numbers = #tpu.dot_dimension_numbers<[1], [0], [0], [1], [0, 0, 1, 1], [], []>} : vector<12x96xf32>, vector<96x8xf32>, vector<12x8xf32> -> vector<12x8xf32>
    %c0_280 = arith.constant 0 : index
    %c0_281 = arith.constant 0 : index
    %286 = vector.load %arg25[%c0_280, %c0_281] : memref<1x8xf32, #tpu.memory_space<vmem>>, vector<1x8xf32>
    %287 = vector.broadcast %286 : vector<1x8xf32> to vector<12x8xf32>
    %288 = arith.addf %285, %287 : vector<12x8xf32>
    %cst_282 = arith.constant 0.000000e+00 : f32
    %289 = vector.broadcast %cst_282 : f32 to vector<12x8xf32>
    %290 = arith.maximumf %288, %289 : vector<12x8xf32>
    %c0_283 = arith.constant 0 : index
    %c0_284 = arith.constant 0 : index
    %c0_285 = arith.constant 0 : index
    %291 = vector.load %arg26[%c0_283, %c0_284, %c0_285] : memref<4x8x4xf32, #tpu.memory_space<vmem>>, vector<1x8x4xf32>
    %292 = vector.shape_cast %291 : vector<1x8x4xf32> to vector<8x4xf32>
    %cst_286 = arith.constant dense<0.000000e+00> : vector<12x4xf32>
    %293 = tpu.matmul %290, %292, %cst_286 {dimension_numbers = #tpu.dot_dimension_numbers<[1], [0], [0], [1], [0, 0, 1, 1], [], []>} : vector<12x8xf32>, vector<8x4xf32>, vector<12x4xf32> -> vector<12x4xf32>
    %294 = vector.extract_strided_slice %157 {offsets = [0, 1], sizes = [12, 1], strides = [1, 1]} : vector<12x4xf32> to vector<12x1xf32>
    %c0_287 = arith.constant 0 : index
    %c0_288 = arith.constant 0 : index
    %295 = vector.load %arg22[%c0_287, %c0_288] : memref<1x96xf32, #tpu.memory_space<vmem>>, vector<1x96xf32>
    %296 = vector.broadcast %294 : vector<12x1xf32> to vector<12x96xf32>
    %297 = vector.broadcast %295 : vector<1x96xf32> to vector<12x96xf32>
    %298 = arith.mulf %296, %297 : vector<12x96xf32>
    %c0_289 = arith.constant 0 : index
    %c0_290 = arith.constant 0 : index
    %299 = vector.load %arg23[%c0_289, %c0_290] : memref<1x96xf32, #tpu.memory_space<vmem>>, vector<1x96xf32>
    %300 = vector.broadcast %299 : vector<1x96xf32> to vector<12x96xf32>
    %301 = arith.addf %298, %300 : vector<12x96xf32>
    %cst_291 = arith.constant 0.000000e+00 : f32
    %302 = vector.broadcast %cst_291 : f32 to vector<12x96xf32>
    %303 = arith.maximumf %301, %302 : vector<12x96xf32>
    %c0_292 = arith.constant 0 : index
    %c0_293 = arith.constant 0 : index
    %304 = vector.load %arg24[%c0_292, %c0_293] : memref<96x8xf32, #tpu.memory_space<vmem>>, vector<96x8xf32>
    %cst_294 = arith.constant dense<0.000000e+00> : vector<12x8xf32>
    %305 = tpu.matmul %303, %304, %cst_294 {dimension_numbers = #tpu.dot_dimension_numbers<[1], [0], [0], [1], [0, 0, 1, 1], [], []>} : vector<12x96xf32>, vector<96x8xf32>, vector<12x8xf32> -> vector<12x8xf32>
    %c0_295 = arith.constant 0 : index
    %c0_296 = arith.constant 0 : index
    %306 = vector.load %arg25[%c0_295, %c0_296] : memref<1x8xf32, #tpu.memory_space<vmem>>, vector<1x8xf32>
    %307 = vector.broadcast %306 : vector<1x8xf32> to vector<12x8xf32>
    %308 = arith.addf %305, %307 : vector<12x8xf32>
    %cst_297 = arith.constant 0.000000e+00 : f32
    %309 = vector.broadcast %cst_297 : f32 to vector<12x8xf32>
    %310 = arith.maximumf %308, %309 : vector<12x8xf32>
    %c1_298 = arith.constant 1 : index
    %c0_299 = arith.constant 0 : index
    %c0_300 = arith.constant 0 : index
    %311 = vector.load %arg26[%c1_298, %c0_299, %c0_300] : memref<4x8x4xf32, #tpu.memory_space<vmem>>, vector<1x8x4xf32>
    %312 = vector.shape_cast %311 : vector<1x8x4xf32> to vector<8x4xf32>
    %cst_301 = arith.constant dense<0.000000e+00> : vector<12x4xf32>
    %313 = tpu.matmul %310, %312, %cst_301 {dimension_numbers = #tpu.dot_dimension_numbers<[1], [0], [0], [1], [0, 0, 1, 1], [], []>} : vector<12x8xf32>, vector<8x4xf32>, vector<12x4xf32> -> vector<12x4xf32>
    %314 = arith.addf %293, %313 : vector<12x4xf32>
    %315 = vector.extract_strided_slice %157 {offsets = [0, 2], sizes = [12, 1], strides = [1, 1]} : vector<12x4xf32> to vector<12x1xf32>
    %c0_302 = arith.constant 0 : index
    %c0_303 = arith.constant 0 : index
    %316 = vector.load %arg22[%c0_302, %c0_303] : memref<1x96xf32, #tpu.memory_space<vmem>>, vector<1x96xf32>
    %317 = vector.broadcast %315 : vector<12x1xf32> to vector<12x96xf32>
    %318 = vector.broadcast %316 : vector<1x96xf32> to vector<12x96xf32>
    %319 = arith.mulf %317, %318 : vector<12x96xf32>
    %c0_304 = arith.constant 0 : index
    %c0_305 = arith.constant 0 : index
    %320 = vector.load %arg23[%c0_304, %c0_305] : memref<1x96xf32, #tpu.memory_space<vmem>>, vector<1x96xf32>
    %321 = vector.broadcast %320 : vector<1x96xf32> to vector<12x96xf32>
    %322 = arith.addf %319, %321 : vector<12x96xf32>
    %cst_306 = arith.constant 0.000000e+00 : f32
    %323 = vector.broadcast %cst_306 : f32 to vector<12x96xf32>
    %324 = arith.maximumf %322, %323 : vector<12x96xf32>
    %c0_307 = arith.constant 0 : index
    %c0_308 = arith.constant 0 : index
    %325 = vector.load %arg24[%c0_307, %c0_308] : memref<96x8xf32, #tpu.memory_space<vmem>>, vector<96x8xf32>
    %cst_309 = arith.constant dense<0.000000e+00> : vector<12x8xf32>
    %326 = tpu.matmul %324, %325, %cst_309 {dimension_numbers = #tpu.dot_dimension_numbers<[1], [0], [0], [1], [0, 0, 1, 1], [], []>} : vector<12x96xf32>, vector<96x8xf32>, vector<12x8xf32> -> vector<12x8xf32>
    %c0_310 = arith.constant 0 : index
    %c0_311 = arith.constant 0 : index
    %327 = vector.load %arg25[%c0_310, %c0_311] : memref<1x8xf32, #tpu.memory_space<vmem>>, vector<1x8xf32>
    %328 = vector.broadcast %327 : vector<1x8xf32> to vector<12x8xf32>
    %329 = arith.addf %326, %328 : vector<12x8xf32>
    %cst_312 = arith.constant 0.000000e+00 : f32
    %330 = vector.broadcast %cst_312 : f32 to vector<12x8xf32>
    %331 = arith.maximumf %329, %330 : vector<12x8xf32>
    %c2_313 = arith.constant 2 : index
    %c0_314 = arith.constant 0 : index
    %c0_315 = arith.constant 0 : index
    %332 = vector.load %arg26[%c2_313, %c0_314, %c0_315] : memref<4x8x4xf32, #tpu.memory_space<vmem>>, vector<1x8x4xf32>
    %333 = vector.shape_cast %332 : vector<1x8x4xf32> to vector<8x4xf32>
    %cst_316 = arith.constant dense<0.000000e+00> : vector<12x4xf32>
    %334 = tpu.matmul %331, %333, %cst_316 {dimension_numbers = #tpu.dot_dimension_numbers<[1], [0], [0], [1], [0, 0, 1, 1], [], []>} : vector<12x8xf32>, vector<8x4xf32>, vector<12x4xf32> -> vector<12x4xf32>
    %335 = arith.addf %314, %334 : vector<12x4xf32>
    %336 = vector.extract_strided_slice %157 {offsets = [0, 3], sizes = [12, 1], strides = [1, 1]} : vector<12x4xf32> to vector<12x1xf32>
    %c0_317 = arith.constant 0 : index
    %c0_318 = arith.constant 0 : index
    %337 = vector.load %arg22[%c0_317, %c0_318] : memref<1x96xf32, #tpu.memory_space<vmem>>, vector<1x96xf32>
    %338 = vector.broadcast %336 : vector<12x1xf32> to vector<12x96xf32>
    %339 = vector.broadcast %337 : vector<1x96xf32> to vector<12x96xf32>
    %340 = arith.mulf %338, %339 : vector<12x96xf32>
    %c0_319 = arith.constant 0 : index
    %c0_320 = arith.constant 0 : index
    %341 = vector.load %arg23[%c0_319, %c0_320] : memref<1x96xf32, #tpu.memory_space<vmem>>, vector<1x96xf32>
    %342 = vector.broadcast %341 : vector<1x96xf32> to vector<12x96xf32>
    %343 = arith.addf %340, %342 : vector<12x96xf32>
    %cst_321 = arith.constant 0.000000e+00 : f32
    %344 = vector.broadcast %cst_321 : f32 to vector<12x96xf32>
    %345 = arith.maximumf %343, %344 : vector<12x96xf32>
    %c0_322 = arith.constant 0 : index
    %c0_323 = arith.constant 0 : index
    %346 = vector.load %arg24[%c0_322, %c0_323] : memref<96x8xf32, #tpu.memory_space<vmem>>, vector<96x8xf32>
    %cst_324 = arith.constant dense<0.000000e+00> : vector<12x8xf32>
    %347 = tpu.matmul %345, %346, %cst_324 {dimension_numbers = #tpu.dot_dimension_numbers<[1], [0], [0], [1], [0, 0, 1, 1], [], []>} : vector<12x96xf32>, vector<96x8xf32>, vector<12x8xf32> -> vector<12x8xf32>
    %c0_325 = arith.constant 0 : index
    %c0_326 = arith.constant 0 : index
    %348 = vector.load %arg25[%c0_325, %c0_326] : memref<1x8xf32, #tpu.memory_space<vmem>>, vector<1x8xf32>
    %349 = vector.broadcast %348 : vector<1x8xf32> to vector<12x8xf32>
    %350 = arith.addf %347, %349 : vector<12x8xf32>
    %cst_327 = arith.constant 0.000000e+00 : f32
    %351 = vector.broadcast %cst_327 : f32 to vector<12x8xf32>
    %352 = arith.maximumf %350, %351 : vector<12x8xf32>
    %c3_328 = arith.constant 3 : index
    %c0_329 = arith.constant 0 : index
    %c0_330 = arith.constant 0 : index
    %353 = vector.load %arg26[%c3_328, %c0_329, %c0_330] : memref<4x8x4xf32, #tpu.memory_space<vmem>>, vector<1x8x4xf32>
    %354 = vector.shape_cast %353 : vector<1x8x4xf32> to vector<8x4xf32>
    %cst_331 = arith.constant dense<0.000000e+00> : vector<12x4xf32>
    %355 = tpu.matmul %352, %354, %cst_331 {dimension_numbers = #tpu.dot_dimension_numbers<[1], [0], [0], [1], [0, 0, 1, 1], [], []>} : vector<12x8xf32>, vector<8x4xf32>, vector<12x4xf32> -> vector<12x4xf32>
    %356 = arith.addf %335, %355 : vector<12x4xf32>
    %357 = tpu.iota {dimensions = array<i32: 0>} : vector<12x4xi32>
    %c6_i32 = arith.constant 6 : i32
    %358 = vector.broadcast %c6_i32 : i32 to vector<12x4xi32>
    %359 = arith.cmpi slt, %357, %358 : vector<12x4xi32>
    %360 = math.tanh %356 : vector<12x4xf32>
    %cst_332 = arith.constant 0.000000e+00 : f32
    %361 = vector.broadcast %cst_332 : f32 to vector<12x4xf32>
    %362 = arith.maximumf %356, %361 : vector<12x4xf32>
    %363 = arith.select %359, %360, %362 : vector<12x4xi1>, vector<12x4xf32>
    %c0_333 = arith.constant 0 : index
    %c0_334 = arith.constant 0 : index
    %c0_335 = arith.constant 0 : index
    %364 = vector.load %arg27[%c0_333, %c0_334, %c0_335] : memref<1x12x4xf32, #tpu.memory_space<vmem>>, vector<1x12x4xf32>
    %365 = vector.shape_cast %364 : vector<1x12x4xf32> to vector<12x4xf32>
    %366 = vector.shape_cast %363 : vector<12x4xf32> to vector<1x12x4xf32>
    tpu.vector_store %arg27[%c0_333, %c0_334, %c0_335], %366 {strides = array<i32>} : memref<1x12x4xf32, #tpu.memory_space<vmem>>, vector<1x12x4xf32>,
    return
  }
  func.func @transform_0(%arg0: i32) -> (i32, i32, i32) {
    %c0_i32 = arith.constant 0 : i32
    %c0_i32_0 = arith.constant 0 : i32
    %c0_i32_1 = arith.constant 0 : i32
    return %arg0, %c0_i32, %c0_i32_0 : i32, i32, i32
  }
  func.func @transform_1(%arg0: i32) -> (i32, i32) {
    %c0_i32 = arith.constant 0 : i32
    %c0_i32_0 = arith.constant 0 : i32
    %c0_i32_1 = arith.constant 0 : i32
    return %c0_i32, %c0_i32_0 : i32, i32
  }
  func.func @transform_2(%arg0: i32) -> (i32, i32) {
    %c0_i32 = arith.constant 0 : i32
    %c0_i32_0 = arith.constant 0 : i32
    %c0_i32_1 = arith.constant 0 : i32
    return %c0_i32, %c0_i32_0 : i32, i32
  }
  func.func @transform_3(%arg0: i32) -> (i32, i32, i32) {
    %c0_i32 = arith.constant 0 : i32
    %c0_i32_0 = arith.constant 0 : i32
    %c0_i32_1 = arith.constant 0 : i32
    %c0_i32_2 = arith.constant 0 : i32
    return %c0_i32, %c0_i32_0, %c0_i32_1 : i32, i32, i32
  }
  func.func @transform_4(%arg0: i32) -> (i32, i32) {
    %c0_i32 = arith.constant 0 : i32
    %c0_i32_0 = arith.constant 0 : i32
    %c0_i32_1 = arith.constant 0 : i32
    return %c0_i32, %c0_i32_0 : i32, i32
  }
  func.func @transform_5(%arg0: i32) -> (i32, i32, i32) {
    %c0_i32 = arith.constant 0 : i32
    %c0_i32_0 = arith.constant 0 : i32
    %c0_i32_1 = arith.constant 0 : i32
    %c0_i32_2 = arith.constant 0 : i32
    return %c0_i32, %c0_i32_0, %c0_i32_1 : i32, i32, i32
  }
  func.func @transform_6(%arg0: i32) -> (i32, i32, i32) {
    %c0_i32 = arith.constant 0 : i32
    %c0_i32_0 = arith.constant 0 : i32
    %c0_i32_1 = arith.constant 0 : i32
    %c0_i32_2 = arith.constant 0 : i32
    return %c0_i32, %c0_i32_0, %c0_i32_1 : i32, i32, i32
  }
  func.func @transform_7(%arg0: i32) -> (i32, i32) {
    %c0_i32 = arith.constant 0 : i32
    %c0_i32_0 = arith.constant 0 : i32
    %c0_i32_1 = arith.constant 0 : i32
    return %c0_i32, %c0_i32_0 : i32, i32
  }
  func.func @transform_8(%arg0: i32) -> (i32, i32, i32) {
    %c0_i32 = arith.constant 0 : i32
    %c0_i32_0 = arith.constant 0 : i32
    %c0_i32_1 = arith.constant 0 : i32
    %c0_i32_2 = arith.constant 0 : i32
    return %c0_i32, %c0_i32_0, %c0_i32_1 : i32, i32, i32
  }
  func.func @transform_9(%arg0: i32) -> (i32, i32, i32) {
    %c0_i32 = arith.constant 0 : i32
    %c0_i32_0 = arith.constant 0 : i32
    %c0_i32_1 = arith.constant 0 : i32
    %c0_i32_2 = arith.constant 0 : i32
    return %c0_i32, %c0_i32_0, %c0_i32_1 : i32, i32, i32
  }
  func.func @transform_10(%arg0: i32) -> (i32, i32) {
    %c0_i32 = arith.constant 0 : i32
    %c0_i32_0 = arith.constant 0 : i32
    %c0_i32_1 = arith.constant 0 : i32
    return %c0_i32, %c0_i32_0 : i32, i32
  }
  func.func @transform_11(%arg0: i32) -> (i32, i32) {
    %c0_i32 = arith.constant 0 : i32
    %c0_i32_0 = arith.constant 0 : i32
    %c0_i32_1 = arith.constant 0 : i32
    return %c0_i32, %c0_i32_0 : i32, i32
  }
  func.func @transform_12(%arg0: i32) -> (i32, i32) {
    %c0_i32 = arith.constant 0 : i32
    %c0_i32_0 = arith.constant 0 : i32
    %c0_i32_1 = arith.constant 0 : i32
    return %c0_i32, %c0_i32_0 : i32, i32
  }
  func.func @transform_13(%arg0: i32) -> (i32, i32) {
    %c0_i32 = arith.constant 0 : i32
    %c0_i32_0 = arith.constant 0 : i32
    %c0_i32_1 = arith.constant 0 : i32
    return %c0_i32, %c0_i32_0 : i32, i32
  }
  func.func @transform_14(%arg0: i32) -> (i32, i32) {
    %c0_i32 = arith.constant 0 : i32
    %c0_i32_0 = arith.constant 0 : i32
    %c0_i32_1 = arith.constant 0 : i32
    return %c0_i32, %c0_i32_0 : i32, i32
  }
  func.func @transform_15(%arg0: i32) -> (i32, i32) {
    %c0_i32 = arith.constant 0 : i32
    %c0_i32_0 = arith.constant 0 : i32
    %c0_i32_1 = arith.constant 0 : i32
    return %c0_i32, %c0_i32_0 : i32, i32
  }
  func.func @transform_16(%arg0: i32) -> (i32, i32) {
    %c0_i32 = arith.constant 0 : i32
    %c0_i32_0 = arith.constant 0 : i32
    %c0_i32_1 = arith.constant 0 : i32
    return %c0_i32, %c0_i32_0 : i32, i32
  }
  func.func @transform_17(%arg0: i32) -> (i32, i32) {
    %c0_i32 = arith.constant 0 : i32
    %c0_i32_0 = arith.constant 0 : i32
    %c0_i32_1 = arith.constant 0 : i32
    return %c0_i32, %c0_i32_0 : i32, i32
  }
  func.func @transform_18(%arg0: i32) -> (i32, i32, i32) {
    %c0_i32 = arith.constant 0 : i32
    %c0_i32_0 = arith.constant 0 : i32
    %c0_i32_1 = arith.constant 0 : i32
    %c0_i32_2 = arith.constant 0 : i32
    return %c0_i32, %c0_i32_0, %c0_i32_1 : i32, i32, i32
  }
  func.func @transform_19(%arg0: i32) -> (i32, i32) {
    %c0_i32 = arith.constant 0 : i32
    %c0_i32_0 = arith.constant 0 : i32
    %c0_i32_1 = arith.constant 0 : i32
    return %c0_i32, %c0_i32_0 : i32, i32
  }
  func.func @transform_20(%arg0: i32) -> (i32, i32, i32) {
    %c0_i32 = arith.constant 0 : i32
    %c0_i32_0 = arith.constant 0 : i32
    %c0_i32_1 = arith.constant 0 : i32
    %c0_i32_2 = arith.constant 0 : i32
    return %c0_i32, %c0_i32_0, %c0_i32_1 : i32, i32, i32
  }
  func.func @transform_21(%arg0: i32) -> (i32, i32) {
    %c0_i32 = arith.constant 0 : i32
    %c0_i32_0 = arith.constant 0 : i32
    %c0_i32_1 = arith.constant 0 : i32
    return %c0_i32, %c0_i32_0 : i32, i32
  }
  func.func @transform_22(%arg0: i32) -> (i32, i32) {
    %c0_i32 = arith.constant 0 : i32
    %c0_i32_0 = arith.constant 0 : i32
    %c0_i32_1 = arith.constant 0 : i32
    return %c0_i32, %c0_i32_0 : i32, i32
  }
  func.func @transform_23(%arg0: i32) -> (i32, i32) {
    %c0_i32 = arith.constant 0 : i32
    %c0_i32_0 = arith.constant 0 : i32
    %c0_i32_1 = arith.constant 0 : i32
    return %c0_i32, %c0_i32_0 : i32, i32
  }
  func.func @transform_24(%arg0: i32) -> (i32, i32) {
    %c0_i32 = arith.constant 0 : i32
    %c0_i32_0 = arith.constant 0 : i32
    %c0_i32_1 = arith.constant 0 : i32
    return %c0_i32, %c0_i32_0 : i32, i32
  }
  func.func @transform_25(%arg0: i32) -> (i32, i32, i32) {
    %c0_i32 = arith.constant 0 : i32
    %c0_i32_0 = arith.constant 0 : i32
    %c0_i32_1 = arith.constant 0 : i32
    %c0_i32_2 = arith.constant 0 : i32
    return %c0_i32, %c0_i32_0, %c0_i32_1 : i32, i32, i32
  }
  func.func @transform_26(%arg0: i32) -> (i32, i32, i32) {
    %c0_i32 = arith.constant 0 : i32
    %c0_i32_0 = arith.constant 0 : i32
    %c0_i32_1 = arith.constant 0 : i32
    return %arg0, %c0_i32, %c0_i32_0 : i32, i32, i32
  }
  func.func @transform_27(%arg0: i32) -> (i32, i32, i32) {
    %c0_i32 = arith.constant 0 : i32
    %c0_i32_0 = arith.constant 0 : i32
    %c0_i32_1 = arith.constant 0 : i32
    return %arg0, %c0_i32, %c0_i32_0 : i32, i32, i32
  }
  func.func @transform_28(%arg0: i32) -> (i32, i32, i32) {
    %c0_i32 = arith.constant 0 : i32
    %c0_i32_0 = arith.constant 0 : i32
    %c0_i32_1 = arith.constant 0 : i32
    return %arg0, %c0_i32, %c0_i32_0 : i32, i32, i32
  }
}

</mosaic_0001>

<bundles_post_ra>
// kernel: anchor_box_predictor_forward.1
= control target key start
LH: loop header
LB: loop body
LE: loop exit
PB: predicated region body
PF: predicated region fallthrough
CT: control target
= control target key end

     0   :  { %s10333_s0 = inlined_call_operand.vmem [shape: f32[2,36,96], index: 0, kind: input, shape index: {}]   ;;  %s10334_s1 = inlined_call_operand.vmem [shape: f32[12,36], index: 1, kind: input, shape index: {}]   ;;  %s10335_s2 = inlined_call_operand.vmem [shape: f32[12,1], index: 2, kind: input, shape index: {}]   ;;  %s10336_s3 = inlined_call_operand.vmem [shape: f32[9,12,12], index: 3, kind: input, shape index: {}]   ;;  %s10337_s4 = inlined_call_operand.vmem [shape: f32[12,1], index: 4, kind: input, shape index: {}]   ;;  %s10338_s5 = inlined_call_operand.vmem [shape: f32[9,96,24], index: 5, kind: input, shape index: {}]   ;;  %s10339_s6 = inlined_call_operand.vmem [shape: f32[9,12,12], index: 6, kind: input, shape index: {}]   ;;  %s10340_s7 = inlined_call_operand.vmem [shape: f32[12,1], index: 7, kind: input, shape index: {}]   ;;  %s10341_s8 = inlined_call_operand.vmem [shape: f32[9,24,24], index: 8, kind: input, shape index: {}]   ;;  %s10342_s9 = inlined_call_operand.vmem [shape: f32[4,24,4], index: 9, kind: input, shape index: {}]   ;;  %s10343_s10 = inlined_call_operand.vmem [shape: f32[1,12], index: 10, kind: input, shape index: {}]   ;;  %s10344_s11 = inlined_call_operand.<no memory space> [shape: f32[1,1], index: 11, kind: input, shape index: {}]   ;;  %s10345_s12 = inlined_call_operand.vmem [shape: f32[1,12], index: 12, kind: input, shape index: {}]   ;;  %s10346_s14 = inlined_call_operand.vmem [shape: f32[12,12], index: 14, kind: input, shape index: {}]   ;;  %s10347_s15 = inlined_call_operand.vmem [shape: f32[12,1], index: 15, kind: input, shape index: {}]   ;;  %s10348_s17 = inlined_call_operand.vmem [shape: f32[4,4], index: 17, kind: input, shape index: {}]   ;;  %s10349_s18 = inlined_call_operand.vmem [shape: f32[9,3,12], index: 18, kind: input, shape index: {}]   ;;  %s10350_s19 = inlined_call_operand.vmem [shape: f32[3,1], index: 19, kind: input, shape index: {}]   ;;  %s10351_s20 = inlined_call_operand.vmem [shape: f32[9,4,4], index: 20, kind: input, shape index: {}]   ;;  %s10352_s21 = inlined_call_operand.vmem [shape: f32[1,96], index: 21, kind: input, shape index: {}]   ;;  %s10353_s22 = inlined_call_operand.vmem [shape: f32[1,96], index: 22, kind: input, shape index: {}]   ;;  %s10354_s23 = inlined_call_operand.vmem [shape: f32[96,8], index: 23, kind: input, shape index: {}]   ;;  %s10355_s24 = inlined_call_operand.vmem [shape: f32[1,8], index: 24, kind: input, shape index: {}]   ;;  %s10356_s25 = inlined_call_operand.vmem [shape: f32[4,8,4], index: 25, kind: input, shape index: {}]   ;;  %s10357_s26 = inlined_call_operand.vmem [shape: f32[2,12,4], index: 26, kind: output, shape index: {0}]   ;;  %s10358_s27 = inlined_call_operand.vmem [shape: f32[2,3,4], index: 27, kind: output, shape index: {1}]   ;;  %s10359_s28 = inlined_call_operand.vmem [shape: f32[2,3,4], index: 28, kind: output, shape index: {2}]   ;;  %s10360_s13 = inlined_call_operand.<no memory space> [shape: f32[1,1], index: 13, kind: input, shape index: {}]   ;;  %s10361_s16 = inlined_call_operand.<no memory space> [shape: f32[1,1], index: 16, kind: input, shape index: {}]  }
   0x1   :  { %10373 = sst [smem:[#allocation5_spill]] %s10333_s0  ;;  %v36_v1 = vstv %s10360_s13  ;;  %v38_v2 = vstv %s10361_s16  ;;  %s9099_s0 = smov 0  }
   0x2   :  { %10374 = sst [smem:[#allocation6_spill]] %s10334_s1  ;;  %37 = vst [vmem:[#allocation3] sm:$0x1] %v36_v1  ;;  %39 = vst [vmem:[#allocation4] sm:$0x1] %v38_v2 }
   0x3   :  { %10375 = sst [smem:[#allocation7_spill]] %s10335_s2 }
   0x4   :  { %10376 = sst [smem:[#allocation8_spill]] %s10336_s3 }
   0x5   :  { %10377 = sst [smem:[#allocation9_spill]] %s10337_s4 }
   0x6   :  { %10378 = sst [smem:[#allocation10_spill]] %s10338_s5 }
   0x7   :  { %10379 = sst [smem:[#allocation11_spill]] %s10339_s6 }
   0x8   :  { %10380 = sst [smem:[#allocation12_spill]] %s10340_s7 }
   0x9   :  { %10381 = sst [smem:[#allocation13_spill]] %s10341_s8 }
   0xa   :  { %10382 = sst [smem:[#allocation14_spill]] %s10342_s9 }
   0xb   :  { %10383 = sst [smem:[#allocation15_spill]] %s10343_s10 }
   0xc   :  { %10384 = sst [smem:[#allocation16_spill]] %s10344_s11 }
   0xd   :  { %10385 = sst [smem:[#allocation17_spill]] %s10345_s12 }
   0xe   :  { %s10386_s9 = sld [smem:[#allocation16_spill]] }
  0x14   :  { %v34_v0 = vstv %s10386_s9 }
  0x15   :  { %35 = vst [vmem:[#allocation2] sm:$0x1] %v34_v0 }
  0x16 LB: > { %s7341_s11 = sadd.s32 4294967295, %s8937_s0   ;;  %p7345_p0 = scmp.ge.s32.totalorder %s8937_s0, 1  ;;  %s8937_s0 = sphi %s9099_s0, %s45_s0  }
  0x17   : > { %p773_p1 = scmp.lt.s32.totalorder %s8937_s0, 3 }
  0x19   : > { %p774_p2 = pnand %p7345_p0, %p773_p1 }
  0x1a   : > { %p855_p3 = scmp.lt.s32.totalorder (!%p774_p2), %s7341_s11, 1  ;;  %s10387_s29 = sld [smem:[#allocation6_spill]] (!%p774_p2) }
  0x1b   : > { %777 = sbr.rel (%p774_p2) target bundleno = 6998 (0x1b56), region = 124  ;;  %s10388_s12 = sld [smem:[#allocation7_spill]] (!%p774_p2) }
  0x1c   : > { %s10389_s8 = sld [smem:[#allocation10_spill]] (!%p774_p2) }
  0x1d   : > { %s10390_s7 = sld [smem:[#allocation5_spill]] (!%p774_p2) }
  0x1e   : > { %s10391_s6 = sld [smem:[#allocation12_spill]] (!%p774_p2) }
  0x1f   : > { %s10392_s3 = sld [smem:[#allocation8_spill]] (!%p774_p2) }
  0x20   : > { %v873_v3 = vld [vmem:[%s10387_s29] sm:$0xff]  ;;  %vm892_vm0 = vcmask 293888   ;;  %s10400_s11 = smov (!%p855_p3, %s7341_s11), 1  ;;  %v8939_v5 = vmov 0   ;;  %vm899_vm1 = vcmask 1043456   ;;  %vm996_vm2 = vcmask 785408  }
  0x21   : > { %8137 = vmatprep.mubr.msk.f32.mxu0 %vm892_vm0, %v873_v3  ;;  %v880_v4 = vld [vmem:[%s10388_s12] sm:$0xff]  ;;  %8913 = vset.pattern.permute.xlu0 %v8939_v5  ;;  %s8898_s30 = smul.u32 40, %s10400_s11  ;;  %v881_v8 = vld [vmem:[%s10388_s12 + $0x8] sm:$0xf]  ;;  %vm1078_vm3 = vcmask 97280   ;;  %s10393_s10 = sld [smem:[#allocation9_spill]] }
  0x22   : > { %v995_v6 = vld [vmem:[%s10389_s8 + $0x58] sm:$0xff]  ;;  %8914 = vset.pattern.permute.xlu1 %v8939_v5  ;;  %884 = vperm.xlu0 %8913, %v880_v4   ;;  %v994_v7 = vld [vmem:[%s10389_s8 + $0x50] sm:$0xff]  ;;  %v993_v9 = vld [vmem:[%s10389_s8 + $0x48] sm:$0xff]  ;;  %vm2600_vm4 = vcmask 195584   ;;  %s10395_s5 = sld [smem:[#allocation11_spill]]  ;;  %vm8941_vm5 = vmmov 0  }
  0x23   : > { %8140 = vmatprep.subr.mxu1 %v995_v6  ;;  %s859_s1 = scalar_lea.vmem %s10390_s7, %s8898_s30  ;;  %v992_v10 = vld [vmem:[%s10389_s8 + $0x40] sm:$0xff]  ;;  %v991_v15 = vld [vmem:[%s10389_s8 + $0x38] sm:$0xff]  ;;  %v990_v17 = vld [vmem:[%s10389_s8 + $0x30] sm:$0xff]  ;;  %s10396_s9 = sld [smem:[#allocation14_spill]]  ;;  %vm4737_vm7 = vcmask 1040384   ;;  %vm4729_vm8 = vcmask 27648  }
  0x24   : > { %8141 = vmatpush3.msra.mxu1 %v995_v6  ;;  %v879_v11 = vld [vmem:[%s859_s1 + $0x20] sm:$0xf]  ;;  %v878_v12 = vld [vmem:[%s859_s1 + $0x18] sm:$0xff]  ;;  %v877_v14 = vld [vmem:[%s859_s1 + $0x10] sm:$0xff]  ;;  %s10397_s30 = sld [smem:[#allocation15_spill]]  ;;  %vm4733_vm9 = vcmask 7168  }
  0x25   : > { %8142 = vmatprep.subr.mxu1 %v994_v7  ;;  %8127 = vmatprep.subr.msk.mxu0 %vm899_vm1, %v879_v11  ;;  %v2593_v13 = vld [vmem:[%s10391_s6] sm:$0xff]  ;;  %v876_v16 = vld [vmem:[%s859_s1 + $0x8] sm:$0xff]  ;;  %v987_v24 = vld [vmem:[%s10389_s8 + $0x18] sm:$0xff]  ;;  %vm4822_vm10 = vcmask 31744   ;;  %vm6686_vm11 = vcmask 64512   ;;  %s7349_s7 = sshll.u32 %s10400_s11, 2 }
  0x26   : > { %8143 = vmatpush3.msra.mxu1 %v994_v7  ;;  %889 = vperm.xlu0 %8913, %v881_v8   ;;  %v4452_v18 = vld [vmem:[#allocation2] sm:$0x1]  ;;  %v989_v20 = vld [vmem:[%s10389_s8 + $0x28] sm:$0xff]  ;;  %v4539_v22 = vld [vmem:[#allocation3] sm:$0x1]  ;;  %s872_s13 = scalar_lea.vmem %s10359_s28, %s7349_s7  ;;  %vm6452_vm12 = vcmask 26624   ;;  %s868_s16 = scalar_lea.vmem %s10358_s27, %s7349_s7 }
  0x27   : > { %8144 = vmatprep.subr.mxu1 %v993_v9  ;;  %8128 = vmatpush3.msk.msra.mxu0 %vm899_vm1, %v879_v11  ;;  %v875_v19 = vld [vmem:[%s859_s1] sm:$0xff]  ;;  %v874_v21 = vld [vmem:[%s10387_s29 + $0x8] sm:$0xf]  ;;  %v986_v25 = vld [vmem:[%s10389_s8 + $0x10] sm:$0xff]  ;;  %s10394_s1 = sld [smem:[#allocation13_spill]] }
  0x28   : > { %8145 = vmatpush3.msra.mxu1 %v993_v9  ;;  %8129 = vmatprep.subr.mxu0 %v878_v12  ;;  %v988_v23 = vld [vmem:[%s10389_s8 + $0x20] sm:$0xff]  ;;  %v985_v26 = vld [vmem:[%s10389_s8 + $0x8] sm:$0xff]  ;;  %v7372_v42 = vld [vmem:[%s10389_s8 + $0xb8] sm:$0xff] }
  0x29   : > { %8146 = vmatprep.subr.mxu1 %v992_v10  ;;  %8130 = vmatpush3.msra.mxu0 %v878_v12  ;;  %v984_v27 = vld [vmem:[%s10389_s8] sm:$0xff]  ;;  %v981_v38 = vld [vmem:[%s10393_s10 + $0x8] sm:$0xf]  ;;  %v7371_v43 = vld [vmem:[%s10389_s8 + $0xb0] sm:$0xff] }
  0x2a   : > { %8147 = vmatpush3.msra.mxu1 %v992_v10  ;;  %2768 = vperm.xlu0 %8913, %v2593_v13   ;;  %v982_v36 = vld [vmem:[%s10392_s3] sm:$0xff]  ;;  %v983_v41 = vld [vmem:[%s10392_s3 + $0x8] sm:$0xf]  ;;  %v7368_v46 = vld [vmem:[%s10389_s8 + $0x98] sm:$0xff] }
  0x2b   : > { %8131 = vmatprep.subr.mxu0 %v877_v14  ;;  %8148 = vmatprep.subr.mxu1 %v991_v15  ;;  %v980_v37 = vld [vmem:[%s10393_s10] sm:$0xff]  ;;  %v7370_v44 = vld [vmem:[%s10389_s8 + $0xa8] sm:$0xff]  ;;  %v7367_v47 = vld [vmem:[%s10389_s8 + $0x90] sm:$0xff] }
  0x2c   : > { %8132 = vmatpush3.msra.mxu0 %v877_v14  ;;  %8149 = vmatpush3.msra.mxu1 %v991_v15  ;;  %v7369_v45 = vld [vmem:[%s10389_s8 + $0xa0] sm:$0xff]  ;;  %v7366_v48 = vld [vmem:[%s10389_s8 + $0x88] sm:$0xff]  ;;  %v7364_v50 = vld [vmem:[%s10389_s8 + $0x78] sm:$0xff] }
  0x2d   : > { %8133 = vmatprep.subr.mxu0 %v876_v16  ;;  %8150 = vmatprep.subr.mxu1 %v990_v17  ;;  %v7365_v49 = vld [vmem:[%s10389_s8 + $0x80] sm:$0xff]  ;;  %v7363_v51 = vld [vmem:[%s10389_s8 + $0x70] sm:$0xff]  ;;  %v7362_v52 = vld [vmem:[%s10389_s8 + $0x68] sm:$0xff] }
  0x2e   : > { %8134 = vmatpush3.msra.mxu0 %v876_v16  ;;  %4455 = vperm.xlu0 %8913, %v4452_v18   ;;  %v7361_v53 = vld [vmem:[%s10389_s8 + $0x60] sm:$0xff]  ;;  %v7359_v54 = vld [vmem:[%s10392_s3 + $0x10] sm:$0xff]  ;;  %v7360_v59 = vld [vmem:[%s10392_s3 + $0x18] sm:$0xf] }
  0x2f   : > { %8135 = vmatprep.subr.mxu0 %v875_v19  ;;  %8151 = vmatpush3.msra.mxu1 %v990_v17  ;;  %v7391_v60 = vld [vmem:[%s10389_s8 + $0x118] sm:$0xff]  ;;  %v7390_v61 = vld [vmem:[%s10389_s8 + $0x110] sm:$0xff]  ;;  %v7389_v62 = vld [vmem:[%s10389_s8 + $0x108] sm:$0xff] }
  0x30   : > { %8136 = vmatpush3.msra.mxu0 %v875_v19  ;;  %8152 = vmatprep.subr.mxu1 %v989_v20  ;;  %v7388_v63 = vld [vmem:[%s10389_s8 + $0x100] sm:$0xff]  ;;  %v7387_v0 = vld [vmem:[%s10389_s8 + $0xf8] sm:$0xff]  ;;  %v7386_v1 = vld [vmem:[%s10389_s8 + $0xf0] sm:$0xff] }
  0x31   : > { %8138 = vmatmul.mubr.msk.f32.vlgmr.msra.gmra.mxu0 %vm892_vm0, %v874_v21  ;;  %8153 = vmatpush3.msra.mxu1 %v989_v20  ;;  %v7385_v2 = vld [vmem:[%s10389_s8 + $0xe8] sm:$0xff]  ;;  %v7384_v3 = vld [vmem:[%s10389_s8 + $0xe0] sm:$0xff]  ;;  %v7383_v4 = vld [vmem:[%s10389_s8 + $0xd8] sm:$0xff] }
  0x32   : > { %4542 = vperm.xlu0 %8913, %v4539_v22   ;;  %8154 = vmatprep.subr.mxu1 %v988_v23  ;;  %v7382_v6 = vld [vmem:[%s10389_s8 + $0xd0] sm:$0xff]  ;;  %v7381_v7 = vld [vmem:[%s10389_s8 + $0xc8] sm:$0xff]  ;;  %v7380_v8 = vld [vmem:[%s10389_s8 + $0xc0] sm:$0xff] }
  0x33   : > { %8155 = vmatpush3.msra.mxu1 %v988_v23  ;;  %8171 = vmatprep.mubr.msk.f32.mxu0 %vm1078_vm3, %v982_v36  ;;  %v7378_v9 = vld [vmem:[%s10392_s3 + $0x20] sm:$0xff]  ;;  %v7379_v20 = vld [vmem:[%s10392_s3 + $0x28] sm:$0xf]  ;;  %v7410_v21 = vld [vmem:[%s10389_s8 + $0x178] sm:$0xff] }
  0x34   : > { %8156 = vmatprep.subr.mxu1 %v987_v24  ;;  %1165 = vperm.xlu1 %8914, %v980_v37   ;;  %v7409_v22 = vld [vmem:[%s10389_s8 + $0x170] sm:$0xff]  ;;  %v7408_v23 = vld [vmem:[%s10389_s8 + $0x168] sm:$0xff] }
  0x35   : > { %8157 = vmatpush3.msra.mxu1 %v987_v24  ;;  %v7407_v24 = vld [vmem:[%s10389_s8 + $0x160] sm:$0xff] }
  0x36   : > { %8158 = vmatprep.subr.mxu1 %v986_v25 }
  0x37   : > { %8159 = vmatpush3.msra.mxu1 %v986_v25  ;;  %v7406_v25 = vld [vmem:[%s10389_s8 + $0x158] sm:$0xff] }
  0x38   : > { %8160 = vmatprep.subr.mxu1 %v985_v26  ;;  %1170 = vperm.xlu1 %8914, %v981_v38  }
  0x39   : > { %8161 = vmatpush3.msra.mxu1 %v985_v26  ;;  %v7405_v26 = vld [vmem:[%s10389_s8 + $0x150] sm:$0xff] }
  0x3a   : > { %8162 = vmatprep.subr.mxu1 %v984_v27 }
  0x3b   : > { %8163 = vmatpush3.msra.mxu1 %v984_v27  ;;  %v7404_v27 = vld [vmem:[%s10389_s8 + $0x148] sm:$0xff] }
  0x9d   : > { %v885_v28 = vpop.permute.xlu0 %884 }
  0xa1   : > { %v890_v30 = vpop.permute.xlu0 %889 }
  0xaf   : > { %v1166_v10 = vpop.permute.xlu1 %1165 }
  0xb3   : > { %v1171_v11 = vpop.permute.xlu1 %1170 }
  0xf1   : > { %v8139_v29 = vpop.f32.mrf.mxu0 }
  0xf2   : > { %v975_v31 = vadd.f32 %v8139_v29, %v890_v30  ;;  %v7402_v29 = vld [vmem:[%s10389_s8 + $0x138] sm:$0xff]  ;;  %v7401_v30 = vld [vmem:[%s10389_s8 + $0x130] sm:$0xff] }
  0xf3   : > { %v969_v32 = vpop.f32.mrf.mxu0 }
  0xf4   : > { %v970_v33 = vadd.f32 %v969_v32, %v885_v28  ;;  %v9172_v35 = vmax.f32 %v975_v31, 0.0  ;;  %v7403_v28 = vld [vmem:[%s10389_s8 + $0x140] sm:$0xff]  ;;  %v7400_v31 = vld [vmem:[%s10389_s8 + $0x128] sm:$0xff] }
  0xf5   : > { %v7399_v32 = vld [vmem:[%s10389_s8 + $0x120] sm:$0xff] }
  0xf6   : > { %v9170_v34 = vmax.f32 %v970_v33, 0.0  ;;  %v7397_v33 = vld [vmem:[%s10392_s3 + $0x30] sm:$0xff] }
  0xf8   : > { %8164 = vmatprep.mubr.msk.f32.mxu1 %vm996_vm2, %v9170_v34 }
  0xf9   : > { %8165 = vmatmul.mubr.msk.f32.vlgmr.msra.gmra.mxu1 %vm996_vm2, %v9172_v35 }
  0xfa   : > { %8205 = vmatprep.mubr.msk.f32.mxu1 %vm1078_vm3, %v7359_v54  ;;  %v7418_v54 = vld [vmem:[%s10389_s8 + $0x180] sm:$0xff] }
 0x1b9   : > { %v8166_v39 = vpop.f32.mrf.mxu1 }
 0x1ba   : > { %8167 = vmatprep.subr.msk.mxu0 %vm899_vm1, %v8166_v39 }
 0x1bb   : > { %v1069_v40 = vpop.f32.mrf.mxu1  ;;  %8168 = vmatpush3.msk.msra.mxu0 %vm899_vm1, %v8166_v39 }
 0x1bc   : > { %8169 = vmatprep.subr.mxu0 %v1069_v40 }
 0x1bd   : > { %8170 = vmatpush3.msra.mxu0 %v1069_v40 }
 0x1be   : > { %8172 = vmatmul.mubr.msk.f32.vlgmr.msra.gmra.mxu0 %vm1078_vm3, %v983_v41  ;;  %8174 = vmatprep.subr.mxu0 %v7372_v42 }
 0x1bf   : > { %8175 = vmatpush3.msra.mxu0 %v7372_v42  ;;  %8198 = vmatprep.mubr.msk.f32.mxu0 %vm996_vm2, %v9170_v34  ;;  %v7398_v42 = vld [vmem:[%s10392_s3 + $0x38] sm:$0xf] }
 0x1c0   : > { %8176 = vmatprep.subr.mxu0 %v7371_v43 }
 0x1c1   : > { %8177 = vmatpush3.msra.mxu0 %v7371_v43  ;;  %v7429_v43 = vld [vmem:[%s10389_s8 + $0x1d8] sm:$0xff] }
 0x1c2   : > { %8178 = vmatprep.subr.mxu0 %v7370_v44 }
 0x1c3   : > { %8179 = vmatpush3.msra.mxu0 %v7370_v44  ;;  %v7428_v44 = vld [vmem:[%s10389_s8 + $0x1d0] sm:$0xff] }
 0x1c4   : > { %8180 = vmatprep.subr.mxu0 %v7369_v45 }
 0x1c5   : > { %8181 = vmatpush3.msra.mxu0 %v7369_v45  ;;  %v7427_v45 = vld [vmem:[%s10389_s8 + $0x1c8] sm:$0xff] }
 0x1c6   : > { %8182 = vmatprep.subr.mxu0 %v7368_v46 }
 0x1c7   : > { %8183 = vmatpush3.msra.mxu0 %v7368_v46  ;;  %v7426_v46 = vld [vmem:[%s10389_s8 + $0x1c0] sm:$0xff] }
 0x1c8   : > { %8184 = vmatprep.subr.mxu0 %v7367_v47 }
 0x1c9   : > { %8185 = vmatpush3.msra.mxu0 %v7367_v47  ;;  %v7425_v47 = vld [vmem:[%s10389_s8 + $0x1b8] sm:$0xff] }
 0x1ca   : > { %8186 = vmatprep.subr.mxu0 %v7366_v48 }
 0x1cb   : > { %8187 = vmatpush3.msra.mxu0 %v7366_v48  ;;  %v7424_v48 = vld [vmem:[%s10389_s8 + $0x1b0] sm:$0xff] }
 0x1cc   : > { %8188 = vmatprep.subr.mxu0 %v7365_v49 }
 0x1cd   : > { %8189 = vmatpush3.msra.mxu0 %v7365_v49  ;;  %v7423_v49 = vld [vmem:[%s10389_s8 + $0x1a8] sm:$0xff] }
 0x1ce   : > { %8190 = vmatprep.subr.mxu0 %v7364_v50 }
 0x1cf   : > { %8191 = vmatpush3.msra.mxu0 %v7364_v50  ;;  %v7422_v50 = vld [vmem:[%s10389_s8 + $0x1a0] sm:$0xff] }
 0x1d0   : > { %8192 = vmatprep.subr.mxu0 %v7363_v51 }
 0x1d1   : > { %8193 = vmatpush3.msra.mxu0 %v7363_v51  ;;  %v7421_v51 = vld [vmem:[%s10389_s8 + $0x198] sm:$0xff] }
 0x1d2   : > { %8194 = vmatprep.subr.mxu0 %v7362_v52 }
 0x1d3   : > { %8195 = vmatpush3.msra.mxu0 %v7362_v52  ;;  %v7420_v52 = vld [vmem:[%s10389_s8 + $0x190] sm:$0xff] }
 0x1d4   : > { %8196 = vmatprep.subr.mxu0 %v7361_v53 }
 0x1d5   : > { %8197 = vmatpush3.msra.mxu0 %v7361_v53  ;;  %v7419_v53 = vld [vmem:[%s10389_s8 + $0x188] sm:$0xff] }
 0x1d6   : > { %8199 = vmatmul.mubr.msk.f32.vlgmr.msra.gmra.mxu0 %vm996_vm2, %v9172_v35 }
 0x1d7   : > { %8239 = vmatprep.mubr.msk.f32.mxu0 %vm1078_vm3, %v7378_v9  ;;  %v7439_v9 = vld [vmem:[%s10389_s8 + $0x1f0] sm:$0xff] }
 0x27e   : > { %v8173_v55 = vpop.f32.mrf.mxu0 }
 0x27f   : > { %v1174_v12 = vadd.f32 %v8173_v55, %v1171_v11  ;;  %v7416_v55 = vld [vmem:[%s10392_s3 + $0x40] sm:$0xff] }
 0x280   : > { %v1154_v56 = vpop.f32.mrf.mxu0  ;;  %v7437_v11 = vld [vmem:[%s10389_s8 + $0x1e0] sm:$0xff] }
 0x281   : > { %v1173_v14 = vadd.f32 %v1166_v10, %v1154_v56  ;;  %v7438_v10 = vld [vmem:[%s10389_s8 + $0x1e8] sm:$0xff] }
 0x296   : > { %v8200_v57 = vpop.f32.mrf.mxu0 }
 0x297   : > { %8201 = vmatprep.subr.msk.mxu1 %vm899_vm1, %v8200_v57 }
 0x298   : > { %v1257_v58 = vpop.f32.mrf.mxu0  ;;  %8202 = vmatpush3.msk.msra.mxu1 %vm899_vm1, %v8200_v57 }
 0x299   : > { %8203 = vmatprep.subr.mxu1 %v1257_v58 }
 0x29a   : > { %8204 = vmatpush3.msra.mxu1 %v1257_v58 }
 0x29b   : > { %8206 = vmatmul.mubr.msk.f32.vlgmr.msra.gmra.mxu1 %vm1078_vm3, %v7360_v59  ;;  %8208 = vmatprep.subr.mxu1 %v7391_v60 }
 0x29c   : > { %8209 = vmatpush3.msra.mxu1 %v7391_v60  ;;  %8232 = vmatprep.mubr.msk.f32.mxu1 %vm996_vm2, %v9170_v34 }
 0x29d   : > { %8210 = vmatprep.subr.mxu1 %v7390_v61 }
 0x29e   : > { %8211 = vmatpush3.msra.mxu1 %v7390_v61 }
 0x29f   : > { %8212 = vmatprep.subr.mxu1 %v7389_v62 }
 0x2a0   : > { %8213 = vmatpush3.msra.mxu1 %v7389_v62  ;;  %v7417_v62 = vld [vmem:[%s10392_s3 + $0x48] sm:$0xf] }
 0x2a1   : > { %8214 = vmatprep.subr.mxu1 %v7388_v63 }
 0x2a2   : > { %8215 = vmatpush3.msra.mxu1 %v7388_v63  ;;  %v7448_v63 = vld [vmem:[%s10389_s8 + $0x238] sm:$0xff] }
 0x2a3   : > { %8216 = vmatprep.subr.mxu1 %v7387_v0 }
 0x2a4   : > { %8217 = vmatpush3.msra.mxu1 %v7387_v0  ;;  %v7447_v0 = vld [vmem:[%s10389_s8 + $0x230] sm:$0xff] }
 0x2a5   : > { %8218 = vmatprep.subr.mxu1 %v7386_v1 }
 0x2a6   : > { %8219 = vmatpush3.msra.mxu1 %v7386_v1  ;;  %v7446_v1 = vld [vmem:[%s10389_s8 + $0x228] sm:$0xff] }
 0x2a7   : > { %8220 = vmatprep.subr.mxu1 %v7385_v2 }
 0x2a8   : > { %8221 = vmatpush3.msra.mxu1 %v7385_v2  ;;  %v7445_v2 = vld [vmem:[%s10389_s8 + $0x220] sm:$0xff] }
 0x2a9   : > { %8222 = vmatprep.subr.mxu1 %v7384_v3 }
 0x2aa   : > { %8223 = vmatpush3.msra.mxu1 %v7384_v3  ;;  %v7444_v3 = vld [vmem:[%s10389_s8 + $0x218] sm:$0xff] }
 0x2ab   : > { %8224 = vmatprep.subr.mxu1 %v7383_v4 }
 0x2ac   : > { %8225 = vmatpush3.msra.mxu1 %v7383_v4  ;;  %v7443_v4 = vld [vmem:[%s10389_s8 + $0x210] sm:$0xff] }
 0x2ad   : > { %8226 = vmatprep.subr.mxu1 %v7382_v6 }
 0x2ae   : > { %8227 = vmatpush3.msra.mxu1 %v7382_v6  ;;  %v7442_v6 = vld [vmem:[%s10389_s8 + $0x208] sm:$0xff] }
 0x2af   : > { %8228 = vmatprep.subr.mxu1 %v7381_v7 }
 0x2b0   : > { %8229 = vmatpush3.msra.mxu1 %v7381_v7  ;;  %v7441_v7 = vld [vmem:[%s10389_s8 + $0x200] sm:$0xff] }
 0x2b1   : > { %8230 = vmatprep.subr.mxu1 %v7380_v8 }
 0x2b2   : > { %8231 = vmatpush3.msra.mxu1 %v7380_v8  ;;  %v7440_v8 = vld [vmem:[%s10389_s8 + $0x1f8] sm:$0xff] }
 0x2b3   : > { %8233 = vmatmul.mubr.msk.f32.vlgmr.msra.gmra.mxu1 %vm996_vm2, %v9172_v35 }
 0x2b4   : > { %8273 = vmatprep.mubr.msk.f32.mxu1 %vm1078_vm3, %v7397_v33 }
 0x35b   : > { %v8207_v13 = vpop.f32.mrf.mxu1 }
 0x35c   : > { %v1351_v15 = vadd.f32 %v8207_v13, %v1174_v12  ;;  %v7435_v12 = vld [vmem:[%s10392_s3 + $0x50] sm:$0xff] }
 0x35d   : > { %v1341_v16 = vpop.f32.mrf.mxu1 }
 0x35e   : > { %v1350_v17 = vadd.f32 %v1341_v16, %v1173_v14 }
 0x373   : > { %v8234_v18 = vpop.f32.mrf.mxu1 }
 0x374   : > { %8235 = vmatprep.subr.msk.mxu0 %vm899_vm1, %v8234_v18 }
 0x375   : > { %v1434_v19 = vpop.f32.mrf.mxu1  ;;  %8236 = vmatpush3.msk.msra.mxu0 %vm899_vm1, %v8234_v18 }
 0x376   : > { %8237 = vmatprep.subr.mxu0 %v1434_v19 }
 0x377   : > { %8238 = vmatpush3.msra.mxu0 %v1434_v19  ;;  %v7436_v19 = vld [vmem:[%s10392_s3 + $0x58] sm:$0xf] }
 0x378   : > { %8240 = vmatmul.mubr.msk.f32.vlgmr.msra.gmra.mxu0 %vm1078_vm3, %v7379_v20  ;;  %8242 = vmatprep.subr.mxu0 %v7410_v21  ;;  %v7467_v20 = vld [vmem:[%s10389_s8 + $0x298] sm:$0xff] }
 0x379   : > { %8243 = vmatpush3.msra.mxu0 %v7410_v21  ;;  %8266 = vmatprep.mubr.msk.f32.mxu0 %vm996_vm2, %v9170_v34  ;;  %v7466_v21 = vld [vmem:[%s10389_s8 + $0x290] sm:$0xff] }
 0x37a   : > { %8244 = vmatprep.subr.mxu0 %v7409_v22 }
 0x37b   : > { %8245 = vmatpush3.msra.mxu0 %v7409_v22  ;;  %v7465_v22 = vld [vmem:[%s10389_s8 + $0x288] sm:$0xff] }
 0x37c   : > { %8246 = vmatprep.subr.mxu0 %v7408_v23 }
 0x37d   : > { %8247 = vmatpush3.msra.mxu0 %v7408_v23  ;;  %v7464_v23 = vld [vmem:[%s10389_s8 + $0x280] sm:$0xff] }
 0x37e   : > { %8248 = vmatprep.subr.mxu0 %v7407_v24 }
 0x37f   : > { %8249 = vmatpush3.msra.mxu0 %v7407_v24  ;;  %v7463_v24 = vld [vmem:[%s10389_s8 + $0x278] sm:$0xff] }
 0x380   : > { %8250 = vmatprep.subr.mxu0 %v7406_v25 }
 0x381   : > { %8251 = vmatpush3.msra.mxu0 %v7406_v25  ;;  %v7462_v25 = vld [vmem:[%s10389_s8 + $0x270] sm:$0xff] }
 0x382   : > { %8252 = vmatprep.subr.mxu0 %v7405_v26 }
 0x383   : > { %8253 = vmatpush3.msra.mxu0 %v7405_v26  ;;  %v7461_v26 = vld [vmem:[%s10389_s8 + $0x268] sm:$0xff] }
 0x384   : > { %8254 = vmatprep.subr.mxu0 %v7404_v27 }
 0x385   : > { %8255 = vmatpush3.msra.mxu0 %v7404_v27  ;;  %v7460_v27 = vld [vmem:[%s10389_s8 + $0x260] sm:$0xff] }
 0x386   : > { %8256 = vmatprep.subr.mxu0 %v7403_v28 }
 0x387   : > { %8257 = vmatpush3.msra.mxu0 %v7403_v28  ;;  %v7459_v28 = vld [vmem:[%s10389_s8 + $0x258] sm:$0xff] }
 0x388   : > { %8258 = vmatprep.subr.mxu0 %v7402_v29 }
 0x389   : > { %8259 = vmatpush3.msra.mxu0 %v7402_v29  ;;  %v7458_v29 = vld [vmem:[%s10389_s8 + $0x250] sm:$0xff] }
 0x38a   : > { %8260 = vmatprep.subr.mxu0 %v7401_v30 }
 0x38b   : > { %8261 = vmatpush3.msra.mxu0 %v7401_v30  ;;  %v7457_v30 = vld [vmem:[%s10389_s8 + $0x248] sm:$0xff] }
 0x38c   : > { %8262 = vmatprep.subr.mxu0 %v7400_v31 }
 0x38d   : > { %8263 = vmatpush3.msra.mxu0 %v7400_v31  ;;  %v7456_v31 = vld [vmem:[%s10389_s8 + $0x240] sm:$0xff] }
 0x38e   : > { %8264 = vmatprep.subr.mxu0 %v7399_v32 }
 0x38f   : > { %8265 = vmatpush3.msra.mxu0 %v7399_v32  ;;  %v7454_v32 = vld [vmem:[%s10392_s3 + $0x60] sm:$0xff] }
 0x390   : > { %8267 = vmatmul.mubr.msk.f32.vlgmr.msra.gmra.mxu0 %vm996_vm2, %v9172_v35 }
 0x391   : > { %8307 = vmatprep.mubr.msk.f32.mxu0 %vm1078_vm3, %v7416_v55 }
 0x438   : > { %v8241_v36 = vpop.f32.mrf.mxu0 }
 0x439   : > { %v1528_v37 = vadd.f32 %v8241_v36, %v1351_v15 }
 0x43a   : > { %v1518_v38 = vpop.f32.mrf.mxu0 }
 0x43b   : > { %v1527_v39 = vadd.f32 %v1518_v38, %v1350_v17 }
 0x450   : > { %v8268_v40 = vpop.f32.mrf.mxu0 }
 0x451   : > { %8269 = vmatprep.subr.msk.mxu1 %vm899_vm1, %v8268_v40 }
 0x452   : > { %v1611_v41 = vpop.f32.mrf.mxu0  ;;  %8270 = vmatpush3.msk.msra.mxu1 %vm899_vm1, %v8268_v40 }
 0x453   : > { %8271 = vmatprep.subr.mxu1 %v1611_v41 }
 0x454   : > { %8272 = vmatpush3.msra.mxu1 %v1611_v41  ;;  %v7455_v41 = vld [vmem:[%s10392_s3 + $0x68] sm:$0xf] }
 0x455   : > { %8274 = vmatmul.mubr.msk.f32.vlgmr.msra.gmra.mxu1 %vm1078_vm3, %v7398_v42  ;;  %8276 = vmatprep.subr.mxu1 %v7429_v43  ;;  %v7486_v42 = vld [vmem:[%s10389_s8 + $0x2f8] sm:$0xff] }
 0x456   : > { %8277 = vmatpush3.msra.mxu1 %v7429_v43  ;;  %8300 = vmatprep.mubr.msk.f32.mxu1 %vm996_vm2, %v9170_v34  ;;  %v7485_v43 = vld [vmem:[%s10389_s8 + $0x2f0] sm:$0xff] }
 0x457   : > { %8278 = vmatprep.subr.mxu1 %v7428_v44 }
 0x458   : > { %8279 = vmatpush3.msra.mxu1 %v7428_v44  ;;  %v7484_v44 = vld [vmem:[%s10389_s8 + $0x2e8] sm:$0xff] }
 0x459   : > { %8280 = vmatprep.subr.mxu1 %v7427_v45 }
 0x45a   : > { %8281 = vmatpush3.msra.mxu1 %v7427_v45  ;;  %v7483_v45 = vld [vmem:[%s10389_s8 + $0x2e0] sm:$0xff] }
 0x45b   : > { %8282 = vmatprep.subr.mxu1 %v7426_v46 }
 0x45c   : > { %8283 = vmatpush3.msra.mxu1 %v7426_v46  ;;  %v7482_v46 = vld [vmem:[%s10389_s8 + $0x2d8] sm:$0xff] }
 0x45d   : > { %8284 = vmatprep.subr.mxu1 %v7425_v47 }
 0x45e   : > { %8285 = vmatpush3.msra.mxu1 %v7425_v47  ;;  %v7481_v47 = vld [vmem:[%s10389_s8 + $0x2d0] sm:$0xff] }
 0x45f   : > { %8286 = vmatprep.subr.mxu1 %v7424_v48 }
 0x460   : > { %8287 = vmatpush3.msra.mxu1 %v7424_v48  ;;  %v7480_v48 = vld [vmem:[%s10389_s8 + $0x2c8] sm:$0xff] }
 0x461   : > { %8288 = vmatprep.subr.mxu1 %v7423_v49 }
 0x462   : > { %8289 = vmatpush3.msra.mxu1 %v7423_v49  ;;  %v7479_v49 = vld [vmem:[%s10389_s8 + $0x2c0] sm:$0xff] }
 0x463   : > { %8290 = vmatprep.subr.mxu1 %v7422_v50 }
 0x464   : > { %8291 = vmatpush3.msra.mxu1 %v7422_v50  ;;  %v7478_v50 = vld [vmem:[%s10389_s8 + $0x2b8] sm:$0xff] }
 0x465   : > { %8292 = vmatprep.subr.mxu1 %v7421_v51 }
 0x466   : > { %8293 = vmatpush3.msra.mxu1 %v7421_v51  ;;  %v7477_v51 = vld [vmem:[%s10389_s8 + $0x2b0] sm:$0xff] }
 0x467   : > { %8294 = vmatprep.subr.mxu1 %v7420_v52 }
 0x468   : > { %8295 = vmatpush3.msra.mxu1 %v7420_v52  ;;  %v7476_v52 = vld [vmem:[%s10389_s8 + $0x2a8] sm:$0xff] }
 0x469   : > { %8296 = vmatprep.subr.mxu1 %v7419_v53 }
 0x46a   : > { %8297 = vmatpush3.msra.mxu1 %v7419_v53  ;;  %v7475_v53 = vld [vmem:[%s10389_s8 + $0x2a0] sm:$0xff] }
 0x46b   : > { %8298 = vmatprep.subr.mxu1 %v7418_v54 }
 0x46c   : > { %8299 = vmatpush3.msra.mxu1 %v7418_v54  ;;  %v7473_v54 = vld [vmem:[%s10392_s3 + $0x70] sm:$0xff] }
 0x46d   : > { %8301 = vmatmul.mubr.msk.f32.vlgmr.msra.gmra.mxu1 %vm996_vm2, %v9172_v35 }
 0x46e   : > { %8341 = vmatprep.mubr.msk.f32.mxu1 %vm1078_vm3, %v7435_v12 }
 0x515   : > { %v8275_v56 = vpop.f32.mrf.mxu1 }
 0x516   : > { %v1705_v57 = vadd.f32 %v8275_v56, %v1528_v37 }
 0x517   : > { %v1695_v58 = vpop.f32.mrf.mxu1 }
 0x518   : > { %v1704_v59 = vadd.f32 %v1695_v58, %v1527_v39 }
 0x52d   : > { %v8302_v60 = vpop.f32.mrf.mxu1 }
 0x52e   : > { %8303 = vmatprep.subr.msk.mxu0 %vm899_vm1, %v8302_v60 }
 0x52f   : > { %v1788_v61 = vpop.f32.mrf.mxu1  ;;  %8304 = vmatpush3.msk.msra.mxu0 %vm899_vm1, %v8302_v60 }
 0x530   : > { %8305 = vmatprep.subr.mxu0 %v1788_v61 }
 0x531   : > { %8306 = vmatpush3.msra.mxu0 %v1788_v61  ;;  %v7474_v61 = vld [vmem:[%s10392_s3 + $0x78] sm:$0xf] }
 0x532   : > { %8308 = vmatmul.mubr.msk.f32.vlgmr.msra.gmra.mxu0 %vm1078_vm3, %v7417_v62  ;;  %8310 = vmatprep.subr.mxu0 %v7448_v63  ;;  %v7505_v62 = vld [vmem:[%s10389_s8 + $0x358] sm:$0xff] }
 0x533   : > { %8311 = vmatpush3.msra.mxu0 %v7448_v63  ;;  %8334 = vmatprep.mubr.msk.f32.mxu0 %vm996_vm2, %v9170_v34  ;;  %v7504_v63 = vld [vmem:[%s10389_s8 + $0x350] sm:$0xff] }
 0x534   : > { %8312 = vmatprep.subr.mxu0 %v7447_v0 }
 0x535   : > { %8313 = vmatpush3.msra.mxu0 %v7447_v0  ;;  %v7503_v0 = vld [vmem:[%s10389_s8 + $0x348] sm:$0xff] }
 0x536   : > { %8314 = vmatprep.subr.mxu0 %v7446_v1 }
 0x537   : > { %8315 = vmatpush3.msra.mxu0 %v7446_v1  ;;  %v7502_v1 = vld [vmem:[%s10389_s8 + $0x340] sm:$0xff] }
 0x538   : > { %8316 = vmatprep.subr.mxu0 %v7445_v2 }
 0x539   : > { %8317 = vmatpush3.msra.mxu0 %v7445_v2  ;;  %v7501_v2 = vld [vmem:[%s10389_s8 + $0x338] sm:$0xff] }
 0x53a   : > { %8318 = vmatprep.subr.mxu0 %v7444_v3 }
 0x53b   : > { %8319 = vmatpush3.msra.mxu0 %v7444_v3  ;;  %v7499_v3 = vld [vmem:[%s10389_s8 + $0x328] sm:$0xff] }
 0x53c   : > { %8320 = vmatprep.subr.mxu0 %v7443_v4 }
 0x53d   : > { %8321 = vmatpush3.msra.mxu0 %v7443_v4  ;;  %v7498_v4 = vld [vmem:[%s10389_s8 + $0x320] sm:$0xff] }
 0x53e   : > { %8322 = vmatprep.subr.mxu0 %v7442_v6 }
 0x53f   : > { %8323 = vmatpush3.msra.mxu0 %v7442_v6  ;;  %v7497_v6 = vld [vmem:[%s10389_s8 + $0x318] sm:$0xff] }
 0x540   : > { %8324 = vmatprep.subr.mxu0 %v7441_v7 }
 0x541   : > { %8325 = vmatpush3.msra.mxu0 %v7441_v7  ;;  %v7496_v7 = vld [vmem:[%s10389_s8 + $0x310] sm:$0xff] }
 0x542   : > { %8326 = vmatprep.subr.mxu0 %v7440_v8 }
 0x543   : > { %8327 = vmatpush3.msra.mxu0 %v7440_v8  ;;  %v7495_v8 = vld [vmem:[%s10389_s8 + $0x308] sm:$0xff] }
 0x544   : > { %8328 = vmatprep.subr.mxu0 %v7439_v9 }
 0x545   : > { %8329 = vmatpush3.msra.mxu0 %v7439_v9  ;;  %v7494_v9 = vld [vmem:[%s10389_s8 + $0x300] sm:$0xff] }
 0x546   : > { %8330 = vmatprep.subr.mxu0 %v7438_v10 }
 0x547   : > { %8331 = vmatpush3.msra.mxu0 %v7438_v10  ;;  %v7492_v10 = vld [vmem:[%s10392_s3 + $0x80] sm:$0xff] }
 0x548   : > { %8332 = vmatprep.subr.mxu0 %v7437_v11 }
 0x549   : > { %8333 = vmatpush3.msra.mxu0 %v7437_v11  ;;  %v2594_v11 = vld [vmem:[%s10391_s6 + $0x8] sm:$0xf] }
 0x54a   : > { %8335 = vmatmul.mubr.msk.f32.vlgmr.msra.gmra.mxu0 %vm996_vm2, %v9172_v35  ;;  %2773 = vperm.xlu1 %8914, %v2594_v11  }
 0x54b   : > { %8375 = vmatprep.mubr.msk.f32.mxu0 %vm1078_vm3, %v7454_v32  ;;  %v7519_v32 = vld [vmem:[%s10394_s1 + $0x20] sm:$0xff] }
 0x5f2   : > { %v8309_v13 = vpop.f32.mrf.mxu0 }
 0x5f3   : > { %v1882_v14 = vadd.f32 %v8309_v13, %v1705_v57 }
 0x5f4   : > { %v1872_v15 = vpop.f32.mrf.mxu0 }
 0x5f5   : > { %v1881_v16 = vadd.f32 %v1872_v15, %v1704_v59 }
 0x60a   : > { %v8336_v17 = vpop.f32.mrf.mxu0 }
 0x60b   : > { %8337 = vmatprep.subr.msk.mxu1 %vm899_vm1, %v8336_v17 }
 0x60c   : > { %v1965_v18 = vpop.f32.mrf.mxu0  ;;  %8338 = vmatpush3.msk.msra.mxu1 %vm899_vm1, %v8336_v17 }
 0x60d   : > { %8339 = vmatprep.subr.mxu1 %v1965_v18 }
 0x60e   : > { %8340 = vmatpush3.msra.mxu1 %v1965_v18  ;;  %v2599_v18 = vld [vmem:[%s10394_s1 + $0x10] sm:$0xff] }
 0x60f   : > { %8342 = vmatmul.mubr.msk.f32.vlgmr.msra.gmra.mxu1 %vm1078_vm3, %v7436_v19  ;;  %8344 = vmatprep.subr.mxu1 %v7467_v20  ;;  %v2598_v19 = vld [vmem:[%s10394_s1 + $0x8] sm:$0xff] }
 0x610   : > { %8345 = vmatpush3.msra.mxu1 %v7467_v20  ;;  %8368 = vmatprep.mubr.msk.f32.mxu1 %vm996_vm2, %v9170_v34  ;;  %v2597_v20 = vld [vmem:[%s10394_s1] sm:$0xff] }
 0x611   : > { %8346 = vmatprep.subr.mxu1 %v7466_v21 }
 0x612   : > { %8347 = vmatpush3.msra.mxu1 %v7466_v21 }
 0x613   : > { %8348 = vmatprep.subr.mxu1 %v7465_v22 }
 0x614   : > { %8349 = vmatpush3.msra.mxu1 %v7465_v22 }
 0x615   : > { %8350 = vmatprep.subr.mxu1 %v7464_v23 }
 0x616   : > { %8351 = vmatpush3.msra.mxu1 %v7464_v23 }
 0x617   : > { %8352 = vmatprep.subr.mxu1 %v7463_v24 }
 0x618   : > { %8353 = vmatpush3.msra.mxu1 %v7463_v24 }
 0x619   : > { %8354 = vmatprep.subr.mxu1 %v7462_v25 }
 0x61a   : > { %8355 = vmatpush3.msra.mxu1 %v7462_v25 }
 0x61b   : > { %8356 = vmatprep.subr.mxu1 %v7461_v26 }
 0x61c   : > { %8357 = vmatpush3.msra.mxu1 %v7461_v26 }
 0x61d   : > { %8358 = vmatprep.subr.mxu1 %v7460_v27 }
 0x61e   : > { %8359 = vmatpush3.msra.mxu1 %v7460_v27  ;;  %v2595_v27 = vld [vmem:[%s10395_s5] sm:$0xff] }
 0x61f   : > { %8360 = vmatprep.subr.mxu1 %v7459_v28 }
 0x620   : > { %8361 = vmatpush3.msra.mxu1 %v7459_v28 }
 0x621   : > { %8362 = vmatprep.subr.mxu1 %v7458_v29 }
 0x622   : > { %8363 = vmatpush3.msra.mxu1 %v7458_v29 }
 0x623   : > { %8364 = vmatprep.subr.mxu1 %v7457_v30 }
 0x624   : > { %8365 = vmatpush3.msra.mxu1 %v7457_v30  ;;  %v2596_v30 = vld [vmem:[%s10395_s5 + $0x8] sm:$0xf] }
 0x625   : > { %8366 = vmatprep.subr.mxu1 %v7456_v31 }
 0x626   : > { %8367 = vmatpush3.msra.mxu1 %v7456_v31  ;;  %v7520_v31 = vld [vmem:[%s10394_s1 + $0x28] sm:$0xff] }
 0x627   : > { %8369 = vmatmul.mubr.msk.f32.vlgmr.msra.gmra.mxu1 %vm996_vm2, %v9172_v35 }
 0x628   : > { %8409 = vmatprep.mubr.msk.f32.mxu1 %vm1078_vm3, %v7473_v54 }
 0x6cf   : > { %v8343_v33 = vpop.f32.mrf.mxu1 }
 0x6d0   : > { %v2059_v36 = vadd.f32 %v8343_v33, %v1882_v14  ;;  %v7518_v33 = vld [vmem:[%s10394_s1 + $0x18] sm:$0xff] }
 0x6d1   : > { %v2049_v37 = vpop.f32.mrf.mxu1 }
 0x6d2   : > { %v2058_v38 = vadd.f32 %v2049_v37, %v1881_v16 }
 0x6e7   : > { %v8370_v39 = vpop.f32.mrf.mxu1 }
 0x6e8   : > { %8371 = vmatprep.subr.msk.mxu0 %vm899_vm1, %v8370_v39 }
 0x6e9   : > { %v2142_v40 = vpop.f32.mrf.mxu1  ;;  %8372 = vmatpush3.msk.msra.mxu0 %vm899_vm1, %v8370_v39 }
 0x6ea   : > { %8373 = vmatprep.subr.mxu0 %v2142_v40 }
 0x6eb   : > { %8374 = vmatpush3.msra.mxu0 %v2142_v40 }
 0x6ec   : > { %8376 = vmatmul.mubr.msk.f32.vlgmr.msra.gmra.mxu0 %vm1078_vm3, %v7455_v41  ;;  %8378 = vmatprep.subr.mxu0 %v7486_v42  ;;  %v7517_v41 = vld [vmem:[%s10395_s5 + $0x18] sm:$0xf] }
 0x6ed   : > { %8379 = vmatpush3.msra.mxu0 %v7486_v42  ;;  %8402 = vmatprep.mubr.msk.f32.mxu0 %vm996_vm2, %v9170_v34  ;;  %v7530_v42 = vld [vmem:[%s10394_s1 + $0x40] sm:$0xff] }
 0x6ee   : > { %8380 = vmatprep.subr.mxu0 %v7485_v43 }
 0x6ef   : > { %8381 = vmatpush3.msra.mxu0 %v7485_v43  ;;  %v7529_v43 = vld [vmem:[%s10394_s1 + $0x38] sm:$0xff] }
 0x6f0   : > { %8382 = vmatprep.subr.mxu0 %v7484_v44 }
 0x6f1   : > { %8383 = vmatpush3.msra.mxu0 %v7484_v44  ;;  %v7528_v44 = vld [vmem:[%s10394_s1 + $0x30] sm:$0xff] }
 0x6f2   : > { %8384 = vmatprep.subr.mxu0 %v7483_v45 }
 0x6f3   : > { %8385 = vmatpush3.msra.mxu0 %v7483_v45  ;;  %v7526_v45 = vld [vmem:[%s10395_s5 + $0x20] sm:$0xff] }
 0x6f4   : > { %8386 = vmatprep.subr.mxu0 %v7482_v46 }
 0x6f5   : > { %8387 = vmatpush3.msra.mxu0 %v7482_v46  ;;  %v2774_v46 = vpop.permute.xlu1 %2773 }
 0x6f6   : > { %8388 = vmatprep.subr.mxu0 %v7481_v47 }
 0x6f7   : > { %8389 = vmatpush3.msra.mxu0 %v7481_v47 }
 0x6f8   : > { %8390 = vmatprep.subr.mxu0 %v7480_v48 }
 0x6f9   : > { %8391 = vmatpush3.msra.mxu0 %v7480_v48  ;;  %v2769_v48 = vpop.permute.xlu0 %2768 }
 0x6fa   : > { %8392 = vmatprep.subr.mxu0 %v7479_v49 }
 0x6fb   : > { %8393 = vmatpush3.msra.mxu0 %v7479_v49 }
 0x6fc   : > { %8394 = vmatprep.subr.mxu0 %v7478_v50 }
 0x6fd   : > { %8395 = vmatpush3.msra.mxu0 %v7478_v50 }
 0x6fe   : > { %8396 = vmatprep.subr.mxu0 %v7477_v51 }
 0x6ff   : > { %8397 = vmatpush3.msra.mxu0 %v7477_v51 }
 0x700   : > { %8398 = vmatprep.subr.mxu0 %v7476_v52 }
 0x701   : > { %8399 = vmatpush3.msra.mxu0 %v7476_v52 }
 0x702   : > { %8400 = vmatprep.subr.mxu0 %v7475_v53 }
 0x703   : > { %8401 = vmatpush3.msra.mxu0 %v7475_v53 }
 0x704   : > { %8403 = vmatmul.mubr.msk.f32.vlgmr.msra.gmra.mxu0 %vm996_vm2, %v9172_v35 }
 0x705   : > { %8443 = vmatprep.mubr.msk.f32.mxu0 %vm1078_vm3, %v7492_v10 }
 0x7ac   : > { %v8377_v55 = vpop.f32.mrf.mxu0 }
 0x7ad   : > { %v2236_v56 = vadd.f32 %v8377_v55, %v2059_v36  ;;  %v7516_v36 = vld [vmem:[%s10395_s5 + $0x10] sm:$0xff] }
 0x7ae   : > { %v2226_v57 = vpop.f32.mrf.mxu0 }
 0x7af   : > { %v2235_v58 = vadd.f32 %v2226_v57, %v2058_v38  ;;  %v7540_v57 = vld [vmem:[%s10394_s1 + $0x58] sm:$0xff] }
 0x7c4   : > { %v8404_v59 = vpop.f32.mrf.mxu0 }
 0x7c5   : > { %8405 = vmatprep.subr.msk.mxu1 %vm899_vm1, %v8404_v59 }
 0x7c6   : > { %v2319_v60 = vpop.f32.mrf.mxu0  ;;  %8406 = vmatpush3.msk.msra.mxu1 %vm899_vm1, %v8404_v59  ;;  %v7538_v59 = vld [vmem:[%s10394_s1 + $0x48] sm:$0xff] }
 0x7c7   : > { %8407 = vmatprep.subr.mxu1 %v2319_v60 }
 0x7c8   : > { %8408 = vmatpush3.msra.mxu1 %v2319_v60  ;;  %v7536_v60 = vld [vmem:[%s10395_s5 + $0x30] sm:$0xff] }
 0x7c9   : > { %8410 = vmatmul.mubr.msk.f32.vlgmr.msra.gmra.mxu1 %vm1078_vm3, %v7474_v61  ;;  %8412 = vmatprep.subr.mxu1 %v7505_v62 }
 0x7ca   : > { %8413 = vmatpush3.msra.mxu1 %v7505_v62  ;;  %8436 = vmatprep.mubr.msk.f32.mxu1 %vm996_vm2, %v9170_v34  ;;  %v7500_v34 = vld [vmem:[%s10389_s8 + $0x330] sm:$0xff] }
 0x7cb   : > { %8414 = vmatprep.subr.mxu1 %v7504_v63 }
 0x7cc   : > { %8415 = vmatpush3.msra.mxu1 %v7504_v63 }
 0x7cd   : > { %8416 = vmatprep.subr.mxu1 %v7503_v0 }
 0x7ce   : > { %8417 = vmatpush3.msra.mxu1 %v7503_v0 }
 0x7cf   : > { %8418 = vmatprep.subr.mxu1 %v7502_v1 }
 0x7d0   : > { %8419 = vmatpush3.msra.mxu1 %v7502_v1 }
 0x7d1   : > { %8420 = vmatprep.subr.mxu1 %v7501_v2 }
 0x7d2   : > { %8421 = vmatpush3.msra.mxu1 %v7501_v2 }
 0x7d3   : > { %8422 = vmatprep.subr.mxu1 %v7500_v34 }
 0x7d4   : > { %8423 = vmatpush3.msra.mxu1 %v7500_v34  ;;  %v7537_v34 = vld [vmem:[%s10395_s5 + $0x38] sm:$0xf] }
 0x7d5   : > { %8424 = vmatprep.subr.mxu1 %v7499_v3 }
 0x7d6   : > { %8425 = vmatpush3.msra.mxu1 %v7499_v3  ;;  %v7550_v3 = vld [vmem:[%s10394_s1 + $0x70] sm:$0xff] }
 0x7d7   : > { %8426 = vmatprep.subr.mxu1 %v7498_v4 }
 0x7d8   : > { %8427 = vmatpush3.msra.mxu1 %v7498_v4  ;;  %v7549_v4 = vld [vmem:[%s10394_s1 + $0x68] sm:$0xff] }
 0x7d9   : > { %8428 = vmatprep.subr.mxu1 %v7497_v6 }
 0x7da   : > { %8429 = vmatpush3.msra.mxu1 %v7497_v6  ;;  %v7548_v6 = vld [vmem:[%s10394_s1 + $0x60] sm:$0xff] }
 0x7db   : > { %8430 = vmatprep.subr.mxu1 %v7496_v7 }
 0x7dc   : > { %8431 = vmatpush3.msra.mxu1 %v7496_v7  ;;  %v7546_v7 = vld [vmem:[%s10395_s5 + $0x40] sm:$0xff] }
 0x7dd   : > { %8432 = vmatprep.subr.mxu1 %v7495_v8 }
 0x7de   : > { %8433 = vmatpush3.msra.mxu1 %v7495_v8 }
 0x7df   : > { %8434 = vmatprep.subr.mxu1 %v7494_v9 }
 0x7e0   : > { %8435 = vmatpush3.msra.mxu1 %v7494_v9 }
 0x7e1   : > { %8437 = vmatmul.mubr.msk.f32.vlgmr.msra.gmra.mxu1 %vm996_vm2, %v9172_v35  ;;  %v7493_v35 = vld [vmem:[%s10392_s3 + $0x88] sm:$0xf] }
 0x7e2   : > { %8475 = vmatprep.mubr.msk.f32.mxu1 %vm1078_vm3, %v7516_v36 }
 0x889   : > { %v8411_v12 = vpop.f32.mrf.mxu1 }
 0x88a   : > { %v2413_v13 = vadd.f32 %v8411_v12, %v2236_v56  ;;  %v7527_v56 = vld [vmem:[%s10395_s5 + $0x28] sm:$0xf] }
 0x88b   : > { %v2403_v14 = vpop.f32.mrf.mxu1 }
 0x88c   : > { %v2412_v15 = vadd.f32 %v2403_v14, %v2235_v58  ;;  %v7539_v58 = vld [vmem:[%s10394_s1 + $0x50] sm:$0xff]  ;;  %v7547_v14 = vld [vmem:[%s10395_s5 + $0x48] sm:$0xf] }
 0x8a1   : > { %v8438_v16 = vpop.f32.mrf.mxu1 }
 0x8a2   : > { %8439 = vmatprep.subr.msk.mxu0 %vm899_vm1, %v8438_v16 }
 0x8a3   : > { %v2496_v17 = vpop.f32.mrf.mxu1  ;;  %8440 = vmatpush3.msk.msra.mxu0 %vm899_vm1, %v8438_v16  ;;  %v7559_v16 = vld [vmem:[%s10394_s1 + $0x80] sm:$0xff] }
 0x8a4   : > { %8441 = vmatprep.subr.mxu0 %v2496_v17 }
 0x8a5   : > { %8442 = vmatpush3.msra.mxu0 %v2496_v17  ;;  %v7558_v17 = vld [vmem:[%s10394_s1 + $0x78] sm:$0xff] }
 0x8a6   : > { %8444 = vmatmul.mubr.msk.f32.vlgmr.msra.gmra.mxu0 %vm1078_vm3, %v7493_v35  ;;  %8446 = vmatprep.subr.mxu0 %v2599_v18  ;;  %v7556_v35 = vld [vmem:[%s10395_s5 + $0x50] sm:$0xff] }
 0x8a7   : > { %8447 = vmatpush3.msra.mxu0 %v2599_v18 }
 0x8a8   : > { %8448 = vmatprep.subr.mxu0 %v2598_v19 }
 0x8a9   : > { %8449 = vmatpush3.msra.mxu0 %v2598_v19 }
 0x8aa   : > { %8450 = vmatprep.subr.mxu0 %v2597_v20 }
 0x8ab   : > { %8451 = vmatpush3.msra.mxu0 %v2597_v20 }
 0x966   : > { %v8445_v21 = vpop.f32.mrf.mxu0 }
 0x967   : > { %v2590_v22 = vadd.f32 %v8445_v21, %v2413_v13 }
 0x968   : > { %v2580_v23 = vpop.f32.mrf.mxu0 }
 0x969   : > { %v2589_v24 = vadd.f32 %v2580_v23, %v2412_v15  ;;  %v9608_v26 = vmax.f32 %v2590_v22, 0.0  ;;  %v7560_v15 = vld [vmem:[%s10394_s1 + $0x88] sm:$0xff] }
 0x96b   : > { %v9606_v25 = vmax.f32 %v2589_v24, 0.0  ;;  %v7557_v24 = vld [vmem:[%s10395_s5 + $0x58] sm:$0xf] }
 0x96d   : > { %8452 = vmatprep.mubr.msk.f32.mxu0 %vm2600_vm4, %v9606_v25 }
 0x96e   : > { %8453 = vmatmul.mubr.msk.f32.vlgmr.msra.gmra.mxu0 %vm2600_vm4, %v9608_v26 }
 0x96f   : > { %8459 = vmatprep.mubr.msk.f32.mxu0 %vm1078_vm3, %v2595_v27  ;;  %v7570_v27 = vld [vmem:[%s10394_s1 + $0xa0] sm:$0xff] }
 0xa2e   : > { %v8454_v28 = vpop.f32.mrf.mxu0 }
 0xa2f   : > { %8455 = vmatprep.subr.msk.mxu0 %vm899_vm1, %v8454_v28 }
 0xa30   : > { %v2673_v29 = vpop.f32.mrf.mxu0  ;;  %8456 = vmatpush3.msk.msra.mxu0 %vm899_vm1, %v8454_v28  ;;  %v7569_v28 = vld [vmem:[%s10394_s1 + $0x98] sm:$0xff] }
 0xa31   : > { %8457 = vmatprep.subr.mxu0 %v2673_v29 }
 0xa32   : > { %8458 = vmatpush3.msra.mxu0 %v2673_v29  ;;  %v7568_v29 = vld [vmem:[%s10394_s1 + $0x90] sm:$0xff] }
 0xa33   : > { %8460 = vmatmul.mubr.msk.f32.vlgmr.msra.gmra.mxu0 %vm1078_vm3, %v2596_v30  ;;  %8462 = vmatprep.subr.mxu0 %v7520_v31  ;;  %v7566_v30 = vld [vmem:[%s10395_s5 + $0x60] sm:$0xff] }
 0xa34   : > { %8463 = vmatpush3.msra.mxu0 %v7520_v31  ;;  %8468 = vmatprep.mubr.msk.f32.mxu0 %vm2600_vm4, %v9606_v25 }
 0xa35   : > { %8464 = vmatprep.subr.mxu0 %v7519_v32 }
 0xa36   : > { %8465 = vmatpush3.msra.mxu0 %v7519_v32 }
 0xa37   : > { %8466 = vmatprep.subr.mxu0 %v7518_v33 }
 0xa38   : > { %8467 = vmatpush3.msra.mxu0 %v7518_v33 }
 0xa39   : > { %8469 = vmatmul.mubr.msk.f32.vlgmr.msra.gmra.mxu0 %vm2600_vm4, %v9608_v26 }
 0xa3a   : > { %8491 = vmatprep.mubr.msk.f32.mxu0 %vm1078_vm3, %v7526_v45 }
 0xaf3   : > { %v8461_v37 = vpop.f32.mrf.mxu0 }
 0xaf4   : > { %v2777_v47 = vadd.f32 %v8461_v37, %v2774_v46 }
 0xaf5   : > { %v2757_v38 = vpop.f32.mrf.mxu0 }
 0xaf6   : > { %v2776_v50 = vadd.f32 %v2769_v48, %v2757_v38 }
 0xaf9   : > { %v8470_v39 = vpop.f32.mrf.mxu0 }
 0xafa   : > { %8471 = vmatprep.subr.msk.mxu1 %vm899_vm1, %v8470_v39 }
 0xafb   : > { %v2851_v40 = vpop.f32.mrf.mxu0  ;;  %8472 = vmatpush3.msk.msra.mxu1 %vm899_vm1, %v8470_v39  ;;  %v7567_v39 = vld [vmem:[%s10395_s5 + $0x68] sm:$0xf] }
 0xafc   : > { %8473 = vmatprep.subr.mxu1 %v2851_v40 }
 0xafd   : > { %8474 = vmatpush3.msra.mxu1 %v2851_v40  ;;  %v7580_v40 = vld [vmem:[%s10394_s1 + $0xb8] sm:$0xff] }
 0xafe   : > { %8476 = vmatmul.mubr.msk.f32.vlgmr.msra.gmra.mxu1 %vm1078_vm3, %v7517_v41  ;;  %8478 = vmatprep.subr.mxu1 %v7530_v42  ;;  %v7579_v41 = vld [vmem:[%s10394_s1 + $0xb0] sm:$0xff] }
 0xaff   : > { %8479 = vmatpush3.msra.mxu1 %v7530_v42  ;;  %8484 = vmatprep.mubr.msk.f32.mxu1 %vm2600_vm4, %v9606_v25  ;;  %v7578_v42 = vld [vmem:[%s10394_s1 + $0xa8] sm:$0xff] }
 0xb00   : > { %8480 = vmatprep.subr.mxu1 %v7529_v43 }
 0xb01   : > { %8481 = vmatpush3.msra.mxu1 %v7529_v43  ;;  %v7576_v43 = vld [vmem:[%s10395_s5 + $0x70] sm:$0xff] }
 0xb02   : > { %8482 = vmatprep.subr.mxu1 %v7528_v44 }
 0xb03   : > { %8483 = vmatpush3.msra.mxu1 %v7528_v44 }
 0xb04   : > { %8485 = vmatmul.mubr.msk.f32.vlgmr.msra.gmra.mxu1 %vm2600_vm4, %v9608_v26 }
 0xb05   : > { %8507 = vmatprep.mubr.msk.f32.mxu1 %vm1078_vm3, %v7536_v60  ;;  %v4126_v60 = vld [vmem:[%s10396_s9 + $0x10] sm:$0xff] }
 0xbbe   : > { %v8477_v49 = vpop.f32.mrf.mxu1 }
 0xbbf   : > { %v2945_v51 = vadd.f32 %v8477_v49, %v2777_v47 }
 0xbc0   : > { %v2935_v52 = vpop.f32.mrf.mxu1 }
 0xbc1   : > { %v2944_v53 = vadd.f32 %v2935_v52, %v2776_v50  ;;  %v7577_v50 = vld [vmem:[%s10395_s5 + $0x78] sm:$0xf]  ;;  %v7589_v52 = vld [vmem:[%s10394_s1 + $0xc8] sm:$0xff] }
 0xbc4   : > { %v8486_v54 = vpop.f32.mrf.mxu1 }
 0xbc5   : > { %8487 = vmatprep.subr.msk.mxu0 %vm899_vm1, %v8486_v54 }
 0xbc6   : > { %v3019_v55 = vpop.f32.mrf.mxu1  ;;  %8488 = vmatpush3.msk.msra.mxu0 %vm899_vm1, %v8486_v54  ;;  %v7586_v54 = vld [vmem:[%s10395_s5 + $0x80] sm:$0xff] }
 0xbc7   : > { %8489 = vmatprep.subr.mxu0 %v3019_v55 }
 0xbc8   : > { %8490 = vmatpush3.msra.mxu0 %v3019_v55 }
 0xbc9   : > { %8492 = vmatmul.mubr.msk.f32.vlgmr.msra.gmra.mxu0 %vm1078_vm3, %v7527_v56  ;;  %8494 = vmatprep.subr.mxu0 %v7540_v57 }
 0xbca   : > { %8495 = vmatpush3.msra.mxu0 %v7540_v57  ;;  %8500 = vmatprep.mubr.msk.f32.mxu0 %vm2600_vm4, %v9606_v25 }
 0xbcb   : > { %8496 = vmatprep.subr.mxu0 %v7539_v58 }
 0xbcc   : > { %8497 = vmatpush3.msra.mxu0 %v7539_v58 }
 0xbcd   : > { %8498 = vmatprep.subr.mxu0 %v7538_v59 }
 0xbce   : > { %8499 = vmatpush3.msra.mxu0 %v7538_v59 }
 0xbcf   : > { %8501 = vmatmul.mubr.msk.f32.vlgmr.msra.gmra.mxu0 %vm2600_vm4, %v9608_v26 }
 0xbd0   : > { %8523 = vmatprep.mubr.msk.f32.mxu0 %vm1078_vm3, %v7546_v7 }
 0xc89   : > { %v8493_v61 = vpop.f32.mrf.mxu0 }
 0xc8a   : > { %v3113_v62 = vadd.f32 %v8493_v61, %v2945_v51  ;;  %v7590_v51 = vld [vmem:[%s10394_s1 + $0xd0] sm:$0xff]  ;;  %v7600_v61 = vld [vmem:[%s10396_s9 + $0x28] sm:$0xff] }
 0xc8b   : > { %v3103_v63 = vpop.f32.mrf.mxu0 }
 0xc8c   : > { %v3112_v0 = vadd.f32 %v3103_v63, %v2944_v53  ;;  %v7588_v53 = vld [vmem:[%s10394_s1 + $0xc0] sm:$0xff]  ;;  %s10398_s1 = sld [smem:[#allocation17_spill]] }
 0xc8d   : > { %v7599_v63 = vld [vmem:[%s10396_s9 + $0x20] sm:$0xff] }
 0xc8f   : > { %v8502_v1 = vpop.f32.mrf.mxu0 }
 0xc90   : > { %8503 = vmatprep.subr.msk.mxu1 %vm899_vm1, %v8502_v1 }
 0xc91   : > { %v3187_v2 = vpop.f32.mrf.mxu0  ;;  %8504 = vmatpush3.msk.msra.mxu1 %vm899_vm1, %v8502_v1  ;;  %v7598_v1 = vld [vmem:[%s10396_s9 + $0x18] sm:$0xff] }
 0xc92   : > { %8505 = vmatprep.subr.mxu1 %v3187_v2 }
 0xc93   : > { %8506 = vmatpush3.msra.mxu1 %v3187_v2  ;;  %v7605_v2 = vld [vmem:[%s10396_s9 + $0x40] sm:$0xff] }
 0xc94   : > { %8508 = vmatmul.mubr.msk.f32.vlgmr.msra.gmra.mxu1 %vm1078_vm3, %v7537_v34  ;;  %8510 = vmatprep.subr.mxu1 %v7550_v3  ;;  %v7610_v34 = vld [vmem:[%s10396_s9 + $0x58] sm:$0xff] }
 0xc95   : > { %8511 = vmatpush3.msra.mxu1 %v7550_v3  ;;  %8516 = vmatprep.mubr.msk.f32.mxu1 %vm2600_vm4, %v9606_v25 }
 0xc96   : > { %8512 = vmatprep.subr.mxu1 %v7549_v4 }
 0xc97   : > { %8513 = vmatpush3.msra.mxu1 %v7549_v4 }
 0xc98   : > { %8514 = vmatprep.subr.mxu1 %v7548_v6 }
 0xc99   : > { %8515 = vmatpush3.msra.mxu1 %v7548_v6 }
 0xc9a   : > { %8517 = vmatmul.mubr.msk.f32.vlgmr.msra.gmra.mxu1 %vm2600_vm4, %v9608_v26 }
 0xc9b   : > { %8539 = vmatprep.mubr.msk.f32.mxu1 %vm1078_vm3, %v7556_v35 }
 0xd54   : > { %v8509_v8 = vpop.f32.mrf.mxu1 }
 0xd55   : > { %v3281_v9 = vadd.f32 %v8509_v8, %v3113_v62  ;;  %v4125_v62 = vld [vmem:[%s10396_s9 + $0x8] sm:$0xff] }
 0xd56   : > { %v3271_v10 = vpop.f32.mrf.mxu1 }
 0xd57   : > { %v3280_v11 = vadd.f32 %v3271_v10, %v3112_v0  ;;  %v4124_v0 = vld [vmem:[%s10396_s9] sm:$0xff]  ;;  %v7604_v10 = vld [vmem:[%s10396_s9 + $0x38] sm:$0xff] }
 0xd5a   : > { %v8518_v12 = vpop.f32.mrf.mxu1 }
 0xd5b   : > { %8519 = vmatprep.subr.msk.mxu0 %vm899_vm1, %v8518_v12 }
 0xd5c   : > { %v3355_v13 = vpop.f32.mrf.mxu1  ;;  %8520 = vmatpush3.msk.msra.mxu0 %vm899_vm1, %v8518_v12  ;;  %v7603_v12 = vld [vmem:[%s10396_s9 + $0x30] sm:$0xff] }
 0xd5d   : > { %8521 = vmatprep.subr.mxu0 %v3355_v13 }
 0xd5e   : > { %8522 = vmatpush3.msra.mxu0 %v3355_v13  ;;  %v7608_v13 = vld [vmem:[%s10396_s9 + $0x48] sm:$0xff] }
 0xd5f   : > { %8524 = vmatmul.mubr.msk.f32.vlgmr.msra.gmra.mxu0 %vm1078_vm3, %v7547_v14  ;;  %8526 = vmatprep.subr.mxu0 %v7560_v15  ;;  %v8940_v14 = vmov 0.0  }
 0xd60   : > { %8527 = vmatpush3.msra.mxu0 %v7560_v15  ;;  %8532 = vmatprep.mubr.msk.f32.mxu0 %vm2600_vm4, %v9606_v25 }
 0xd61   : > { %8528 = vmatprep.subr.mxu0 %v7559_v16 }
 0xd62   : > { %8529 = vmatpush3.msra.mxu0 %v7559_v16 }
 0xd63   : > { %8530 = vmatprep.subr.mxu0 %v7558_v17 }
 0xd64   : > { %8531 = vmatpush3.msra.mxu0 %v7558_v17 }
 0xd65   : > { %8533 = vmatmul.mubr.msk.f32.vlgmr.msra.gmra.mxu0 %vm2600_vm4, %v9608_v26 }
 0xd66   : > { %8555 = vmatprep.mubr.msk.f32.mxu0 %vm1078_vm3, %v7566_v30  ;;  %v4451_v30 = vld [vmem:[%s10397_s30] sm:$0x1] }
 0xe1f   : > { %v8525_v18 = vpop.f32.mrf.mxu0 }
 0xe20   : > { %v3449_v19 = vadd.f32 %v8525_v18, %v3281_v9 }
 0xe21   : > { %v3439_v20 = vpop.f32.mrf.mxu0 }
 0xe22   : > { %v3448_v21 = vadd.f32 %v3439_v20, %v3280_v11  ;;  %v7609_v11 = vld [vmem:[%s10396_s9 + $0x50] sm:$0xff] }
 0xe25   : > { %v8534_v22 = vpop.f32.mrf.mxu0 }
 0xe26   : > { %8535 = vmatprep.subr.msk.mxu1 %vm899_vm1, %v8534_v22 }
 0xe27   : > { %v3523_v23 = vpop.f32.mrf.mxu0  ;;  %8536 = vmatpush3.msk.msra.mxu1 %vm899_vm1, %v8534_v22 }
 0xe28   : > { %8537 = vmatprep.subr.mxu1 %v3523_v23 }
 0xe29   : > { %8538 = vmatpush3.msra.mxu1 %v3523_v23 }
 0xe2a   : > { %8540 = vmatmul.mubr.msk.f32.vlgmr.msra.gmra.mxu1 %vm1078_vm3, %v7557_v24  ;;  %8542 = vmatprep.subr.mxu1 %v7570_v27 }
 0xe2b   : > { %8543 = vmatpush3.msra.mxu1 %v7570_v27  ;;  %8548 = vmatprep.mubr.msk.f32.mxu1 %vm2600_vm4, %v9606_v25 }
 0xe2c   : > { %8544 = vmatprep.subr.mxu1 %v7569_v28 }
 0xe2d   : > { %8545 = vmatpush3.msra.mxu1 %v7569_v28 }
 0xe2e   : > { %8546 = vmatprep.subr.mxu1 %v7568_v29 }
 0xe2f   : > { %8547 = vmatpush3.msra.mxu1 %v7568_v29 }
 0xe30   : > { %8549 = vmatmul.mubr.msk.f32.vlgmr.msra.gmra.mxu1 %vm2600_vm4, %v9608_v26 }
 0xe31   : > { %8571 = vmatprep.mubr.msk.f32.mxu1 %vm1078_vm3, %v7576_v43 }
 0xeea   : > { %v8541_v31 = vpop.f32.mrf.mxu1 }
 0xeeb   : > { %v3617_v32 = vadd.f32 %v8541_v31, %v3449_v19  ;;  %v4538_v31 = vld [vmem:[%s10398_s1] sm:$0x1] }
 0xeec   : > { %v3607_v33 = vpop.f32.mrf.mxu1 }
 0xeed   : > { %v3616_v36 = vadd.f32 %v3607_v33, %v3448_v21  ;;  %v4456_v33 = vpop.permute.xlu0 %4455 }
 0xef0   : > { %v8550_v37 = vpop.f32.mrf.mxu1 }
 0xef1   : > { %8551 = vmatprep.subr.msk.mxu0 %vm899_vm1, %v8550_v37 }
 0xef2   : > { %v3691_v38 = vpop.f32.mrf.mxu1  ;;  %8552 = vmatpush3.msk.msra.mxu0 %vm899_vm1, %v8550_v37 }
 0xef3   : > { %8553 = vmatprep.subr.mxu0 %v3691_v38 }
 0xef4   : > { %8554 = vmatpush3.msra.mxu0 %v3691_v38 }
 0xef5   : > { %8556 = vmatmul.mubr.msk.f32.vlgmr.msra.gmra.mxu0 %vm1078_vm3, %v7567_v39  ;;  %8558 = vmatprep.subr.mxu0 %v7580_v40  ;;  %v4543_v39 = vpop.permute.xlu0 %4542 }
 0xef6   : > { %8559 = vmatpush3.msra.mxu0 %v7580_v40  ;;  %8564 = vmatprep.mubr.msk.f32.mxu0 %vm2600_vm4, %v9606_v25 }
 0xef7   : > { %8560 = vmatprep.subr.mxu0 %v7579_v41 }
 0xef8   : > { %8561 = vmatpush3.msra.mxu0 %v7579_v41 }
 0xef9   : > { %8562 = vmatprep.subr.mxu0 %v7578_v42 }
 0xefa   : > { %8563 = vmatpush3.msra.mxu0 %v7578_v42 }
 0xefb   : > { %8565 = vmatmul.mubr.msk.f32.vlgmr.msra.gmra.mxu0 %vm2600_vm4, %v9608_v26 }
 0xefc   : > { %8587 = vmatprep.mubr.msk.f32.mxu0 %vm1078_vm3, %v7586_v54 }
 0xfb5   : > { %v8557_v44 = vpop.f32.mrf.mxu0 }
 0xfb6   : > { %v3785_v45 = vadd.f32 %v8557_v44, %v3617_v32  ;;  %v4458_v32 = vlaneseq }
 0xfb7   : > { %v3775_v46 = vpop.f32.mrf.mxu0 }
 0xfb8   : > { %v3784_v47 = vadd.f32 %v3775_v46, %v3616_v36  ;;  %v9887_v36 = vshrl.u32 %v4458_v32, 7  ;;  %v4720_v38 = vand.u32 127, %v4458_v32 }
 0xfba   : > { %v4460_v37 = vsub.s32 0, %v9887_v36  ;;  %vm4721_vm6 = vcmp.eq.s32.totalorder %v9887_v36, %v4720_v38  ;;  %v7685_v38 = vld [vmem:[%s10351_s20 + $0x20] sm:$0xf]  ;;  %vm7214_vm14 = vcmp.lt.s32.totalorder %v9887_v36, 6 }
 0xfbb   : > { %v8566_v48 = vpop.f32.mrf.mxu0 }
 0xfbc   : > { %8567 = vmatprep.subr.msk.mxu1 %vm899_vm1, %v8566_v48  ;;  %v4461_v40 = vrot.slane %v4456_v33, %v4460_v37  ;;  %v4548_v41 = vrot.slane %v4543_v39, %v4460_v37  ;;  %v9992_v33 = vld [vmem:[%s10352_s21] ss:$0 sm:$0xff] }
 0xfbd   : > { %v3859_v49 = vpop.f32.mrf.mxu0  ;;  %8568 = vmatpush3.msk.msra.mxu1 %vm899_vm1, %v8566_v48  ;;  %v10005_v39 = vld [vmem:[%s10353_s22] ss:$0 sm:$0xff] }
 0xfbe   : > { %8569 = vmatprep.subr.mxu1 %v3859_v49 }
 0xfbf   : > { %8570 = vmatpush3.msra.mxu1 %v3859_v49 }
 0xfc0   : > { %8572 = vmatmul.mubr.msk.f32.vlgmr.msra.gmra.mxu1 %vm1078_vm3, %v7577_v50  ;;  %8574 = vmatprep.subr.mxu1 %v7590_v51 }
 0xfc1   : > { %8575 = vmatpush3.msra.mxu1 %v7590_v51  ;;  %8580 = vmatprep.mubr.msk.f32.mxu1 %vm2600_vm4, %v9606_v25 }
 0xfc2   : > { %8576 = vmatprep.subr.mxu1 %v7589_v52 }
 0xfc3   : > { %8577 = vmatpush3.msra.mxu1 %v7589_v52  ;;  %v4622_v52 = vld [vmem:[%s10346_s14] sm:$0xff] }
 0xfc4   : > { %8578 = vmatprep.subr.mxu1 %v7588_v53 }
 0xfc5   : > { %8579 = vmatpush3.msra.mxu1 %v7588_v53  ;;  %v4623_v53 = vld [vmem:[%s10346_s14 + $0x8] sm:$0xf] }
 0xfc6   : > { %8581 = vmatmul.mubr.msk.f32.vlgmr.msra.gmra.mxu1 %vm2600_vm4, %v9608_v26  ;;  %v7587_v26 = vld [vmem:[%s10395_s5 + $0x88] sm:$0xf]  ;;  %8599 = vmatprep.subr.mxu1 %v7600_v61 }
 0xfc7   : > { %8600 = vmatpush3.msra.mxu1 %v7600_v61 }
 0xfc8   : > { %8601 = vmatprep.subr.mxu1 %v7599_v63 }
 0xfc9   : > { %8602 = vmatpush3.msra.mxu1 %v7599_v63 }
 0xfca   : > { %8603 = vmatprep.subr.mxu1 %v7598_v1 }
 0xfcb   : > { %8604 = vmatpush3.msra.mxu1 %v7598_v1 }
 0xfcc   : > { %8617 = vmatprep.subr.mxu1 %v7610_v34 }
0x1080   : > { %v8573_v55 = vpop.f32.mrf.mxu1 }
0x1081   : > { %v3953_v56 = vadd.f32 %v8573_v55, %v3785_v45 }
0x1082   : > { %v3943_v25 = vpop.f32.mrf.mxu1 }
0x1083   : > { %v3952_v57 = vadd.f32 %v3943_v25, %v3784_v47  ;;  %v7620_v47 = vsel %vm4721_vm6, 1.0, %v8940_v14 }
0x1086   : > { %v8582_v58 = vpop.f32.mrf.mxu1 }
0x1087   : > { %8583 = vmatprep.subr.msk.mxu0 %vm899_vm1, %v8582_v58 }
0x1088   : > { %v4027_v59 = vpop.f32.mrf.mxu1  ;;  %8584 = vmatpush3.msk.msra.mxu0 %vm899_vm1, %v8582_v58  ;;  %v8942_v58 = vmov 1  }
0x1089   : > { %8585 = vmatprep.subr.mxu0 %v4027_v59 }
0x108a   : > { %8586 = vmatpush3.msra.mxu0 %v4027_v59  ;;  %v8943_v59 = vmov 3  }
0x108b   : > { %8588 = vmatmul.mubr.msk.f32.vlgmr.msra.gmra.mxu0 %vm1078_vm3, %v7587_v26  ;;  %8590 = vmatprep.subr.mxu0 %v4126_v60 }
0x108c   : > { %8591 = vmatpush3.msra.mxu0 %v4126_v60 }
0x108d   : > { %8592 = vmatprep.subr.mxu0 %v4125_v62 }
0x108e   : > { %8593 = vmatpush3.msra.mxu0 %v4125_v62 }
0x108f   : > { %8594 = vmatprep.subr.mxu0 %v4124_v0 }
0x1090   : > { %8595 = vmatpush3.msra.mxu0 %v4124_v0 }
0x1091   : > { %8608 = vmatprep.subr.mxu0 %v7605_v2 }
0x114b   : > { %v8589_v3 = vpop.f32.mrf.mxu0 }
0x114c   : > { %v4121_v4 = vadd.f32 %v8589_v3, %v3953_v56  ;;  %v4625_v3 = vld [vmem:[%s10347_s15 + $0x8] sm:$0xf] }
0x114d   : > { %v4111_v6 = vpop.f32.mrf.mxu0 }
0x114e   : > { %v4120_v7 = vadd.f32 %v4111_v6, %v3952_v57  ;;  %v4123_v9 = vmax.f32 %v4121_v4, 0.0  ;;  %v4624_v57 = vld [vmem:[%s10347_s15] sm:$0xff]  ;;  %v8944_v6 = vmov 2  }
0x114f   : > { %v7626_v4 = vld [vmem:[#allocation4] ss:$0 sm:$0xff] }
0x1150   : > { %v4122_v8 = vmax.f32 %v4120_v7, 0.0 }
0x1152   : > { %8596 = vmatprep.mubr.msk.f32.mxu0 %vm2600_vm4, %v4122_v8  ;;  %8605 = vmatprep.mubr.msk.f32.mxu1 %vm2600_vm4, %v4122_v8 }
0x1153   : > { %8597 = vmatmul.mubr.msk.f32.vlgmr.msra.gmra.mxu0 %vm2600_vm4, %v4123_v9  ;;  %8606 = vmatmul.mubr.msk.f32.vlgmr.msra.gmra.mxu1 %vm2600_vm4, %v4123_v9 }
0x1154   : > { %8609 = vmatpush3.msra.mxu0 %v7605_v2  ;;  %8618 = vmatpush3.msra.mxu1 %v7610_v34 }
0x1155   : > { %8610 = vmatprep.subr.mxu0 %v7604_v10  ;;  %8614 = vmatprep.mubr.msk.f32.mxu0 %vm2600_vm4, %v4122_v8 }
0x1156   : > { %8619 = vmatprep.subr.mxu1 %v7609_v11  ;;  %8623 = vmatprep.mubr.msk.f32.mxu1 %vm2600_vm4, %v4122_v8 }
0x1157   : > { %8611 = vmatpush3.msra.mxu0 %v7604_v10  ;;  %8620 = vmatpush3.msra.mxu1 %v7609_v11 }
0x1158   : > { %8612 = vmatprep.subr.mxu0 %v7603_v12  ;;  %8621 = vmatprep.subr.mxu1 %v7608_v13 }
0x1159   : > { %8613 = vmatpush3.msra.mxu0 %v7603_v12  ;;  %8622 = vmatpush3.msra.mxu1 %v7608_v13  ;;  %v4921_v12 = vld [vmem:[%s10348_s17] sm:$0xf] }
0x115a   : > { %8615 = vmatmul.mubr.msk.f32.vlgmr.msra.gmra.mxu0 %vm2600_vm4, %v4123_v9  ;;  %8624 = vmatmul.mubr.msk.f32.vlgmr.msra.gmra.mxu1 %vm2600_vm4, %v4123_v9 }
0x115b   : > { %8626 = vmatprep.subr.mxu0 %v8940_v14  ;;  %8633 = vmatprep.subr.mxu1 %v8940_v14 }
0x115c   : > { %8630 = vmatprep.mubr.msk.f32.mxu0 %vm8941_vm5, %v8940_v14  ;;  %8637 = vmatprep.mubr.msk.f32.mxu1 %vm8941_vm5, %v8940_v14 }
0x1213   : > { %v8598_v15 = vpop.f32.mrf.mxu0  ;;  %v8607_v16 = vpop.f32.mrf.mxu1 }
0x1214   : > { %v4446_v20 = vmax.f32 %v8598_v15, %v8607_v16 }
0x1215   : > { %v4199_v17 = vpop.f32.mrf.mxu0  ;;  %v4278_v35 = vpop.f32.mrf.mxu1 }
0x1216   : > { %v4445_v24 = vmax.f32 %v4199_v17, %v4278_v35 }
0x121a   : > { %v8616_v18 = vpop.f32.mrf.mxu0  ;;  %v8625_v19 = vpop.f32.mrf.mxu1 }
0x121b   : > { %v4448_v21 = vmax.f32 %v8616_v18, %v8625_v19  ;;  %v5008_v19 = vld [vmem:[%s10351_s20] sm:$0xf] }
0x121c   : > { %v4357_v22 = vpop.f32.mrf.mxu0  ;;  %v4436_v23 = vpop.f32.mrf.mxu1 }
0x121d   : > { %v9858_v27 = vmax.f32 %v4446_v20, %v4448_v21  ;;  %v4447_v28 = vmax.f32 %v4357_v22, %v4436_v23  ;;  %v7636_v20 = vld [vmem:[%s10351_s20 + $0x4] sm:$0xf]  ;;  %v7643_v23 = vld [vmem:[%s10351_s20 + $0x8] sm:$0xf] }
0x121f   : > { %v9860_v29 = vmax.f32 %v4445_v24, %v4447_v28  ;;  %8627 = vmatpush3.msk.msra.mxu0 %vm899_vm1, %v9858_v27  ;;  %8634 = vmatpush3.msk.msra.mxu1 %vm899_vm1, %v9858_v27  ;;  %v7650_v24 = vld [vmem:[%s10351_s20 + $0xc] sm:$0xf]  ;;  %v7664_v28 = vld [vmem:[%s10351_s20 + $0x14] sm:$0xf] }
0x1220   : > { %8628 = vmatprep.subr.mxu0 %v8940_v14  ;;  %8635 = vmatprep.subr.mxu1 %v8940_v14 }
0x1221   : > { %8629 = vmatpush3.msra.mxu0 %v9860_v29  ;;  %8636 = vmatpush3.msra.mxu1 %v9860_v29 }
0x1222   : > { %8631 = vmatmul.mubr.msk.f32.vlgmr.msra.gmra.mxu0 %vm1078_vm3, %v4451_v30  ;;  %8638 = vmatmul.mubr.msk.f32.vlgmr.msra.gmra.mxu1 %vm1078_vm3, %v4538_v31  ;;  %v7671_v30 = vld [vmem:[%s10351_s20 + $0x18] sm:$0xf]  ;;  %v7678_v31 = vld [vmem:[%s10351_s20 + $0x1c] sm:$0xf] }
0x1223   : > { %8640 = vmatprep.subr.msk.mxu0 %vm899_vm1, %v9858_v27  ;;  %8647 = vmatprep.subr.mxu1 %v8940_v14 }
0x1224   : > { %8641 = vmatpush3.msk.msra.mxu0 %vm899_vm1, %v9858_v27  ;;  %8649 = vmatprep.mubr.msk.f32.mxu1 %vm8941_vm5, %v8940_v14 }
0x1225   : > { %8642 = vmatprep.subr.mxu0 %v9860_v29  ;;  %8644 = vmatprep.mubr.msk.f32.mxu0 %vm1078_vm3, %v4622_v52  ;;  %v10073_v52 = vld [vmem:[%s10354_s23 + $0x18] sm:$0xff] }
0x1226   : > { %8643 = vmatpush3.msra.mxu0 %v9860_v29 }
0x1227   : > { %8645 = vmatmul.mubr.msk.f32.vlgmr.msra.gmra.mxu0 %vm1078_vm3, %v4623_v53 }
0x12e2   : > { %v4534_v42 = vpop.f32.mrf.mxu0  ;;  %v4618_v43 = vpop.f32.mrf.mxu1 }
0x12e3   : > { %v4535_v44 = vadd.f32 %v4534_v42, %v4461_v40  ;;  %v4619_v45 = vadd.f32 %v4618_v43, %v4548_v41  ;;  %v10012_v41 = vld [vmem:[%s10354_s23 + $0x58] sm:$0xff]  ;;  %v10021_v43 = vld [vmem:[%s10354_s23 + $0x50] sm:$0xff] }
0x12e4   : > { %v8632_v46 = vpop.f32.mrf.mxu0  ;;  %v8639_v48 = vpop.f32.mrf.mxu1 }
0x12e5   : > { %v4727_v49 = vrot.slane %v4535_v44, %v4460_v37  ;;  %8648 = vmatpush3.msk.msra.mxu1 %vm4737_vm7, %v4619_v45  ;;  %v10029_v44 = vld [vmem:[%s10354_s23 + $0x48] sm:$0xff]  ;;  %v10036_v45 = vld [vmem:[%s10354_s23 + $0x40] sm:$0xff]  ;;  %v10052_v48 = vld [vmem:[%s10354_s23 + $0x30] sm:$0xff] }
0x12e6   : > { %8657 = vmatprep.subr.msk.mxu1 %vm899_vm1, %v4921_v12 }
0x12e7   : > { %v4728_v50 = vmul.f32 %v7620_v47, %v4727_v49  ;;  %v8646_v61 = vpop.f32.mrf.mxu0  ;;  %v10045_v47 = vld [vmem:[%s10354_s23 + $0x38] sm:$0xff]  ;;  %v10059_v49 = vld [vmem:[%s10354_s23 + $0x28] sm:$0xff] }
0x12e9   : > { %v4730_v51 = vsel %vm4729_vm8, %v4728_v50, 0.0  ;;  %v4708_v63 = vpop.f32.mrf.mxu0 }
0x12ea   : > { %4731 = vadd.xlane.f32.xlu1 %v4730_v51  ;;  %v10066_v51 = vld [vmem:[%s10354_s23 + $0x20] sm:$0xff] }
0x1373   : > { %v4732_v54 = vpop.xlane.xlu1 %4731 }
0x1374   : > { %8650 = vmatmul.mubr.msk.f32.vlgmr.msra.gmra.mxu1 %vm4733_vm9, %v4732_v54  ;;  %v10081_v54 = vld [vmem:[%s10354_s23 + $0x10] sm:$0xff] }
0x1375   : > { %8658 = vmatpush3.msk.msra.mxu1 %vm899_vm1, %v4921_v12 }
0x1376   : > { %8667 = vmatprep.subr.mxu1 %v8940_v14 }
0x1434   : > { %v4807_v55 = vpop.f32.mrf.mxu1 }
0x1435   : > { %v4811_v56 = vsel %vm4729_vm8, %v4807_v55, -inf }
0x1436   : > { %4812 = vmax.xlane.f32.xlu0 %v4811_v56  ;;  %v8651_v25 = vpop.f32.mrf.mxu1 }
0x1437   : > { %v10096_v25 = vld [vmem:[%s10354_s23] sm:$0xff] }
0x144c   : > { %4628 = vperm.xlu0 %8913, %v4624_v57  }
0x1450   : > { %8915 = vset.pattern.permute.xlu0 %v8942_v58 }
0x1451   : > { %6588 = vperm.xlu0 %8915, %v9860_v29  }
0x1455   : > { %8918 = vset.pattern.permute.xlu0 %v8939_v5 }
0x1456   : > { %6462 = vperm.xlu0 %8918, %v9858_v27  }
0x145a   : > { %8920 = vset.pattern.permute.xlu0 %v8943_v59 }
0x145b   : > { %7032 = vperm.xlu0 %8920, %v9860_v29  }
0x14bf   : > { %v4813_v26 = vpop.xlane.xlu0 %4812 }
0x14c0   : > { %v4814_v60 = vsub.f32 %v4807_v55, %v4813_v26  ;;  %v10088_v55 = vld [vmem:[%s10354_s23 + $0x8] sm:$0xff]  ;;  %v5007_v26 = vld [vmem:[%s10349_s18] sm:$0x7] }
0x14c2   : > { %v4815_v62 = vmul.f32 1.442695, %v4814_v60 }
0x14c4   : > { %8923 = vpow2.f32 %v4815_v62  ;;  %v7635_v62 = vld [vmem:[%s10349_s18 + $0x4] sm:$0x7] }
0x14c7   : > { %v4629_v0 = vpop.permute.xlu0 %4628 }
0x14c8   : > { %v4709_v1 = vadd.f32 %v4708_v63, %v4629_v0 }
0x14ca   : > { %8654 = vmatprep.mubr.msk.f32.mxu0 %vm4822_vm10, %v4709_v1  ;;  %v7642_v1 = vld [vmem:[%s10349_s18 + $0x8] sm:$0x7] }
0x14cc   : > { %v10039_v46 = vpop.permute.xlu0 %6588 }
0x14d1   : > { %v8924_v2 = vpop.eup %8923  ;;  %v6463_v50 = vpop.permute.xlu0 %6462 }
0x14d2   : > { %v4817_v34 = vsel %vm4729_vm8, %v8924_v2, 0.0  ;;  %v6472_v53 = vmul.f32 %v9992_v33, %v6463_v50 }
0x14d3   : > { %4818 = vadd.xlane.f32.xlu1 %v4817_v34 }
0x14d4   : > { %v6481_v56 = vadd.f32 %v10005_v39, %v6472_v53 }
0x14d6   : > { %v6483_v57 = vmax.f32 %v6481_v56, 0.0 }
0x14e4   : > { %4633 = vperm.xlu1 %8914, %v4625_v3   ;;  %v7649_v3 = vld [vmem:[%s10349_s18 + $0xc] sm:$0x7] }
0x14e8   : > { %4914 = vperm.xlu1 %8914, %v7626_v4  }
0x14ec   : > { %8916 = vset.pattern.permute.xlu1 %v8942_v58  ;;  %v5006_v58 = vld [vmem:[%s10350_s19] sm:$0x7] }
0x14ed   : > { %6592 = vperm.xlu1 %8916, %v9858_v27  }
0x14f1   : > { %8917 = vset.pattern.permute.xlu1 %v8939_v5 }
0x14f2   : > { %6458 = vperm.xlu1 %8917, %v9860_v29  }
0x14f6   : > { %8919 = vset.pattern.permute.xlu1 %v8944_v6 }
0x14f7   : > { %6850 = vperm.xlu1 %8919, %v9860_v29  }
0x14fb   : > { %6854 = vperm.xlu1 %8919, %v9858_v27  }
0x14ff   : > { %8921 = vset.pattern.permute.xlu1 %v8943_v59 }
0x1500   : > { %7036 = vperm.xlu1 %8921, %v9858_v27  }
0x1504   : > { %8922 = vset.pattern.permute.xlu1 %v8939_v5 }
0x1505   : > { %5171 = vperm.xlu1 %8922, %v5006_v58  }
0x155c   : > { %v4819_v7 = vpop.xlane.xlu1 %4818 }
0x155d   : > { %8925 = vrcp.f32 %v4819_v7  ;;  %v7656_v7 = vld [vmem:[%s10349_s18 + $0x10] sm:$0x7] }
0x1560   : > { %v4634_v10 = vpop.permute.xlu1 %4633 }
0x1561   : > { %v4714_v11 = vadd.f32 %v8646_v61, %v4634_v10  ;;  %v7663_v10 = vld [vmem:[%s10349_s18 + $0x14] sm:$0x7] }
0x1564   : > { %v4915_v13 = vpop.permute.xlu1 %4914 }
0x156a   : > { %v8926_v8 = vpop.eup %8925 }
0x156b   : > { %v4821_v9 = vmul.f32 %v8926_v8, %v8924_v2 }
0x156d   : > { %8652 = vmatprep.subr.msk.mxu0 %vm4822_vm10, %v4821_v9 }
0x156e   : > { %8653 = vmatpush3.xpose.msk.msra.mxu0 %vm4822_vm10, %v4821_v9 }
0x156f   : > { %8662 = vmatprep.subr.msk.mxu0 %vm899_vm1, %v5008_v19 }
0x1571   : > { %8655 = vmatmul.mubr.msk.f32.vlgmr.msra.gmra.mxu0 %vm4822_vm10, %v4714_v11 }
0x1572   : > { %8663 = vmatpush3.msk.msra.mxu0 %vm899_vm1, %v5008_v19 }
0x1573   : > { %8674 = vmatprep.subr.msk.mxu0 %vm899_vm1, %v7636_v20 }
0x1631   : > { %v8656_v5 = vpop.f32.mrf.mxu0 }
0x1632   : > { %v4918_v15 = vmul.f32 %v8656_v5, %v4915_v13  ;;  %v7670_v5 = vld [vmem:[%s10349_s18 + $0x18] sm:$0x7] }
0x1633   : > { %v4898_v16 = vpop.f32.mrf.mxu0 }
0x1634   : > { %v4917_v17 = vmul.f32 %v4915_v13, %v4898_v16  ;;  %v4920_v18 = vadd.f32 %v4918_v15, %v9858_v27  ;;  %v7657_v27 = vld [vmem:[%s10351_s20 + $0x10] sm:$0xf]  ;;  %v6595_v15 = vmul.f32 %v9992_v33, %v10039_v46 }
0x1636   : > { %v4919_v35 = vadd.f32 %v4917_v17, %v9860_v29  ;;  %v9973_v29 = vpop.permute.xlu1 %6592  ;;  %v7677_v17 = vld [vmem:[%s10349_s18 + $0x1c] sm:$0x7] }
0x1638   : > { %8659 = vmatprep.mubr.msk.f32.mxu1 %vm4822_vm10, %v4919_v35 }
0x1639   : > { %8660 = vmatmul.mubr.msk.f32.vlgmr.msra.gmra.mxu1 %vm4822_vm10, %v4920_v18  ;;  %v6597_v18 = vadd.f32 %v10005_v39, %v6595_v15 }
0x163a   : > { %8671 = vmatprep.mubr.msk.f32.mxu1 %vm8941_vm5, %v8940_v14  ;;  %v6459_v32 = vpop.permute.xlu1 %6458 }
0x163b   : > { %v6471_v37 = vmul.f32 %v9992_v33, %v6459_v32 }
0x163d   : > { %v6480_v40 = vadd.f32 %v10005_v39, %v6471_v37 }
0x163e   : > { %v6851_v46 = vpop.permute.xlu1 %6850 }
0x163f   : > { %v6482_v42 = vmax.f32 %v6480_v40, 0.0 }
0x1642   : > { %v10232_v53 = vpop.permute.xlu1 %6854 }
0x16f9   : > { %v8661_v21 = vpop.f32.mrf.mxu1 }
0x16fb   : > { %v4997_v22 = vpop.f32.mrf.mxu1 }
0x16fc   : > { %8664 = vmatprep.mubr.msk.f32.mxu0 %vm4822_vm10, %v4997_v22 }
0x16fd   : > { %8665 = vmatmul.mubr.msk.f32.vlgmr.msra.gmra.mxu0 %vm4822_vm10, %v8661_v21 }
0x16fe   : > { %8675 = vmatpush3.msk.msra.mxu0 %vm899_vm1, %v7636_v20  ;;  %8676 = vmatprep.mubr.msk.f32.mxu0 %vm4822_vm10, %v4997_v22  ;;  %v7684_v20 = vld [vmem:[%s10349_s18 + $0x20] sm:$0x7] }
0x16ff   : > { %8686 = vmatprep.subr.msk.mxu0 %vm899_vm1, %v7643_v23 }
0x1701   : > { %8677 = vmatmul.mubr.msk.f32.vlgmr.msra.gmra.mxu0 %vm4822_vm10, %v8661_v21 }
0x1702   : > { %8687 = vmatpush3.msk.msra.mxu0 %vm899_vm1, %v7643_v23  ;;  %8688 = vmatprep.mubr.msk.f32.mxu0 %vm4822_vm10, %v4997_v22  ;;  %v6596_v23 = vmul.f32 %v9992_v33, %v9973_v29  ;;  %v6586_v29 = vld [vmem:[%s10356_s25] sm:$0xff] }
0x1703   : > { %8698 = vmatprep.subr.msk.mxu0 %vm899_vm1, %v7650_v24 }
0x1705   : > { %8689 = vmatmul.mubr.msk.f32.vlgmr.msra.gmra.mxu0 %vm4822_vm10, %v8661_v21 }
0x1706   : > { %8699 = vmatpush3.msk.msra.mxu0 %vm899_vm1, %v7650_v24  ;;  %8700 = vmatprep.mubr.msk.f32.mxu0 %vm4822_vm10, %v4997_v22  ;;  %v6598_v24 = vadd.f32 %v10005_v39, %v6596_v23 }
0x1707   : > { %8710 = vmatprep.subr.msk.mxu0 %vm899_vm1, %v7657_v27 }
0x1709   : > { %8701 = vmatmul.mubr.msk.f32.vlgmr.msra.gmra.mxu0 %vm4822_vm10, %v8661_v21 }
0x170a   : > { %8711 = vmatpush3.msk.msra.mxu0 %vm899_vm1, %v7657_v27  ;;  %8712 = vmatprep.mubr.msk.f32.mxu0 %vm4822_vm10, %v4997_v22  ;;  %v10213_v27 = vld [vmem:[%s10355_s24] ss:$0 sm:$0xff] }
0x170b   : > { %8722 = vmatprep.subr.msk.mxu0 %vm899_vm1, %v7664_v28 }
0x170d   : > { %8713 = vmatmul.mubr.msk.f32.vlgmr.msra.gmra.mxu0 %vm4822_vm10, %v8661_v21 }
0x170e   : > { %8723 = vmatpush3.msk.msra.mxu0 %vm899_vm1, %v7664_v28  ;;  %8724 = vmatprep.mubr.msk.f32.mxu0 %vm4822_vm10, %v4997_v22 }
0x170f   : > { %8734 = vmatprep.subr.msk.mxu0 %vm899_vm1, %v7671_v30 }
0x1711   : > { %8725 = vmatmul.mubr.msk.f32.vlgmr.msra.gmra.mxu0 %vm4822_vm10, %v8661_v21 }
0x1712   : > { %8735 = vmatpush3.msk.msra.mxu0 %vm899_vm1, %v7671_v30  ;;  %8736 = vmatprep.mubr.msk.f32.mxu0 %vm4822_vm10, %v4997_v22  ;;  %v6600_v30 = vmax.f32 %v6598_v24, 0.0 }
0x1713   : > { %8746 = vmatprep.subr.msk.mxu0 %vm899_vm1, %v7678_v31 }
0x1715   : > { %8737 = vmatmul.mubr.msk.f32.vlgmr.msra.gmra.mxu0 %vm4822_vm10, %v8661_v21 }
0x1716   : > { %8747 = vmatpush3.msk.msra.mxu0 %vm899_vm1, %v7678_v31  ;;  %8748 = vmatprep.mubr.msk.f32.mxu0 %vm4822_vm10, %v4997_v22 }
0x1717   : > { %8758 = vmatprep.subr.msk.mxu0 %vm899_vm1, %v7685_v38 }
0x1719   : > { %8749 = vmatmul.mubr.msk.f32.vlgmr.msra.gmra.mxu0 %vm4822_vm10, %v8661_v21 }
0x171a   : > { %8759 = vmatpush3.msk.msra.mxu0 %vm899_vm1, %v7685_v38  ;;  %8760 = vmatprep.mubr.msk.f32.mxu0 %vm4822_vm10, %v4997_v22  ;;  %v6599_v22 = vmax.f32 %v6597_v18, 0.0 }
0x171b   : > { %8770 = vmatprep.subr.mxu0 %v10012_v41 }
0x171d   : > { %8761 = vmatmul.mubr.msk.f32.vlgmr.msra.gmra.mxu0 %vm4822_vm10, %v8661_v21 }
0x171e   : > { %8771 = vmatpush3.msra.mxu0 %v10012_v41  ;;  %8794 = vmatprep.mubr.msk.f32.mxu0 %vm996_vm2, %v6482_v42  ;;  %v7699_v42 = vld [vmem:[%s10356_s25 + $0x8] sm:$0xff] }
0x171f   : > { %8772 = vmatprep.subr.mxu0 %v10021_v43 }
0x1720   : > { %8773 = vmatpush3.msra.mxu0 %v10021_v43 }
0x1721   : > { %8774 = vmatprep.subr.mxu0 %v10029_v44 }
0x1722   : > { %8775 = vmatpush3.msra.mxu0 %v10029_v44 }
0x1723   : > { %8776 = vmatprep.subr.mxu0 %v10036_v45 }
0x1724   : > { %8777 = vmatpush3.msra.mxu0 %v10036_v45 }
0x1725   : > { %8778 = vmatprep.subr.mxu0 %v10045_v47 }
0x1726   : > { %8779 = vmatpush3.msra.mxu0 %v10045_v47 }
0x1727   : > { %8780 = vmatprep.subr.mxu0 %v10052_v48 }
0x1728   : > { %8781 = vmatpush3.msra.mxu0 %v10052_v48 }
0x1729   : > { %8782 = vmatprep.subr.mxu0 %v10059_v49 }
0x172a   : > { %8783 = vmatpush3.msra.mxu0 %v10059_v49 }
0x172b   : > { %8784 = vmatprep.subr.mxu0 %v10066_v51 }
0x172c   : > { %8785 = vmatpush3.msra.mxu0 %v10066_v51 }
0x172d   : > { %8786 = vmatprep.subr.mxu0 %v10073_v52 }
0x172e   : > { %8787 = vmatpush3.msra.mxu0 %v10073_v52 }
0x172f   : > { %8788 = vmatprep.subr.mxu0 %v10081_v54 }
0x1730   : > { %8789 = vmatpush3.msra.mxu0 %v10081_v54 }
0x1731   : > { %8790 = vmatprep.subr.mxu0 %v10088_v55 }
0x1732   : > { %8791 = vmatpush3.msra.mxu0 %v10088_v55 }
0x1733   : > { %8792 = vmatprep.subr.mxu0 %v10096_v25 }
0x1734   : > { %8793 = vmatpush3.msra.mxu0 %v10096_v25 }
0x1735   : > { %8795 = vmatmul.mubr.msk.f32.vlgmr.msra.gmra.mxu0 %vm996_vm2, %v6483_v57  ;;  %8824 = vmatprep.subr.mxu0 %v7699_v42 }
0x1736   : > { %8825 = vmatpush3.msra.mxu0 %v7699_v42 }
0x1737   : > { %8834 = vmatprep.subr.mxu0 %v10012_v41 }
0x17bd   : > { %v8666_v59 = vpop.f32.mrf.mxu0 }
0x17be   : > { %8668 = vmatpush3.msk.msra.mxu1 %vm899_vm1, %v8666_v59  ;;  %v10234_v59 = vpop.permute.xlu1 %7036 }
0x17bf   : > { %v5084_v60 = vpop.f32.mrf.mxu0  ;;  %8669 = vmatprep.subr.mxu1 %v8940_v14 }
0x17c0   : > { %8670 = vmatpush3.msra.mxu1 %v5084_v60 }
0x17c1   : > { %8672 = vmatmul.mubr.msk.f32.vlgmr.msra.gmra.mxu1 %vm1078_vm3, %v5007_v26  ;;  %v8678_v61 = vpop.f32.mrf.mxu0  ;;  %8679 = vmatprep.subr.mxu1 %v8940_v14 }
0x17c2   : > { %8680 = vmatpush3.msk.msra.mxu1 %vm899_vm1, %v8678_v61  ;;  %8683 = vmatprep.mubr.msk.f32.mxu1 %vm8941_vm5, %v8940_v14  ;;  %v5172_v61 = vpop.permute.xlu1 %5171 }
0x17c3   : > { %v5248_v63 = vpop.f32.mrf.mxu0  ;;  %8681 = vmatprep.subr.mxu1 %v8940_v14 }
0x17c4   : > { %8682 = vmatpush3.msra.mxu1 %v5248_v63 }
0x17c5   : > { %8684 = vmatmul.mubr.msk.f32.vlgmr.msra.gmra.mxu1 %vm1078_vm3, %v7635_v62  ;;  %v8690_v0 = vpop.f32.mrf.mxu0  ;;  %8691 = vmatprep.subr.mxu1 %v8940_v14 }
0x17c6   : > { %8692 = vmatpush3.msk.msra.mxu1 %vm899_vm1, %v8690_v0  ;;  %8695 = vmatprep.mubr.msk.f32.mxu1 %vm8941_vm5, %v8940_v14 }
0x17c7   : > { %v5407_v2 = vpop.f32.mrf.mxu0  ;;  %8693 = vmatprep.subr.mxu1 %v8940_v14 }
0x17c8   : > { %8694 = vmatpush3.msra.mxu1 %v5407_v2 }
0x17c9   : > { %8696 = vmatmul.mubr.msk.f32.vlgmr.msra.gmra.mxu1 %vm1078_vm3, %v7642_v1  ;;  %v8702_v34 = vpop.f32.mrf.mxu0  ;;  %8703 = vmatprep.subr.mxu1 %v8940_v14 }
0x17ca   : > { %8704 = vmatpush3.msk.msra.mxu1 %vm899_vm1, %v8702_v34  ;;  %8707 = vmatprep.mubr.msk.f32.mxu1 %vm8941_vm5, %v8940_v14 }
0x17cb   : > { %v5566_v4 = vpop.f32.mrf.mxu0  ;;  %8705 = vmatprep.subr.mxu1 %v8940_v14 }
0x17cc   : > { %8706 = vmatpush3.msra.mxu1 %v5566_v4 }
0x17cd   : > { %8708 = vmatmul.mubr.msk.f32.vlgmr.msra.gmra.mxu1 %vm1078_vm3, %v7649_v3  ;;  %v8714_v6 = vpop.f32.mrf.mxu0  ;;  %8715 = vmatprep.subr.mxu1 %v8940_v14 }
0x17ce   : > { %8716 = vmatpush3.msk.msra.mxu1 %vm899_vm1, %v8714_v6  ;;  %8719 = vmatprep.mubr.msk.f32.mxu1 %vm8941_vm5, %v8940_v14 }
0x17cf   : > { %v5725_v8 = vpop.f32.mrf.mxu0  ;;  %8717 = vmatprep.subr.mxu1 %v8940_v14 }
0x17d0   : > { %8718 = vmatpush3.msra.mxu1 %v5725_v8 }
0x17d1   : > { %8720 = vmatmul.mubr.msk.f32.vlgmr.msra.gmra.mxu1 %vm1078_vm3, %v7656_v7  ;;  %v8726_v9 = vpop.f32.mrf.mxu0  ;;  %8727 = vmatprep.subr.mxu1 %v8940_v14 }
0x17d2   : > { %8728 = vmatpush3.msk.msra.mxu1 %vm899_vm1, %v8726_v9  ;;  %8731 = vmatprep.mubr.msk.f32.mxu1 %vm8941_vm5, %v8940_v14 }
0x17d3   : > { %v5884_v11 = vpop.f32.mrf.mxu0  ;;  %8729 = vmatprep.subr.mxu1 %v8940_v14 }
0x17d4   : > { %8730 = vmatpush3.msra.mxu1 %v5884_v11 }
0x17d5   : > { %8732 = vmatmul.mubr.msk.f32.vlgmr.msra.gmra.mxu1 %vm1078_vm3, %v7663_v10  ;;  %v8738_v12 = vpop.f32.mrf.mxu0  ;;  %8739 = vmatprep.subr.mxu1 %v8940_v14 }
0x17d6   : > { %8740 = vmatpush3.msk.msra.mxu1 %vm899_vm1, %v8738_v12  ;;  %8743 = vmatprep.mubr.msk.f32.mxu1 %vm8941_vm5, %v8940_v14 }
0x17d7   : > { %v6043_v13 = vpop.f32.mrf.mxu0  ;;  %8741 = vmatprep.subr.mxu1 %v8940_v14 }
0x17d8   : > { %8742 = vmatpush3.msra.mxu1 %v6043_v13 }
0x17d9   : > { %8744 = vmatmul.mubr.msk.f32.vlgmr.msra.gmra.mxu1 %vm1078_vm3, %v7670_v5  ;;  %v8750_v16 = vpop.f32.mrf.mxu0  ;;  %8751 = vmatprep.subr.mxu1 %v8940_v14 }
0x17da   : > { %8752 = vmatpush3.msk.msra.mxu1 %vm899_vm1, %v8750_v16  ;;  %8755 = vmatprep.mubr.msk.f32.mxu1 %vm8941_vm5, %v8940_v14 }
0x17db   : > { %v6202_v35 = vpop.f32.mrf.mxu0  ;;  %8753 = vmatprep.subr.mxu1 %v8940_v14 }
0x17dc   : > { %8754 = vmatpush3.msra.mxu1 %v6202_v35 }
0x17dd   : > { %8756 = vmatmul.mubr.msk.f32.vlgmr.msra.gmra.mxu1 %vm1078_vm3, %v7677_v17  ;;  %v8762_v19 = vpop.f32.mrf.mxu0  ;;  %8763 = vmatprep.subr.mxu1 %v8940_v14 }
0x17de   : > { %8764 = vmatpush3.msk.msra.mxu1 %vm899_vm1, %v8762_v19  ;;  %8767 = vmatprep.mubr.msk.f32.mxu1 %vm8941_vm5, %v8940_v14 }
0x17df   : > { %v6361_v21 = vpop.f32.mrf.mxu0  ;;  %8765 = vmatprep.subr.mxu1 %v8940_v14 }
0x17e0   : > { %8766 = vmatpush3.msra.mxu1 %v6361_v21  ;;  %v6857_v21 = vmul.f32 %v9992_v33, %v6851_v46  ;;  %v7033_v46 = vpop.permute.xlu0 %7032 }
0x17e1   : > { %8768 = vmatmul.mubr.msk.f32.vlgmr.msra.gmra.mxu1 %vm1078_vm3, %v7684_v20  ;;  %8797 = vmatprep.subr.mxu1 %v10012_v41 }
0x17e2   : > { %8798 = vmatpush3.msra.mxu1 %v10012_v41  ;;  %8821 = vmatprep.mubr.msk.f32.mxu1 %vm996_vm2, %v6599_v22 }
0x17e3   : > { %8799 = vmatprep.subr.mxu1 %v10021_v43 }
0x17e4   : > { %8800 = vmatpush3.msra.mxu1 %v10021_v43 }
0x17e5   : > { %8801 = vmatprep.subr.mxu1 %v10029_v44 }
0x17e6   : > { %8802 = vmatpush3.msra.mxu1 %v10029_v44 }
0x17e7   : > { %8803 = vmatprep.subr.mxu1 %v10036_v45 }
0x17e8   : > { %8804 = vmatpush3.msra.mxu1 %v10036_v45 }
0x17e9   : > { %8805 = vmatprep.subr.mxu1 %v10045_v47 }
0x17ea   : > { %8806 = vmatpush3.msra.mxu1 %v10045_v47 }
0x17eb   : > { %8807 = vmatprep.subr.mxu1 %v10052_v48 }
0x17ec   : > { %8808 = vmatpush3.msra.mxu1 %v10052_v48 }
0x17ed   : > { %8809 = vmatprep.subr.mxu1 %v10059_v49 }
0x17ee   : > { %8810 = vmatpush3.msra.mxu1 %v10059_v49 }
0x17ef   : > { %8811 = vmatprep.subr.mxu1 %v10066_v51 }
0x17f0   : > { %8812 = vmatpush3.msra.mxu1 %v10066_v51 }
0x17f1   : > { %8813 = vmatprep.subr.mxu1 %v10073_v52 }
0x17f2   : > { %8814 = vmatpush3.msra.mxu1 %v10073_v52 }
0x17f3   : > { %8815 = vmatprep.subr.mxu1 %v10081_v54 }
0x17f4   : > { %8816 = vmatpush3.msra.mxu1 %v10081_v54 }
0x17f5   : > { %v8796_v28 = vpop.f32.mrf.mxu0  ;;  %8817 = vmatprep.subr.mxu1 %v10088_v55 }
0x17f6   : > { %8818 = vmatpush3.msra.mxu1 %v10088_v55  ;;  %v6581_v31 = vadd.f32 %v8796_v28, %v10213_v27  ;;  %v6859_v28 = vadd.f32 %v10005_v39, %v6857_v21 }
0x17f7   : > { %v6575_v32 = vpop.f32.mrf.mxu0  ;;  %8819 = vmatprep.subr.mxu1 %v10096_v25 }
0x17f8   : > { %v6576_v37 = vadd.f32 %v10213_v27, %v6575_v32  ;;  %8820 = vmatpush3.msra.mxu1 %v10096_v25  ;;  %v6585_v40 = vmax.f32 %v6581_v31, 0.0  ;;  %v6861_v32 = vmax.f32 %v6859_v28, 0.0 }
0x17f9   : > { %8822 = vmatmul.mubr.msk.f32.vlgmr.msra.gmra.mxu1 %vm996_vm2, %v6600_v30  ;;  %8829 = vmatprep.subr.mxu1 %v6586_v29 }
0x17fa   : > { %v6584_v38 = vmax.f32 %v6576_v37, 0.0  ;;  %8830 = vmatpush3.msra.mxu1 %v6586_v29 }
0x17fc   : > { %8831 = vmatprep.mubr.msk.f32.mxu1 %vm6686_vm11, %v6584_v38 }
0x17fd   : > { %8832 = vmatmul.mubr.msk.f32.vlgmr.msra.gmra.mxu1 %vm6686_vm11, %v6585_v40  ;;  %v7706_v40 = vld [vmem:[%s10356_s25 + $0x10] sm:$0xff] }
0x17fe   : > { %8861 = vmatprep.subr.mxu1 %v7706_v40 }
0x17ff   : > { %8862 = vmatpush3.msra.mxu1 %v7706_v40 }
0x1800   : > { %8866 = vmatprep.subr.mxu1 %v10012_v41 }
0x1881   : > { %v5165_v50 = vpop.f32.mrf.mxu1 }
0x1882   : > { %v5174_v0 = vadd.f32 %v5172_v61, %v5165_v50 }
0x1883   : > { %v8673_v56 = vpop.f32.mrf.mxu1 }
0x1885   : > { %v5329_v57 = vpop.f32.mrf.mxu1 }
0x1886   : > { %v5333_v34 = vadd.f32 %v5329_v57, %v5174_v0 }
0x1887   : > { %v8685_v58 = vpop.f32.mrf.mxu1 }
0x1889   : > { %v5488_v26 = vpop.f32.mrf.mxu1 }
0x188a   : > { %v5492_v4 = vadd.f32 %v5488_v26, %v5333_v34 }
0x188b   : > { %v8697_v60 = vpop.f32.mrf.mxu1 }
0x188d   : > { %v5647_v62 = vpop.f32.mrf.mxu1 }
0x188e   : > { %v5651_v7 = vadd.f32 %v5647_v62, %v5492_v4 }
0x188f   : > { %v8709_v63 = vpop.f32.mrf.mxu1 }
0x1891   : > { %v5806_v1 = vpop.f32.mrf.mxu1 }
0x1892   : > { %v5810_v9 = vadd.f32 %v5806_v1, %v5651_v7 }
0x1893   : > { %v8721_v2 = vpop.f32.mrf.mxu1 }
0x1895   : > { %v5965_v3 = vpop.f32.mrf.mxu1 }
0x1896   : > { %v5969_v11 = vadd.f32 %v5965_v3, %v5810_v9 }
0x1897   : > { %v8733_v6 = vpop.f32.mrf.mxu1 }
0x1899   : > { %v6124_v8 = vpop.f32.mrf.mxu1 }
0x189a   : > { %v6128_v5 = vadd.f32 %v6124_v8, %v5969_v11 }
0x189b   : > { %v8745_v10 = vpop.f32.mrf.mxu1 }
0x189d   : > { %v6283_v12 = vpop.f32.mrf.mxu1 }
0x189e   : > { %v6287_v15 = vadd.f32 %v6283_v12, %v6128_v5 }
0x189f   : > { %v8757_v13 = vpop.f32.mrf.mxu1 }
0x18a1   : > { %v6442_v16 = vpop.f32.mrf.mxu1 }
0x18a2   : > { %v6446_v17 = vadd.f32 %v6442_v16, %v6287_v15 }
0x18a3   : > { %v8769_v35 = vpop.f32.mrf.mxu1 }
0x18a4   : > { %v6447_v18 = vmax.f32 %v6446_v17, 0.0 }
0x18a6   : > { %8927 = vtanh.f32 %v6447_v18  ;;  %6453 = vst.msk [vmem:[%s872_s13] sm:$0x7] %vm6452_vm12, %v6447_v18  ;;  %s7716_s13 = sshll.u32 %s10400_s11, 4 }
0x18b3   : > { %v8928_v19 = vpop.eup %8927 }
0x18b4   : > { %vm6449_vm13 = vcmp.gt.f32.partialorder %v8928_v19, 0.4 }
0x18b5   : > { %v7691_v20 = vsel %vm6449_vm13, 1.0, %v8940_v14  ;;  %v6858_v14 = vmul.f32 %v9992_v33, %v10232_v53  ;;  %v7039_v53 = vmul.f32 %v9992_v33, %v7033_v46 }
0x18b6   : > { %6454 = vst.msk [vmem:[%s868_s16] sm:$0x7] %vm6452_vm12, %v7691_v20  ;;  %s864_s16 = scalar_lea.vmem %s10357_s26, %s7716_s13 }
0x18b7   : > { %v6860_v37 = vadd.f32 %v10005_v39, %v6858_v14  ;;  %v7041_v26 = vadd.f32 %v10005_v39, %v7039_v53 }
0x18b9   : > { %v8823_v22 = vpop.f32.mrf.mxu1  ;;  %v6862_v38 = vmax.f32 %v6860_v37, 0.0  ;;  %v7043_v63 = vmax.f32 %v7041_v26, 0.0 }
0x18ba   : > { %v6679_v23 = vadd.f32 %v8823_v22, %v10213_v27 }
0x18bb   : > { %v6673_v24 = vpop.f32.mrf.mxu1 }
0x18bc   : > { %v6674_v29 = vadd.f32 %v10213_v27, %v6673_v24  ;;  %v6683_v31 = vmax.f32 %v6679_v23, 0.0 }
0x18be   : > { %v6682_v30 = vmax.f32 %v6674_v29, 0.0 }
0x18c0   : > { %8826 = vmatprep.mubr.msk.f32.mxu0 %vm6686_vm11, %v6682_v30 }
0x18c1   : > { %8827 = vmatmul.mubr.msk.f32.vlgmr.msra.gmra.mxu0 %vm6686_vm11, %v6683_v31 }
0x18c2   : > { %8835 = vmatpush3.msra.mxu0 %v10012_v41  ;;  %8858 = vmatprep.mubr.msk.f32.mxu0 %vm996_vm2, %v6861_v32 }
0x18c3   : > { %8836 = vmatprep.subr.mxu0 %v10021_v43 }
0x18c4   : > { %8837 = vmatpush3.msra.mxu0 %v10021_v43 }
0x18c5   : > { %8838 = vmatprep.subr.mxu0 %v10029_v44 }
0x18c6   : > { %8839 = vmatpush3.msra.mxu0 %v10029_v44 }
0x18c7   : > { %8840 = vmatprep.subr.mxu0 %v10036_v45 }
0x18c8   : > { %8841 = vmatpush3.msra.mxu0 %v10036_v45 }
0x18c9   : > { %8842 = vmatprep.subr.mxu0 %v10045_v47 }
0x18ca   : > { %8843 = vmatpush3.msra.mxu0 %v10045_v47 }
0x18cb   : > { %8844 = vmatprep.subr.mxu0 %v10052_v48 }
0x18cc   : > { %8845 = vmatpush3.msra.mxu0 %v10052_v48 }
0x18cd   : > { %8846 = vmatprep.subr.mxu0 %v10059_v49 }
0x18ce   : > { %8847 = vmatpush3.msra.mxu0 %v10059_v49 }
0x18cf   : > { %8848 = vmatprep.subr.mxu0 %v10066_v51 }
0x18d0   : > { %8849 = vmatpush3.msra.mxu0 %v10066_v51 }
0x18d1   : > { %8850 = vmatprep.subr.mxu0 %v10073_v52 }
0x18d2   : > { %8851 = vmatpush3.msra.mxu0 %v10073_v52 }
0x18d3   : > { %8852 = vmatprep.subr.mxu0 %v10081_v54 }
0x18d4   : > { %8853 = vmatpush3.msra.mxu0 %v10081_v54 }
0x18d5   : > { %8854 = vmatprep.subr.mxu0 %v10088_v55 }
0x18d6   : > { %8855 = vmatpush3.msra.mxu0 %v10088_v55 }
0x18d7   : > { %8856 = vmatprep.subr.mxu0 %v10096_v25 }
0x18d8   : > { %8857 = vmatpush3.msra.mxu0 %v10096_v25 }
0x18d9   : > { %8859 = vmatmul.mubr.msk.f32.vlgmr.msra.gmra.mxu0 %vm996_vm2, %v6862_v38 }
0x1981   : > { %v8828_v42 = vpop.f32.mrf.mxu0 }
0x1983   : > { %v6759_v50 = vpop.f32.mrf.mxu0 }
0x1999   : > { %v8860_v56 = vpop.f32.mrf.mxu0 }
0x199a   : > { %v6941_v57 = vadd.f32 %v8860_v56, %v10213_v27 }
0x199b   : > { %v6935_v58 = vpop.f32.mrf.mxu0 }
0x199c   : > { %v6936_v60 = vadd.f32 %v10213_v27, %v6935_v58  ;;  %v6945_v62 = vmax.f32 %v6941_v57, 0.0 }
0x199e   : > { %v6944_v61 = vmax.f32 %v6936_v60, 0.0 }
0x19a0   : > { %8863 = vmatprep.mubr.msk.f32.mxu1 %vm6686_vm11, %v6944_v61 }
0x19a1   : > { %8864 = vmatmul.mubr.msk.f32.vlgmr.msra.gmra.mxu1 %vm6686_vm11, %v6945_v62 }
0x19a2   : > { %8867 = vmatpush3.msra.mxu1 %v10012_v41  ;;  %8890 = vmatprep.mubr.msk.f32.mxu1 %vm996_vm2, %v7043_v63  ;;  %v7040_v41 = vmul.f32 %v9992_v33, %v10234_v59  ;;  %v7711_v33 = vld [vmem:[%s10356_s25 + $0x18] sm:$0xff] }
0x19a3   : > { %8868 = vmatprep.subr.mxu1 %v10021_v43  ;;  %8893 = vmatprep.subr.mxu0 %v7711_v33 }
0x19a4   : > { %8869 = vmatpush3.msra.mxu1 %v10021_v43  ;;  %v7042_v43 = vadd.f32 %v10005_v39, %v7040_v41  ;;  %8894 = vmatpush3.msra.mxu0 %v7711_v33  ;;  %v8833_v39 = vpop.f32.mrf.mxu1 }
0x19a5   : > { %8870 = vmatprep.subr.mxu1 %v10029_v44 }
0x19a6   : > { %8871 = vmatpush3.msra.mxu1 %v10029_v44  ;;  %v7044_v44 = vmax.f32 %v7042_v43, 0.0 }
0x19a7   : > { %8872 = vmatprep.subr.mxu1 %v10036_v45 }
0x19a8   : > { %8873 = vmatpush3.msra.mxu1 %v10036_v45  ;;  %v6840_v45 = vpop.f32.mrf.mxu1 }
0x19a9   : > { %8874 = vmatprep.subr.mxu1 %v10045_v47 }
0x19aa   : > { %8875 = vmatpush3.msra.mxu1 %v10045_v47  ;;  %v6846_v47 = vadd.f32 %v8833_v39, %v8828_v42 }
0x19ab   : > { %8876 = vmatprep.subr.mxu1 %v10052_v48 }
0x19ac   : > { %8877 = vmatpush3.msra.mxu1 %v10052_v48 }
0x19ad   : > { %8878 = vmatprep.subr.mxu1 %v10059_v49 }
0x19ae   : > { %8879 = vmatpush3.msra.mxu1 %v10059_v49  ;;  %v6841_v49 = vadd.f32 %v6840_v45, %v6759_v50 }
0x19af   : > { %8880 = vmatprep.subr.mxu1 %v10066_v51 }
0x19b0   : > { %8881 = vmatpush3.msra.mxu1 %v10066_v51 }
0x19b1   : > { %8882 = vmatprep.subr.mxu1 %v10073_v52 }
0x19b2   : > { %8883 = vmatpush3.msra.mxu1 %v10073_v52 }
0x19b3   : > { %8884 = vmatprep.subr.mxu1 %v10081_v54 }
0x19b4   : > { %8885 = vmatpush3.msra.mxu1 %v10081_v54 }
0x19b5   : > { %8886 = vmatprep.subr.mxu1 %v10088_v55 }
0x19b6   : > { %8887 = vmatpush3.msra.mxu1 %v10088_v55 }
0x19b7   : > { %8888 = vmatprep.subr.mxu1 %v10096_v25 }
0x19b8   : > { %8889 = vmatpush3.msra.mxu1 %v10096_v25 }
0x19b9   : > { %8891 = vmatmul.mubr.msk.f32.vlgmr.msra.gmra.mxu1 %vm996_vm2, %v7044_v44 }
0x1a61   : > { %v8865_v48 = vpop.f32.mrf.mxu1 }
0x1a62   : > { %v7030_v51 = vadd.f32 %v8865_v48, %v6846_v47 }
0x1a63   : > { %v7020_v52 = vpop.f32.mrf.mxu1 }
0x1a64   : > { %v7029_v54 = vadd.f32 %v7020_v52, %v6841_v49 }
0x1a79   : > { %v8892_v55 = vpop.f32.mrf.mxu1 }
0x1a7a   : > { %v7123_v25 = vadd.f32 %v8892_v55, %v10213_v27 }
0x1a7b   : > { %v7117_v59 = vpop.f32.mrf.mxu1 }
0x1a7c   : > { %v7118_v0 = vadd.f32 %v10213_v27, %v7117_v59  ;;  %v7127_v2 = vmax.f32 %v7123_v25, 0.0 }
0x1a7e   : > { %v7126_v1 = vmax.f32 %v7118_v0, 0.0 }
0x1a80   : > { %8895 = vmatprep.mubr.msk.f32.mxu0 %vm6686_vm11, %v7126_v1 }
0x1a81   : > { %8896 = vmatmul.mubr.msk.f32.vlgmr.msra.gmra.mxu0 %vm6686_vm11, %v7127_v2 }
0x1b41   : > { %v8897_v34 = vpop.f32.mrf.mxu0 }
0x1b42   : > { %v7212_v3 = vadd.f32 %v8897_v34, %v7030_v51 }
0x1b43   : > { %v7202_v4 = vpop.f32.mrf.mxu0 }
0x1b44   : > { %v7219_v6 = vmax.f32 %v7212_v3, 0.0  ;;  %v7211_v7 = vadd.f32 %v7202_v4, %v7029_v54 }
0x1b46   : > { %7223 = vst.msk [vmem:[%s864_s16 + $0x8] sm:$0xf] %vm4729_vm8, %v7219_v6  ;;  %8929 = vtanh.f32 %v7211_v7  ;;  %v7218_v27 = vmax.f32 %v7211_v7, 0.0 }
0x1b53   : > { %v8930_v8 = vpop.eup %8929 }
0x1b54   : > { %v7220_v9 = vsel %vm7214_vm14, %v8930_v8, %v7218_v27 }
0x1b55   : > { %7222 = vst.msk [vmem:[%s864_s16] sm:$0xff] %vm4822_vm10, %v7220_v9 }
0x1b56 PF: > { %s45_s0 = sadd.s32 1, %s8937_s0  }
0x1b57   : > { %p42_p4 = scmp.ge.s32.totalorder %s45_s0, 4  }
0x1b59   :  { %44 = sbr.rel (!%p42_p4) target bundleno = 22 (0x16), region = 232 }

</bundles_post_ra>
